<compile_context>
chip_gen: v5e
topology: v5e:2x2
jax: 0.10.0
libtpu: 0.0.40
codegen_flags: <defaults>
</compile_context>

<pallas_src>
import functools

import jax
import jax.numpy as jnp
from jax.experimental import pallas as pl
from jax.experimental.pallas import tpu as pltpu


# ---------------------------------------------------------------------------
# Fused kernel: one grid step == one batch element.
# ---------------------------------------------------------------------------
def fused_kernel(patches_ref, sc_ref, feat_ref, attn_ref, lstm_ref, fc_ref,
                 o_ref, *, T, P, E, Hl, FC, Kpad):
    f32 = jnp.float32
    bf16 = jnp.bfloat16

    # --- CNN stand-in: per-frame conv-as-matmul + ReLU + global avg pool -----
    w_conv = feat_ref[0:Kpad, :]                                   # (Kpad, E) bf16
    b_conv = feat_ref[Kpad:Kpad + 1, :].astype(f32)                # (1, E)
    feat_rows = []
    for t in range(T):                       # static T, bounds live (P,E) range
        pt = patches_ref[0, t * P:(t + 1) * P, :]                  # (P, Kpad) bf16
        yt = jnp.dot(pt, w_conv, preferred_element_type=f32)       # (P, E) f32
        yt = jnp.maximum(yt + b_conv, 0.0)
        feat_rows.append(jnp.sum(yt, axis=0, keepdims=True))       # (1, E)
    feats = jnp.concatenate(feat_rows, axis=0) * (1.0 / float(P))  # (T, E)

    # --- speed_fc(speed), broadcast over time --------------------------------
    w_sp = feat_ref[Kpad + 1:Kpad + 2, :].astype(f32)              # (1, E)
    b_sp = feat_ref[Kpad + 2:Kpad + 3, :].astype(f32)              # (1, E)
    speed = sc_ref[0, :, 0:1]                                      # (1, 1) f32
    x = feats + (speed * w_sp + b_sp)                              # (T, E)

    # --- single-head self-attention over the T frames of this batch element --
    w_qkv = attn_ref[0:E, 0:3 * E]                                 # (E, 3E) bf16
    b_qkv = attn_ref[E:E + 1, 0:3 * E].astype(f32)                 # (1, 3E)
    qkv = jnp.dot(x.astype(bf16), w_qkv,
                  preferred_element_type=f32) + b_qkv              # (T, 3E)
    q = qkv[:, 0:E]
    k = qkv[:, E:2 * E]
    v = qkv[:, 2 * E:3 * E]
    s = jax.lax.dot_general(q, k, (((1,), (1,)), ((), ())),
                            preferred_element_type=f32)            # (T, T)
    s = s * (1.0 / (float(E) ** 0.5))
    s = s - jnp.max(s, axis=-1, keepdims=True)
    e = jnp.exp(s)
    probs = e * pl.reciprocal(jnp.sum(e, axis=-1, keepdims=True), approx=True)
    attn = jnp.dot(probs, v, preferred_element_type=f32)           # (T, E)
    w_o = attn_ref[0:E, 3 * E:4 * E]                               # (E, E) bf16
    b_o = attn_ref[E:E + 1, 3 * E:4 * E].astype(f32)               # (1, E)
    x_attn = jnp.dot(attn.astype(bf16), w_o,
                     preferred_element_type=f32) + b_o             # (T, E)

    # --- LSTM (M=1 recurrence over T steps); gate order [i, f, o, g] ---------
    w_ih = lstm_ref[0:E, :]                                        # (E, 4H) bf16
    w_hh = lstm_ref[E:E + Hl, :]                                   # (H, 4H) bf16
    b_l = lstm_ref[E + Hl:E + Hl + 1, :].astype(f32)               # (1, 4H)
    gates_x = jnp.dot(x_attn.astype(bf16), w_ih,
                      preferred_element_type=f32) + b_l            # (T, 4H)
    h = jnp.zeros((1, Hl), f32)
    c = jnp.zeros((1, Hl), f32)
    for t in range(T):                                             # static unroll
        g = gates_x[t:t + 1, :] + jnp.dot(h.astype(bf16), w_hh,
                                          preferred_element_type=f32)  # (1, 4H)
        sig = jax.nn.sigmoid(g[:, 0:3 * Hl])                       # i|f|o fused
        i_g = sig[:, 0:Hl]
        f_g = sig[:, Hl:2 * Hl]
        o_g = sig[:, 2 * Hl:3 * Hl]
        c_g = jnp.tanh(g[:, 3 * Hl:4 * Hl])
        c = f_g * c + i_g * c_g
        h = o_g * jnp.tanh(c)

    # --- FC head: cat([h, cmd]) @ W1 == h @ W1[:H] + cmd @ W1[H:] -------------
    w1h = fc_ref[0:Hl, :]                                          # (Hl, FC)
    w1c = fc_ref[Hl:Hl + 8, :]                                     # (8, FC), rows 4:8 zero
    b1 = fc_ref[Hl + 8:Hl + 9, :].astype(f32)                      # (1, FC)
    cmd8 = sc_ref[0, :, 8:16].astype(bf16)                         # (1, 8), cols 4:8 zero
    z = (jnp.dot(h.astype(bf16), w1h, preferred_element_type=f32)
         + jnp.dot(cmd8, w1c, preferred_element_type=f32) + b1)    # (1, FC)
    z = jnp.maximum(z, 0.0)
    w2 = fc_ref[Hl + 16:Hl + 16 + FC, :]                           # (FC, FC), cols 3: zero
    b2 = fc_ref[Hl + 16 + FC:Hl + 17 + FC, :].astype(f32)          # (1, FC)
    yo = jnp.dot(z.astype(bf16), w2, preferred_element_type=f32) + b2
    o_ref[...] = jnp.tanh(yo[:, 0:3]).reshape(o_ref.shape)         # (1, 1, 3)


def fused_forward(patches, sc, params, *, B, T, P):
    Kpad = params["feat"].shape[0] - 3
    E = params["feat"].shape[1]
    Hl = params["lstm"].shape[1] // 4
    FC = params["fc"].shape[1]
    kernel = functools.partial(fused_kernel, T=T, P=P, E=E, Hl=Hl, FC=FC,
                               Kpad=Kpad)
    slab0 = lambda b: (0, 0)
    return pl.pallas_call(
        kernel,
        out_shape=jax.ShapeDtypeStruct((B, 1, 3), jnp.float32),
        grid=(B,),
        in_specs=[
            pl.BlockSpec((1, T * P, Kpad), lambda b: (b, 0, 0)),   # patches (bf16)
            pl.BlockSpec((1, 1, 16), lambda b: (b, 0, 0)),         # speed+cmd (f32)
            pl.BlockSpec(params["feat"].shape, slab0),             # conv + speed_fc slab
            pl.BlockSpec(params["attn"].shape, slab0),             # fused QKV + out-proj slab
            pl.BlockSpec(params["lstm"].shape, slab0),             # LSTM slab
            pl.BlockSpec(params["fc"].shape, slab0),               # FC head slab
        ],
        out_specs=pl.BlockSpec((1, 1, 3), lambda b: (b, 0, 0)),
        compiler_params=pltpu.CompilerParams(
            dimension_semantics=("parallel",)),                    # v7x: 1 TC per batch elem
    )(patches, sc, params["feat"], params["attn"], params["lstm"], params["fc"])


# ---------------------------------------------------------------------------
# Wrapper glue: im2col (layout plumbing only), packed params, full forward.
# ---------------------------------------------------------------------------
def im2col(x, ksize=3, stride=2, pad=1):
    # x: (N, C, H, W) -> patches (N, P, K) with K ordered as (c, kh, kw).
    N, C, H, W = x.shape
    xp = jnp.pad(x, ((0, 0), (0, 0), (pad, pad), (pad, pad)))
    oh = (H + 2 * pad - ksize) // stride + 1
    ow = (W + 2 * pad - ksize) // stride + 1
    cols = []
    for i in range(ksize):
        for j in range(ksize):
            cols.append(xp[:, :, i:i + stride * oh:stride, j:j + stride * ow:stride])
    patches = jnp.stack(cols, axis=2)                      # (N, C, k*k, oh, ow)
    patches = patches.reshape(N, C * ksize * ksize, oh * ow)
    return patches.transpose(0, 2, 1)                      # (N, P, K)


def init_params(key, E, Hl, FC, Kpad):
    ks = jax.random.split(key, 16)
    rn = lambda k, s: (0.05 * jax.random.normal(k, s)).astype(jnp.float32)

    # --- conv + speed_fc slab: rows [w_conv | b_conv | w_sp | b_sp] ----------
    slab_feat = jnp.concatenate(
        [rn(ks[0], (Kpad, E)), rn(ks[1], (1, E)),
         rn(ks[2], (1, E)), rn(ks[3], (1, E))], axis=0)            # (Kpad+3, E)

    # --- attention slab: cols [ w_qkv|b_qkv (3E) , w_o|b_o (E) ] --------------
    qkv_blk = jnp.concatenate([rn(ks[4], (E, 3 * E)), rn(ks[5], (1, 3 * E))], axis=0)
    out_blk = jnp.concatenate([rn(ks[6], (E, E)), rn(ks[7], (1, E))], axis=0)
    slab_attn = jnp.concatenate([qkv_blk, out_blk], axis=1)        # (E+1, 4E)

    # --- LSTM slab: rows [w_ih | w_hh | b_ih+b_hh], gate order [i, f, o, g] ---
    slab_lstm = jnp.concatenate(
        [rn(ks[8], (E, 4 * Hl)), rn(ks[9], (Hl, 4 * Hl)),
         rn(ks[10], (1, 4 * Hl))], axis=0)                         # (E+Hl+1, 4Hl)

    # --- FC head slab (FC columns, fc2 output padded 3 -> FC) -----------------
    w_fc1_h = rn(ks[11], (Hl, FC))
    w_fc1_c = jnp.concatenate([rn(ks[12], (4, FC)),
                               jnp.zeros((4, FC), jnp.float32)], axis=0)   # (8, FC)
    b_fc1 = rn(ks[13], (1, FC))
    pad_rows = jnp.zeros((7, FC), jnp.float32)
    w_fc2 = jnp.pad(rn(ks[14], (FC, 3)), ((0, 0), (0, FC - 3)))
    b_fc2 = jnp.pad(rn(ks[15], (1, 3)), ((0, 0), (0, FC - 3)))
    slab_fc = jnp.concatenate(
        [w_fc1_h, w_fc1_c, b_fc1, pad_rows, w_fc2, b_fc2], axis=0)  # (Hl+17+FC, FC)

    bf = jnp.bfloat16
    return {"feat": slab_feat.astype(bf), "attn": slab_attn.astype(bf),
            "lstm": slab_lstm.astype(bf), "fc": slab_fc.astype(bf)}


def forward(img_seq, cmd, speed, params):
    B, T, C, H, W = img_seq.shape
    Kpad = params["feat"].shape[0] - 3
    x = img_seq.reshape(B * T, C, H, W)                    # batch-major frames
    patches = im2col(x)                                    # (B*T, P, K)
    _, P, K = patches.shape
    pf = jnp.pad(patches, ((0, 0), (0, 0), (0, Kpad - K))).astype(jnp.bfloat16)
    pf = pf.reshape(B, T * P, Kpad)
    # Pack speed (col 0) and cmd (cols 8:12) into one small per-batch row.
    sc = jnp.zeros((B, 1, 16), jnp.float32)
    sc = sc.at[:, 0, 0].set(speed[:, 0])
    sc = sc.at[:, 0, 8:12].set(cmd)
    out = fused_forward(pf, sc, params, B=B, T=T, P=P)
    return out.reshape(B, 3)


if __name__ == "__main__":
    B, T, C, H, W = 2, 4, 3, 32, 32
    E, Hl, FC = 128, 128, 64     # cnn_output_dim (small stand-in), lstm_hidden, fc_hidden
    Kpad = 32                    # C*3*3 = 27 padded to 32

    key = jax.random.PRNGKey(0)
    k_img, k_cmd, k_sp, k_par = jax.random.split(key, 4)
    img_seq = jax.random.normal(k_img, (B, T, C, H, W), jnp.float32)
    cmd = jax.random.normal(k_cmd, (B, 4), jnp.float32)
    speed = jax.random.normal(k_sp, (B, 1), jnp.float32)
    params = init_params(k_par, E, Hl, FC, Kpad)

    out = forward(img_seq, cmd, speed, params)
    out = jax.block_until_ready(out)
    assert out.shape == (B, 3) and out.dtype == jnp.float32
    assert bool(jnp.all(jnp.isfinite(out)))
    print("KERNEL_OK")
</pallas_src>

<mosaic_0001>
module attributes {stable_mosaic.version = 11 : i64} {
  func.func @fused_kernel(%arg0: i32, %arg1: memref<1x1024x32xbf16, #tpu.memory_space<vmem>>, %arg2: memref<1x1x16xf32, #tpu.memory_space<vmem>>, %arg3: memref<35x128xbf16, #tpu.memory_space<vmem>>, %arg4: memref<129x512xbf16, #tpu.memory_space<vmem>>, %arg5: memref<257x512xbf16, #tpu.memory_space<vmem>>, %arg6: memref<209x64xbf16, #tpu.memory_space<vmem>>, %arg7: memref<1x1x3xf32, #tpu.memory_space<vmem>>) attributes {dimension_semantics = [#tpu.dimension_semantics<parallel>], iteration_bounds = array<i64: 2>, scalar_prefetch = 0 : i64, scratch_operands = 0 : i64, tpu.core_type = #tpu.core_type<tc>, window_params = [{transform_indices = @transform_0, window_bounds = array<i64: 1, 1024, 32>}, {transform_indices = @transform_1, window_bounds = array<i64: 1, 1, 16>}, {pipeline_mode = #tpu.pipeline_mode<synchronous>, transform_indices = @transform_2, window_bounds = array<i64: 35, 128>}, {pipeline_mode = #tpu.pipeline_mode<synchronous>, transform_indices = @transform_3, window_bounds = array<i64: 129, 512>}, {pipeline_mode = #tpu.pipeline_mode<synchronous>, transform_indices = @transform_4, window_bounds = array<i64: 257, 512>}, {pipeline_mode = #tpu.pipeline_mode<synchronous>, transform_indices = @transform_5, window_bounds = array<i64: 209, 64>}, {transform_indices = @transform_6, window_bounds = array<i64: 1, 1, 3>}]} {
    %c0 = arith.constant 0 : index
    %c0_0 = arith.constant 0 : index
    %0 = vector.load %arg3[%c0, %c0_0] : memref<35x128xbf16, #tpu.memory_space<vmem>>, vector<32x128xbf16>
    %c32 = arith.constant 32 : index
    %c0_1 = arith.constant 0 : index
    %1 = vector.load %arg3[%c32, %c0_1] : memref<35x128xbf16, #tpu.memory_space<vmem>>, vector<1x128xbf16>
    %2 = arith.extf %1 : vector<1x128xbf16> to vector<1x128xf32>
    %c0_2 = arith.constant 0 : index
    %c0_3 = arith.constant 0 : index
    %c0_4 = arith.constant 0 : index
    %3 = vector.load %arg1[%c0_2, %c0_3, %c0_4] : memref<1x1024x32xbf16, #tpu.memory_space<vmem>>, vector<1x256x32xbf16>
    %4 = vector.shape_cast %3 : vector<1x256x32xbf16> to vector<256x32xbf16>
    %cst = arith.constant dense<0.000000e+00> : vector<256x128xf32>
    %5 = tpu.matmul %4, %0, %cst {dimension_numbers = #tpu.dot_dimension_numbers<[1], [0], [0], [1], [0, 0, 1, 1], [], []>} : vector<256x32xbf16>, vector<32x128xbf16>, vector<256x128xf32> -> vector<256x128xf32>
    %6 = vector.broadcast %2 : vector<1x128xf32> to vector<256x128xf32>
    %7 = arith.addf %5, %6 : vector<256x128xf32>
    %cst_5 = arith.constant 0.000000e+00 : f32
    %8 = vector.broadcast %cst_5 : f32 to vector<256x128xf32>
    %9 = arith.maximumf %7, %8 : vector<256x128xf32>
    %cst_6 = arith.constant dense<0.000000e+00> : vector<128xf32>
    %10 = vector.multi_reduction <add>, %9, %cst_6 [0] : vector<256x128xf32> to vector<128xf32>
    %11 = vector.shape_cast %10 : vector<128xf32> to vector<1x128xf32>
    %c0_7 = arith.constant 0 : index
    %c256 = arith.constant 256 : index
    %c0_8 = arith.constant 0 : index
    %12 = vector.load %arg1[%c0_7, %c256, %c0_8] : memref<1x1024x32xbf16, #tpu.memory_space<vmem>>, vector<1x256x32xbf16>
    %13 = vector.shape_cast %12 : vector<1x256x32xbf16> to vector<256x32xbf16>
    %cst_9 = arith.constant dense<0.000000e+00> : vector<256x128xf32>
    %14 = tpu.matmul %13, %0, %cst_9 {dimension_numbers = #tpu.dot_dimension_numbers<[1], [0], [0], [1], [0, 0, 1, 1], [], []>} : vector<256x32xbf16>, vector<32x128xbf16>, vector<256x128xf32> -> vector<256x128xf32>
    %15 = vector.broadcast %2 : vector<1x128xf32> to vector<256x128xf32>
    %16 = arith.addf %14, %15 : vector<256x128xf32>
    %cst_10 = arith.constant 0.000000e+00 : f32
    %17 = vector.broadcast %cst_10 : f32 to vector<256x128xf32>
    %18 = arith.maximumf %16, %17 : vector<256x128xf32>
    %cst_11 = arith.constant dense<0.000000e+00> : vector<128xf32>
    %19 = vector.multi_reduction <add>, %18, %cst_11 [0] : vector<256x128xf32> to vector<128xf32>
    %20 = vector.shape_cast %19 : vector<128xf32> to vector<1x128xf32>
    %c0_12 = arith.constant 0 : index
    %c512 = arith.constant 512 : index
    %c0_13 = arith.constant 0 : index
    %21 = vector.load %arg1[%c0_12, %c512, %c0_13] : memref<1x1024x32xbf16, #tpu.memory_space<vmem>>, vector<1x256x32xbf16>
    %22 = vector.shape_cast %21 : vector<1x256x32xbf16> to vector<256x32xbf16>
    %cst_14 = arith.constant dense<0.000000e+00> : vector<256x128xf32>
    %23 = tpu.matmul %22, %0, %cst_14 {dimension_numbers = #tpu.dot_dimension_numbers<[1], [0], [0], [1], [0, 0, 1, 1], [], []>} : vector<256x32xbf16>, vector<32x128xbf16>, vector<256x128xf32> -> vector<256x128xf32>
    %24 = vector.broadcast %2 : vector<1x128xf32> to vector<256x128xf32>
    %25 = arith.addf %23, %24 : vector<256x128xf32>
    %cst_15 = arith.constant 0.000000e+00 : f32
    %26 = vector.broadcast %cst_15 : f32 to vector<256x128xf32>
    %27 = arith.maximumf %25, %26 : vector<256x128xf32>
    %cst_16 = arith.constant dense<0.000000e+00> : vector<128xf32>
    %28 = vector.multi_reduction <add>, %27, %cst_16 [0] : vector<256x128xf32> to vector<128xf32>
    %29 = vector.shape_cast %28 : vector<128xf32> to vector<1x128xf32>
    %c0_17 = arith.constant 0 : index
    %c768 = arith.constant 768 : index
    %c0_18 = arith.constant 0 : index
    %30 = vector.load %arg1[%c0_17, %c768, %c0_18] : memref<1x1024x32xbf16, #tpu.memory_space<vmem>>, vector<1x256x32xbf16>
    %31 = vector.shape_cast %30 : vector<1x256x32xbf16> to vector<256x32xbf16>
    %cst_19 = arith.constant dense<0.000000e+00> : vector<256x128xf32>
    %32 = tpu.matmul %31, %0, %cst_19 {dimension_numbers = #tpu.dot_dimension_numbers<[1], [0], [0], [1], [0, 0, 1, 1], [], []>} : vector<256x32xbf16>, vector<32x128xbf16>, vector<256x128xf32> -> vector<256x128xf32>
    %33 = vector.broadcast %2 : vector<1x128xf32> to vector<256x128xf32>
    %34 = arith.addf %32, %33 : vector<256x128xf32>
    %cst_20 = arith.constant 0.000000e+00 : f32
    %35 = vector.broadcast %cst_20 : f32 to vector<256x128xf32>
    %36 = arith.maximumf %34, %35 : vector<256x128xf32>
    %cst_21 = arith.constant dense<0.000000e+00> : vector<128xf32>
    %37 = vector.multi_reduction <add>, %36, %cst_21 [0] : vector<256x128xf32> to vector<128xf32>
    %38 = vector.shape_cast %37 : vector<128xf32> to vector<1x128xf32>
    %39 = tpu.concatenate %11, %20, %29, %38 in 0 : vector<1x128xf32>, vector<1x128xf32>, vector<1x128xf32>, vector<1x128xf32> -> vector<4x128xf32>
    %cst_22 = arith.constant 3.906250e-03 : f32
    %40 = vector.broadcast %cst_22 : f32 to vector<4x128xf32>
    %41 = arith.mulf %39, %40 : vector<4x128xf32>
    %c33 = arith.constant 33 : index
    %c0_23 = arith.constant 0 : index
    %42 = vector.load %arg3[%c33, %c0_23] : memref<35x128xbf16, #tpu.memory_space<vmem>>, vector<1x128xbf16>
    %43 = arith.extf %42 : vector<1x128xbf16> to vector<1x128xf32>
    %c34 = arith.constant 34 : index
    %c0_24 = arith.constant 0 : index
    %44 = vector.load %arg3[%c34, %c0_24] : memref<35x128xbf16, #tpu.memory_space<vmem>>, vector<1x128xbf16>
    %45 = arith.extf %44 : vector<1x128xbf16> to vector<1x128xf32>
    %c0_25 = arith.constant 0 : index
    %c0_26 = arith.constant 0 : index
    %c0_27 = arith.constant 0 : index
    %46 = vector.load %arg2[%c0_25, %c0_26, %c0_27] : memref<1x1x16xf32, #tpu.memory_space<vmem>>, vector<1x1x1xf32>
    %47 = vector.shape_cast %46 : vector<1x1x1xf32> to vector<1x1xf32>
    %48 = vector.broadcast %47 : vector<1x1xf32> to vector<1x128xf32>
    %49 = arith.mulf %48, %43 : vector<1x128xf32>
    %50 = arith.addf %49, %45 : vector<1x128xf32>
    %51 = vector.broadcast %50 : vector<1x128xf32> to vector<4x128xf32>
    %52 = arith.addf %41, %51 : vector<4x128xf32>
    %c0_28 = arith.constant 0 : index
    %c0_29 = arith.constant 0 : index
    %53 = vector.load %arg4[%c0_28, %c0_29] : memref<129x512xbf16, #tpu.memory_space<vmem>>, vector<128x384xbf16>
    %c128 = arith.constant 128 : index
    %c0_30 = arith.constant 0 : index
    %54 = vector.load %arg4[%c128, %c0_30] : memref<129x512xbf16, #tpu.memory_space<vmem>>, vector<1x384xbf16>
    %55 = arith.extf %54 : vector<1x384xbf16> to vector<1x384xf32>
    %56 = arith.truncf %52 : vector<4x128xf32> to vector<4x128xbf16>
    %cst_31 = arith.constant dense<0.000000e+00> : vector<4x384xf32>
    %57 = tpu.matmul %56, %53, %cst_31 {dimension_numbers = #tpu.dot_dimension_numbers<[1], [0], [0], [1], [0, 0, 1, 1], [], []>} : vector<4x128xbf16>, vector<128x384xbf16>, vector<4x384xf32> -> vector<4x384xf32>
    %58 = vector.broadcast %55 : vector<1x384xf32> to vector<4x384xf32>
    %59 = arith.addf %57, %58 : vector<4x384xf32>
    %60 = vector.extract_strided_slice %59 {offsets = [0, 0], sizes = [4, 128], strides = [1, 1]} : vector<4x384xf32> to vector<4x128xf32>
    %61 = vector.extract_strided_slice %59 {offsets = [0, 128], sizes = [4, 128], strides = [1, 1]} : vector<4x384xf32> to vector<4x128xf32>
    %62 = vector.extract_strided_slice %59 {offsets = [0, 256], sizes = [4, 128], strides = [1, 1]} : vector<4x384xf32> to vector<4x128xf32>
    %cst_32 = arith.constant dense<0.000000e+00> : vector<4x4xf32>
    %63 = tpu.matmul %60, %61, %cst_32 {dimension_numbers = #tpu.dot_dimension_numbers<[1], [1], [0], [0], [0, 0, 1, 0], [], []>} : vector<4x128xf32>, vector<4x128xf32>, vector<4x4xf32> -> vector<4x4xf32>
    %cst_33 = arith.constant 0.0883883461 : f32
    %64 = vector.broadcast %cst_33 : f32 to vector<4x4xf32>
    %65 = arith.mulf %63, %64 : vector<4x4xf32>
    %cst_34 = arith.constant dense<0xFF800000> : vector<4xf32>
    %66 = vector.multi_reduction <maximumf>, %65, %cst_34 [1] : vector<4x4xf32> to vector<4xf32>
    %67 = vector.shape_cast %66 : vector<4xf32> to vector<4x1xf32>
    %68 = vector.broadcast %67 : vector<4x1xf32> to vector<4x4xf32>
    %69 = arith.subf %65, %68 : vector<4x4xf32>
    %70 = math.exp %69 : vector<4x4xf32>
    %cst_35 = arith.constant dense<0.000000e+00> : vector<4xf32>
    %71 = vector.multi_reduction <add>, %70, %cst_35 [1] : vector<4x4xf32> to vector<4xf32>
    %72 = vector.shape_cast %71 : vector<4xf32> to vector<4x1xf32>
    %73 = tpu.reciprocal %72 {approx = true} : vector<4x1xf32> -> vector<4x1xf32>
    %74 = vector.broadcast %73 : vector<4x1xf32> to vector<4x4xf32>
    %75 = arith.mulf %70, %74 : vector<4x4xf32>
    %cst_36 = arith.constant dense<0.000000e+00> : vector<4x128xf32>
    %76 = tpu.matmul %75, %62, %cst_36 {dimension_numbers = #tpu.dot_dimension_numbers<[1], [0], [0], [1], [0, 0, 1, 1], [], []>} : vector<4x4xf32>, vector<4x128xf32>, vector<4x128xf32> -> vector<4x128xf32>
    %c0_37 = arith.constant 0 : index
    %c384 = arith.constant 384 : index
    %77 = vector.load %arg4[%c0_37, %c384] : memref<129x512xbf16, #tpu.memory_space<vmem>>, vector<128x128xbf16>
    %c128_38 = arith.constant 128 : index
    %c384_39 = arith.constant 384 : index
    %78 = vector.load %arg4[%c128_38, %c384_39] : memref<129x512xbf16, #tpu.memory_space<vmem>>, vector<1x128xbf16>
    %79 = arith.extf %78 : vector<1x128xbf16> to vector<1x128xf32>
    %80 = arith.truncf %76 : vector<4x128xf32> to vector<4x128xbf16>
    %cst_40 = arith.constant dense<0.000000e+00> : vector<4x128xf32>
    %81 = tpu.matmul %80, %77, %cst_40 {dimension_numbers = #tpu.dot_dimension_numbers<[1], [0], [0], [1], [0, 0, 1, 1], [], []>} : vector<4x128xbf16>, vector<128x128xbf16>, vector<4x128xf32> -> vector<4x128xf32>
    %82 = vector.broadcast %79 : vector<1x128xf32> to vector<4x128xf32>
    %83 = arith.addf %81, %82 : vector<4x128xf32>
    %c0_41 = arith.constant 0 : index
    %c0_42 = arith.constant 0 : index
    %84 = vector.load %arg5[%c0_41, %c0_42] : memref<257x512xbf16, #tpu.memory_space<vmem>>, vector<128x512xbf16>
    %c128_43 = arith.constant 128 : index
    %c0_44 = arith.constant 0 : index
    %85 = vector.load %arg5[%c128_43, %c0_44] : memref<257x512xbf16, #tpu.memory_space<vmem>>, vector<128x512xbf16>
    %c256_45 = arith.constant 256 : index
    %c0_46 = arith.constant 0 : index
    %86 = vector.load %arg5[%c256_45, %c0_46] : memref<257x512xbf16, #tpu.memory_space<vmem>>, vector<1x512xbf16>
    %87 = arith.extf %86 : vector<1x512xbf16> to vector<1x512xf32>
    %88 = arith.truncf %83 : vector<4x128xf32> to vector<4x128xbf16>
    %cst_47 = arith.constant dense<0.000000e+00> : vector<4x512xf32>
    %89 = tpu.matmul %88, %84, %cst_47 {dimension_numbers = #tpu.dot_dimension_numbers<[1], [0], [0], [1], [0, 0, 1, 1], [], []>} : vector<4x128xbf16>, vector<128x512xbf16>, vector<4x512xf32> -> vector<4x512xf32>
    %90 = vector.broadcast %87 : vector<1x512xf32> to vector<4x512xf32>
    %91 = arith.addf %89, %90 : vector<4x512xf32>
    %cst_48 = arith.constant 0.000000e+00 : f32
    %92 = vector.broadcast %cst_48 : f32 to vector<1x128xf32>
    %cst_49 = arith.constant 0.000000e+00 : f32
    %93 = vector.broadcast %cst_49 : f32 to vector<1x128xf32>
    %94 = vector.extract_strided_slice %91 {offsets = [0, 0], sizes = [1, 512], strides = [1, 1]} : vector<4x512xf32> to vector<1x512xf32>
    %95 = arith.truncf %92 : vector<1x128xf32> to vector<1x128xbf16>
    %cst_50 = arith.constant dense<0.000000e+00> : vector<1x512xf32>
    %96 = tpu.matmul %95, %85, %cst_50 {dimension_numbers = #tpu.dot_dimension_numbers<[1], [0], [0], [1], [0, 0, 1, 1], [], []>} : vector<1x128xbf16>, vector<128x512xbf16>, vector<1x512xf32> -> vector<1x512xf32>
    %97 = arith.addf %94, %96 : vector<1x512xf32>
    %98 = vector.extract_strided_slice %97 {offsets = [0, 0], sizes = [1, 384], strides = [1, 1]} : vector<1x512xf32> to vector<1x384xf32>
    %99 = arith.negf %98 : vector<1x384xf32>
    %100 = math.exp %99 : vector<1x384xf32>
    %cst_51 = arith.constant 1.000000e+00 : f32
    %101 = vector.broadcast %cst_51 : f32 to vector<1x384xf32>
    %102 = arith.addf %101, %100 : vector<1x384xf32>
    %103 = arith.divf %101, %102 : vector<1x384xf32>
    %104 = vector.extract_strided_slice %103 {offsets = [0, 0], sizes = [1, 128], strides = [1, 1]} : vector<1x384xf32> to vector<1x128xf32>
    %105 = vector.extract_strided_slice %103 {offsets = [0, 128], sizes = [1, 128], strides = [1, 1]} : vector<1x384xf32> to vector<1x128xf32>
    %106 = vector.extract_strided_slice %103 {offsets = [0, 256], sizes = [1, 128], strides = [1, 1]} : vector<1x384xf32> to vector<1x128xf32>
    %107 = vector.extract_strided_slice %97 {offsets = [0, 384], sizes = [1, 128], strides = [1, 1]} : vector<1x512xf32> to vector<1x128xf32>
    %108 = math.tanh %107 : vector<1x128xf32>
    %109 = arith.mulf %105, %93 : vector<1x128xf32>
    %110 = arith.mulf %104, %108 : vector<1x128xf32>
    %111 = arith.addf %109, %110 : vector<1x128xf32>
    %112 = math.tanh %111 : vector<1x128xf32>
    %113 = arith.mulf %106, %112 : vector<1x128xf32>
    %114 = vector.extract_strided_slice %91 {offsets = [1, 0], sizes = [1, 512], strides = [1, 1]} : vector<4x512xf32> to vector<1x512xf32>
    %115 = arith.truncf %113 : vector<1x128xf32> to vector<1x128xbf16>
    %cst_52 = arith.constant dense<0.000000e+00> : vector<1x512xf32>
    %116 = tpu.matmul %115, %85, %cst_52 {dimension_numbers = #tpu.dot_dimension_numbers<[1], [0], [0], [1], [0, 0, 1, 1], [], []>} : vector<1x128xbf16>, vector<128x512xbf16>, vector<1x512xf32> -> vector<1x512xf32>
    %117 = arith.addf %114, %116 : vector<1x512xf32>
    %118 = vector.extract_strided_slice %117 {offsets = [0, 0], sizes = [1, 384], strides = [1, 1]} : vector<1x512xf32> to vector<1x384xf32>
    %119 = arith.negf %118 : vector<1x384xf32>
    %120 = math.exp %119 : vector<1x384xf32>
    %cst_53 = arith.constant 1.000000e+00 : f32
    %121 = vector.broadcast %cst_53 : f32 to vector<1x384xf32>
    %122 = arith.addf %121, %120 : vector<1x384xf32>
    %123 = arith.divf %121, %122 : vector<1x384xf32>
    %124 = vector.extract_strided_slice %123 {offsets = [0, 0], sizes = [1, 128], strides = [1, 1]} : vector<1x384xf32> to vector<1x128xf32>
    %125 = vector.extract_strided_slice %123 {offsets = [0, 128], sizes = [1, 128], strides = [1, 1]} : vector<1x384xf32> to vector<1x128xf32>
    %126 = vector.extract_strided_slice %123 {offsets = [0, 256], sizes = [1, 128], strides = [1, 1]} : vector<1x384xf32> to vector<1x128xf32>
    %127 = vector.extract_strided_slice %117 {offsets = [0, 384], sizes = [1, 128], strides = [1, 1]} : vector<1x512xf32> to vector<1x128xf32>
    %128 = math.tanh %127 : vector<1x128xf32>
    %129 = arith.mulf %125, %111 : vector<1x128xf32>
    %130 = arith.mulf %124, %128 : vector<1x128xf32>
    %131 = arith.addf %129, %130 : vector<1x128xf32>
    %132 = math.tanh %131 : vector<1x128xf32>
    %133 = arith.mulf %126, %132 : vector<1x128xf32>
    %134 = vector.extract_strided_slice %91 {offsets = [2, 0], sizes = [1, 512], strides = [1, 1]} : vector<4x512xf32> to vector<1x512xf32>
    %135 = arith.truncf %133 : vector<1x128xf32> to vector<1x128xbf16>
    %cst_54 = arith.constant dense<0.000000e+00> : vector<1x512xf32>
    %136 = tpu.matmul %135, %85, %cst_54 {dimension_numbers = #tpu.dot_dimension_numbers<[1], [0], [0], [1], [0, 0, 1, 1], [], []>} : vector<1x128xbf16>, vector<128x512xbf16>, vector<1x512xf32> -> vector<1x512xf32>
    %137 = arith.addf %134, %136 : vector<1x512xf32>
    %138 = vector.extract_strided_slice %137 {offsets = [0, 0], sizes = [1, 384], strides = [1, 1]} : vector<1x512xf32> to vector<1x384xf32>
    %139 = arith.negf %138 : vector<1x384xf32>
    %140 = math.exp %139 : vector<1x384xf32>
    %cst_55 = arith.constant 1.000000e+00 : f32
    %141 = vector.broadcast %cst_55 : f32 to vector<1x384xf32>
    %142 = arith.addf %141, %140 : vector<1x384xf32>
    %143 = arith.divf %141, %142 : vector<1x384xf32>
    %144 = vector.extract_strided_slice %143 {offsets = [0, 0], sizes = [1, 128], strides = [1, 1]} : vector<1x384xf32> to vector<1x128xf32>
    %145 = vector.extract_strided_slice %143 {offsets = [0, 128], sizes = [1, 128], strides = [1, 1]} : vector<1x384xf32> to vector<1x128xf32>
    %146 = vector.extract_strided_slice %143 {offsets = [0, 256], sizes = [1, 128], strides = [1, 1]} : vector<1x384xf32> to vector<1x128xf32>
    %147 = vector.extract_strided_slice %137 {offsets = [0, 384], sizes = [1, 128], strides = [1, 1]} : vector<1x512xf32> to vector<1x128xf32>
    %148 = math.tanh %147 : vector<1x128xf32>
    %149 = arith.mulf %145, %131 : vector<1x128xf32>
    %150 = arith.mulf %144, %148 : vector<1x128xf32>
    %151 = arith.addf %149, %150 : vector<1x128xf32>
    %152 = math.tanh %151 : vector<1x128xf32>
    %153 = arith.mulf %146, %152 : vector<1x128xf32>
    %154 = vector.extract_strided_slice %91 {offsets = [3, 0], sizes = [1, 512], strides = [1, 1]} : vector<4x512xf32> to vector<1x512xf32>
    %155 = arith.truncf %153 : vector<1x128xf32> to vector<1x128xbf16>
    %cst_56 = arith.constant dense<0.000000e+00> : vector<1x512xf32>
    %156 = tpu.matmul %155, %85, %cst_56 {dimension_numbers = #tpu.dot_dimension_numbers<[1], [0], [0], [1], [0, 0, 1, 1], [], []>} : vector<1x128xbf16>, vector<128x512xbf16>, vector<1x512xf32> -> vector<1x512xf32>
    %157 = arith.addf %154, %156 : vector<1x512xf32>
    %158 = vector.extract_strided_slice %157 {offsets = [0, 0], sizes = [1, 384], strides = [1, 1]} : vector<1x512xf32> to vector<1x384xf32>
    %159 = arith.negf %158 : vector<1x384xf32>
    %160 = math.exp %159 : vector<1x384xf32>
    %cst_57 = arith.constant 1.000000e+00 : f32
    %161 = vector.broadcast %cst_57 : f32 to vector<1x384xf32>
    %162 = arith.addf %161, %160 : vector<1x384xf32>
    %163 = arith.divf %161, %162 : vector<1x384xf32>
    %164 = vector.extract_strided_slice %163 {offsets = [0, 0], sizes = [1, 128], strides = [1, 1]} : vector<1x384xf32> to vector<1x128xf32>
    %165 = vector.extract_strided_slice %163 {offsets = [0, 128], sizes = [1, 128], strides = [1, 1]} : vector<1x384xf32> to vector<1x128xf32>
    %166 = vector.extract_strided_slice %163 {offsets = [0, 256], sizes = [1, 128], strides = [1, 1]} : vector<1x384xf32> to vector<1x128xf32>
    %167 = vector.extract_strided_slice %157 {offsets = [0, 384], sizes = [1, 128], strides = [1, 1]} : vector<1x512xf32> to vector<1x128xf32>
    %168 = math.tanh %167 : vector<1x128xf32>
    %169 = arith.mulf %165, %151 : vector<1x128xf32>
    %170 = arith.mulf %164, %168 : vector<1x128xf32>
    %171 = arith.addf %169, %170 : vector<1x128xf32>
    %172 = math.tanh %171 : vector<1x128xf32>
    %173 = arith.mulf %166, %172 : vector<1x128xf32>
    %c0_58 = arith.constant 0 : index
    %c0_59 = arith.constant 0 : index
    %174 = vector.load %arg6[%c0_58, %c0_59] : memref<209x64xbf16, #tpu.memory_space<vmem>>, vector<128x64xbf16>
    %c128_60 = arith.constant 128 : index
    %c0_61 = arith.constant 0 : index
    %175 = vector.load %arg6[%c128_60, %c0_61] : memref<209x64xbf16, #tpu.memory_space<vmem>>, vector<8x64xbf16>
    %c136 = arith.constant 136 : index
    %c0_62 = arith.constant 0 : index
    %176 = vector.load %arg6[%c136, %c0_62] : memref<209x64xbf16, #tpu.memory_space<vmem>>, vector<1x64xbf16>
    %177 = arith.extf %176 : vector<1x64xbf16> to vector<1x64xf32>
    %c0_63 = arith.constant 0 : index
    %c0_64 = arith.constant 0 : index
    %c8 = arith.constant 8 : index
    %178 = vector.load %arg2[%c0_63, %c0_64, %c8] : memref<1x1x16xf32, #tpu.memory_space<vmem>>, vector<1x1x8xf32>
    %179 = vector.shape_cast %178 : vector<1x1x8xf32> to vector<1x8xf32>
    %180 = arith.truncf %179 : vector<1x8xf32> to vector<1x8xbf16>
    %181 = arith.truncf %173 : vector<1x128xf32> to vector<1x128xbf16>
    %cst_65 = arith.constant dense<0.000000e+00> : vector<1x64xf32>
    %182 = tpu.matmul %181, %174, %cst_65 {dimension_numbers = #tpu.dot_dimension_numbers<[1], [0], [0], [1], [0, 0, 1, 1], [], []>} : vector<1x128xbf16>, vector<128x64xbf16>, vector<1x64xf32> -> vector<1x64xf32>
    %cst_66 = arith.constant dense<0.000000e+00> : vector<1x64xf32>
    %183 = tpu.matmul %180, %175, %cst_66 {dimension_numbers = #tpu.dot_dimension_numbers<[1], [0], [0], [1], [0, 0, 1, 1], [], []>} : vector<1x8xbf16>, vector<8x64xbf16>, vector<1x64xf32> -> vector<1x64xf32>
    %184 = arith.addf %182, %183 : vector<1x64xf32>
    %185 = arith.addf %184, %177 : vector<1x64xf32>
    %cst_67 = arith.constant 0.000000e+00 : f32
    %186 = vector.broadcast %cst_67 : f32 to vector<1x64xf32>
    %187 = arith.maximumf %185, %186 : vector<1x64xf32>
    %c144 = arith.constant 144 : index
    %c0_68 = arith.constant 0 : index
    %188 = vector.load %arg6[%c144, %c0_68] : memref<209x64xbf16, #tpu.memory_space<vmem>>, vector<64x64xbf16>
    %c208 = arith.constant 208 : index
    %c0_69 = arith.constant 0 : index
    %189 = vector.load %arg6[%c208, %c0_69] : memref<209x64xbf16, #tpu.memory_space<vmem>>, vector<1x64xbf16>
    %190 = arith.extf %189 : vector<1x64xbf16> to vector<1x64xf32>
    %191 = arith.truncf %187 : vector<1x64xf32> to vector<1x64xbf16>
    %cst_70 = arith.constant dense<0.000000e+00> : vector<1x64xf32>
    %192 = tpu.matmul %191, %188, %cst_70 {dimension_numbers = #tpu.dot_dimension_numbers<[1], [0], [0], [1], [0, 0, 1, 1], [], []>} : vector<1x64xbf16>, vector<64x64xbf16>, vector<1x64xf32> -> vector<1x64xf32>
    %193 = arith.addf %192, %190 : vector<1x64xf32>
    %194 = vector.extract_strided_slice %193 {offsets = [0, 0], sizes = [1, 3], strides = [1, 1]} : vector<1x64xf32> to vector<1x3xf32>
    %195 = math.tanh %194 : vector<1x3xf32>
    %196 = vector.shape_cast %195 : vector<1x3xf32> to vector<1x1x3xf32>
    %c0_71 = arith.constant 0 : index
    %c0_72 = arith.constant 0 : index
    %c0_73 = arith.constant 0 : index
    %197 = vector.load %arg7[%c0_71, %c0_72, %c0_73] : memref<1x1x3xf32, #tpu.memory_space<vmem>>, vector<1x1x3xf32>
    tpu.vector_store %arg7[%c0_71, %c0_72, %c0_73], %196 {strides = array<i32>} : memref<1x1x3xf32, #tpu.memory_space<vmem>>, vector<1x1x3xf32>,
    return
  }
  func.func @transform_0(%arg0: i32) -> (i32, i32, i32) {
    %c0_i32 = arith.constant 0 : i32
    %c0_i32_0 = arith.constant 0 : i32
    %c0_i32_1 = arith.constant 0 : i32
    return %arg0, %c0_i32, %c0_i32_0 : i32, i32, i32
  }
  func.func @transform_1(%arg0: i32) -> (i32, i32, i32) {
    %c0_i32 = arith.constant 0 : i32
    %c0_i32_0 = arith.constant 0 : i32
    %c0_i32_1 = arith.constant 0 : i32
    return %arg0, %c0_i32, %c0_i32_0 : i32, i32, i32
  }
  func.func @transform_2(%arg0: i32) -> (i32, i32) {
    %c0_i32 = arith.constant 0 : i32
    %c0_i32_0 = arith.constant 0 : i32
    %c0_i32_1 = arith.constant 0 : i32
    return %c0_i32, %c0_i32_0 : i32, i32
  }
  func.func @transform_3(%arg0: i32) -> (i32, i32) {
    %c0_i32 = arith.constant 0 : i32
    %c0_i32_0 = arith.constant 0 : i32
    %c0_i32_1 = arith.constant 0 : i32
    return %c0_i32, %c0_i32_0 : i32, i32
  }
  func.func @transform_4(%arg0: i32) -> (i32, i32) {
    %c0_i32 = arith.constant 0 : i32
    %c0_i32_0 = arith.constant 0 : i32
    %c0_i32_1 = arith.constant 0 : i32
    return %c0_i32, %c0_i32_0 : i32, i32
  }
  func.func @transform_5(%arg0: i32) -> (i32, i32) {
    %c0_i32 = arith.constant 0 : i32
    %c0_i32_0 = arith.constant 0 : i32
    %c0_i32_1 = arith.constant 0 : i32
    return %c0_i32, %c0_i32_0 : i32, i32
  }
  func.func @transform_6(%arg0: i32) -> (i32, i32, i32) {
    %c0_i32 = arith.constant 0 : i32
    %c0_i32_0 = arith.constant 0 : i32
    %c0_i32_1 = arith.constant 0 : i32
    return %arg0, %c0_i32, %c0_i32_0 : i32, i32, i32
  }
}

</mosaic_0001>

<bundles_post_ra>
// kernel: tpu_custom_call.1
= control target key start
LH: loop header
LB: loop body
LE: loop exit
PB: predicated region body
PF: predicated region fallthrough
CT: control target
= control target key end

     0   :  { %11 = vsyncpa [#allocation3], 0  ;;  %s5664_s0 = inlined_call_operand.vmem [shape: bf16[2,1024,32], index: 0, kind: input, shape index: {}]   ;;  %s5665_s1 = inlined_call_operand.vmem [shape: f32[2,1,16], index: 1, kind: input, shape index: {}]   ;;  %s5666_s2 = inlined_call_operand.vmem [shape: bf16[35,128], index: 2, kind: input, shape index: {}]   ;;  %s5667_s3 = inlined_call_operand.vmem [shape: bf16[129,512], index: 3, kind: input, shape index: {}]   ;;  %s5668_s4 = inlined_call_operand.vmem [shape: bf16[257,512], index: 4, kind: input, shape index: {}]   ;;  %s5669_s5 = inlined_call_operand.vmem [shape: bf16[209,64], index: 5, kind: input, shape index: {}]   ;;  %s5670_s6 = inlined_call_operand.hbm [shape: f32[2,1,3], index: 6, kind: output, shape index: {}]  }
   0x1   :  { %13 = vsyncpa [#allocation3 + $0x1], 0  ;;  %s4324_s21 = smov 0   ;;  %s4326_s22 = smov 0  }
   0x2   :  { %s4328_s23 = smov 0   ;;  %s4330_s24 = smov 0  }
   0x3 LB: > { %s4345_s25 = sadd.s32 4294967295, %s4285_s24   ;;  %s3151_s26 = sadd.s32 4294967294, %s4285_s24   ;;  %s4285_s24 = sphi %s4330_s24, %s5676_s24   ;;  %s4281_s23 = sphi %s4328_s23, %s5675_s23   ;;  %s4277_s22 = sphi %s4326_s22, %s5674_s22   ;;  %s4273_s21 = sphi %s4324_s21, %s5673_s21  }
   0x4   : > { %s4349_s27 = sadd.s32 1, %s4285_s24   ;;  %s162_s28 = sadd.s32 1, %s4281_s23 }
   0x5   : > { %s159_s29 = ssub.s32 %s4285_s24, %s4349_s27  ;;  %p172_p0 = scmp.ne.s32.totalorder %s4281_s23, %s4277_s22 }
   0x6   : > { %p160_p1 = scmp.eq.s32.totalorder %s159_s29, 0  ;;  %p173_p2 = scmp.eq.s32.totalorder %s4345_s25, 1 }
   0x7   : > { %p178_p3 = scmp.ne.s32.totalorder %s4277_s22, %s4273_s21  ;;  %p179_p4 = scmp.eq.s32.totalorder %s3151_s26, 1 }
   0x8   : > { %s4360_s30 = scalar_select %p160_p1, %s4281_s23, %s162_s28  }
   0x9   : > { %p4362_p5 = por %p173_p2, %p172_p0  ;;  %p4366_p6 = por %p179_p4, %p178_p3 }
   0xa   : > { %p3154_p7 = scmp.ge.s32.totalorder %s4285_s24, 1  ;;  %p223_p8 = scmp.lt.s32.totalorder %s4285_s24, 3 }
   0xc   : > { %p224_p9 = pnand %p3154_p7, %p223_p8 }
   0xd   : > { %p255_p10 = scmp.lt.s32.totalorder (!%p224_p9), %s4345_s25, 1  ;;  %s4288_s12 = smov (!%p224_p9), 120  }
   0xe   : > { %227 = sbr.rel (%p224_p9) target bundleno = 2239 (0x8bf), region = 44  ;;  %s3083_s15 = scalar_lea.hbm (!%p224_p9), %s5670_s6, %s4345_s25 }
   0xf   : > { %s3087_s18 = sshll.u32 (!%p224_p9), %s3083_s15, 4  ;;  %s4243_s9 = scalar_lea.hbm (!%p224_p9), %s5670_s6, 2  ;;  %s3088_s18 = int_to_ptr.hbm [resolvable:$true] %s3087_s18 }
  0x10   : > { %s4237_s20 = sshra.s32 (!%p224_p9), %s3088_s18, 4  ;;  %s4238_s20 = int_to_ptr.hbm [resolvable:$true] %s4237_s20 }
  0x11   : > { %s4239_s26 = scalar_lea.hbm (!%p224_p9), %s4238_s20, 1  ;;  %p4244_p0 = scmp.lt.s32.totalorder (!%p224_p9), %s4238_s20, %s5670_s6 }
  0x12   : > { %p4240_p11 = scmp.ne.s32.totalorder (!%p224_p9), %s4238_s20, %s4239_s26  ;;  %p4245_p1 = scmp.lt.s32.totalorder (!%p224_p9), %s4243_s9, %s4239_s26 }
  0x13   : > { %v3937_v0 = vld [vmem:[%s5666_s2 + $0x8] sm:$0xff]  ;;  %v3936_v1 = vld [vmem:[%s5666_s2] sm:$0xff]  ;;  %s4380_s13 = scalar_select %p255_p10, %s4345_s25, 1  ;;  %vm395_vm0 = vcmask 261120   ;;  %v4455_v34 = vld [vmem:[%s5666_s2 + $0x10] sm:$0x1] }
  0x14   : > { %450 = vmatpush.bf16.msra.mxu0 %v3937_v0  ;;  %768 = vmatpush.bf16.msra.mxu1 %v3937_v0  ;;  %v269_v35 = vunpack.c.l.bf16 %v4455_v34  ;;  %vm1556_vm1 = vcmask 1040384   ;;  %vm1558_vm2 = vcmask 1041408   ;;  %vm1560_vm3 = vcmask 1042432   ;;  %v1611_v34 = vld [vmem:[%s5667_s3 + $0x100] sm:$0x11]  ;;  %p4241_p12 = pnand %p4240_p11, %p4362_p5  ;;  %p4246_p2 = por %p4245_p1, %p4244_p0 }
  0x15   : > { %1086 = vmatpush.bf16.msra.mxu2 %v3937_v0  ;;  %1404 = vmatpush.bf16.msra.mxu3 %v3937_v0  ;;  %s3935_s14 = sshll.u32 %s4380_s13, 9  ;;  %s4588_s28 = scalar_lea.vmem %s5665_s1, %s4380_s13  ;;  %vm1824_vm4 = vcmask 1043456   ;;  %vm1808_vm5 = vcmask 27648   ;;  %vm1820_vm6 = vcmask 31744  }
  0x16   : > { %s4386_s17 = scalar_lea.vmem %s5664_s0, %s3935_s14  ;;  %v4464_v42 = vperm.slane %v269_v35, 0  ;;  %p4242_p13 = pneg %p4241_p12 }
  0x17   : > { %v3938_v2 = vld [vmem:[%s4386_s17] sm:$0xff]  ;;  %v3939_v6 = vld [vmem:[%s4386_s17 + $0x8] sm:$0xff]  ;;  %v3940_v10 = vld [vmem:[%s4386_s17 + $0x10] sm:$0xff] }
  0x18   : > { %451 = vmatpush.bf16.msra.mxu0 %v3936_v1  ;;  %769 = vmatpush.bf16.msra.mxu1 %v3936_v1  ;;  %v3954_v3 = vld [vmem:[%s4386_s17 + $0x80] sm:$0xff]  ;;  %v3955_v7 = vld [vmem:[%s4386_s17 + $0x88] sm:$0xff]  ;;  %v3956_v11 = vld [vmem:[%s4386_s17 + $0x90] sm:$0xff]  ;;  %p4247_p3 = pnand %p4246_p2, %p4242_p13 }
  0x19   : > { %v3970_v4 = vld [vmem:[%s4386_s17 + $0x100] sm:$0xff]  ;;  %1087 = vmatpush.bf16.msra.mxu2 %v3936_v1  ;;  %1405 = vmatpush.bf16.msra.mxu3 %v3936_v1  ;;  %v3971_v8 = vld [vmem:[%s4386_s17 + $0x108] sm:$0xff]  ;;  %v3972_v12 = vld [vmem:[%s4386_s17 + $0x110] sm:$0xff] }
  0x1a   : > { %v3986_v5 = vld [vmem:[%s4386_s17 + $0x180] sm:$0xff]  ;;  %v3987_v9 = vld [vmem:[%s4386_s17 + $0x188] sm:$0xff]  ;;  %v3988_v13 = vld [vmem:[%s4386_s17 + $0x190] sm:$0xff] }
  0x1b   : > { %3229 = vmatmul.msk.bf16.vlgmr.msra.gmra.mxu0 %vm395_vm0, %v3938_v2  ;;  %3309 = vmatmul.msk.bf16.vlgmr.msra.gmra.mxu1 %vm395_vm0, %v3954_v3  ;;  %v3941_v14 = vld [vmem:[%s4386_s17 + $0x18] sm:$0xff]  ;;  %v3942_v18 = vld [vmem:[%s4386_s17 + $0x20] sm:$0xff]  ;;  %v3943_v22 = vld [vmem:[%s4386_s17 + $0x28] sm:$0xff] }
  0x1c   : > { %3389 = vmatmul.msk.bf16.vlgmr.msra.gmra.mxu2 %vm395_vm0, %v3970_v4  ;;  %3469 = vmatmul.msk.bf16.vlgmr.msra.gmra.mxu3 %vm395_vm0, %v3986_v5  ;;  %v3957_v15 = vld [vmem:[%s4386_s17 + $0x98] sm:$0xff]  ;;  %v3958_v19 = vld [vmem:[%s4386_s17 + $0xa0] sm:$0xff]  ;;  %v3959_v23 = vld [vmem:[%s4386_s17 + $0xa8] sm:$0xff] }
  0x1d   : > { %v3973_v16 = vld [vmem:[%s4386_s17 + $0x118] sm:$0xff]  ;;  %v3974_v20 = vld [vmem:[%s4386_s17 + $0x120] sm:$0xff]  ;;  %v3975_v24 = vld [vmem:[%s4386_s17 + $0x128] sm:$0xff] }
  0x1e   : > { %v3989_v17 = vld [vmem:[%s4386_s17 + $0x198] sm:$0xff]  ;;  %v3990_v21 = vld [vmem:[%s4386_s17 + $0x1a0] sm:$0xff]  ;;  %v3991_v25 = vld [vmem:[%s4386_s17 + $0x1a8] sm:$0xff] }
  0x1f   : > { %v3944_v26 = vld [vmem:[%s4386_s17 + $0x30] sm:$0xff]  ;;  %v3945_v30 = vld [vmem:[%s4386_s17 + $0x38] sm:$0xff]  ;;  %v3946_v36 = vld [vmem:[%s4386_s17 + $0x40] sm:$0xff] }
  0x20   : > { %v3960_v27 = vld [vmem:[%s4386_s17 + $0xb0] sm:$0xff]  ;;  %v3961_v31 = vld [vmem:[%s4386_s17 + $0xb8] sm:$0xff]  ;;  %v3962_v37 = vld [vmem:[%s4386_s17 + $0xc0] sm:$0xff] }
  0x21   : > { %v3976_v28 = vld [vmem:[%s4386_s17 + $0x130] sm:$0xff]  ;;  %v3977_v32 = vld [vmem:[%s4386_s17 + $0x138] sm:$0xff]  ;;  %v3978_v40 = vld [vmem:[%s4386_s17 + $0x140] sm:$0xff] }
  0x22   : > { %v3992_v29 = vld [vmem:[%s4386_s17 + $0x1b0] sm:$0xff]  ;;  %v3993_v33 = vld [vmem:[%s4386_s17 + $0x1b8] sm:$0xff]  ;;  %v3994_v41 = vld [vmem:[%s4386_s17 + $0x1c0] sm:$0xff] }
  0x23   : > { %v3947_v61 = vld [vmem:[%s4386_s17 + $0x48] sm:$0xff] }
  0x24   : > { %v3963_v62 = vld [vmem:[%s4386_s17 + $0xc8] sm:$0xff] }
  0x25   : > { %v3979_v3 = vld [vmem:[%s4386_s17 + $0x148] sm:$0xff] }
  0x26   : > { %v3995_v4 = vld [vmem:[%s4386_s17 + $0x1c8] sm:$0xff] }
  0x2b   : > { %3230 = vmatmul.msk.bf16.gmra.mxu0 %vm395_vm0, %v3939_v6  ;;  %3310 = vmatmul.msk.bf16.gmra.mxu1 %vm395_vm0, %v3955_v7 }
  0x2c   : > { %3390 = vmatmul.msk.bf16.gmra.mxu2 %vm395_vm0, %v3971_v8  ;;  %3470 = vmatmul.msk.bf16.gmra.mxu3 %vm395_vm0, %v3987_v9 }
  0x3b   : > { %3231 = vmatmul.msk.bf16.gmra.mxu0 %vm395_vm0, %v3940_v10  ;;  %3311 = vmatmul.msk.bf16.gmra.mxu1 %vm395_vm0, %v3956_v11 }
  0x3c   : > { %3391 = vmatmul.msk.bf16.gmra.mxu2 %vm395_vm0, %v3972_v12  ;;  %3471 = vmatmul.msk.bf16.gmra.mxu3 %vm395_vm0, %v3988_v13 }
  0x4b   : > { %3232 = vmatmul.msk.bf16.gmra.mxu0 %vm395_vm0, %v3941_v14  ;;  %3312 = vmatmul.msk.bf16.gmra.mxu1 %vm395_vm0, %v3957_v15 }
  0x4c   : > { %3392 = vmatmul.msk.bf16.gmra.mxu2 %vm395_vm0, %v3973_v16  ;;  %3472 = vmatmul.msk.bf16.gmra.mxu3 %vm395_vm0, %v3989_v17 }
  0x5b   : > { %3233 = vmatmul.msk.bf16.gmra.mxu0 %vm395_vm0, %v3942_v18  ;;  %3313 = vmatmul.msk.bf16.gmra.mxu1 %vm395_vm0, %v3958_v19 }
  0x5c   : > { %3393 = vmatmul.msk.bf16.gmra.mxu2 %vm395_vm0, %v3974_v20  ;;  %3473 = vmatmul.msk.bf16.gmra.mxu3 %vm395_vm0, %v3990_v21 }
  0x6b   : > { %3234 = vmatmul.msk.bf16.gmra.mxu0 %vm395_vm0, %v3943_v22  ;;  %3314 = vmatmul.msk.bf16.gmra.mxu1 %vm395_vm0, %v3959_v23 }
  0x6c   : > { %3394 = vmatmul.msk.bf16.gmra.mxu2 %vm395_vm0, %v3975_v24  ;;  %3474 = vmatmul.msk.bf16.gmra.mxu3 %vm395_vm0, %v3991_v25 }
  0x7b   : > { %3235 = vmatmul.msk.bf16.gmra.mxu0 %vm395_vm0, %v3944_v26  ;;  %3315 = vmatmul.msk.bf16.gmra.mxu1 %vm395_vm0, %v3960_v27 }
  0x7c   : > { %3395 = vmatmul.msk.bf16.gmra.mxu2 %vm395_vm0, %v3976_v28  ;;  %3475 = vmatmul.msk.bf16.gmra.mxu3 %vm395_vm0, %v3992_v29 }
  0x8b   : > { %3236 = vmatmul.msk.bf16.gmra.mxu0 %vm395_vm0, %v3945_v30  ;;  %3316 = vmatmul.msk.bf16.gmra.mxu1 %vm395_vm0, %v3961_v31 }
  0x8c   : > { %3396 = vmatmul.msk.bf16.gmra.mxu2 %vm395_vm0, %v3977_v32  ;;  %3476 = vmatmul.msk.bf16.gmra.mxu3 %vm395_vm0, %v3993_v33 }
  0x98   : > { %v453_v38 = vpop.f32.mrf.mxu0  ;;  %v771_v39 = vpop.f32.mrf.mxu1 }
  0x99   : > { %v454_v43 = vadd.f32 %v453_v38, %v4464_v42  ;;  %v772_v44 = vadd.f32 %v771_v39, %v4464_v42  ;;  %v3964_v38 = vld [vmem:[%s4386_s17 + $0xd0] sm:$0xff] }
  0x9b   : > { %3237 = vmatmul.msk.bf16.gmra.mxu0 %vm395_vm0, %v3946_v36  ;;  %3317 = vmatmul.msk.bf16.gmra.mxu1 %vm395_vm0, %v3962_v37  ;;  %v533_v51 = vmax.f32 %v454_v43, 0.0  ;;  %v851_v52 = vmax.f32 %v772_v44, 0.0  ;;  %v3948_v37 = vld [vmem:[%s4386_s17 + $0x50] sm:$0xff] }
  0x9c   : > { %3397 = vmatmul.msk.bf16.gmra.mxu2 %vm395_vm0, %v3978_v40  ;;  %3477 = vmatmul.msk.bf16.gmra.mxu3 %vm395_vm0, %v3994_v41  ;;  %v3980_v44 = vld [vmem:[%s4386_s17 + $0x150] sm:$0xff] }
  0x9f   : > { %v1089_v45 = vpop.f32.mrf.mxu2  ;;  %v1407_v46 = vpop.f32.mrf.mxu3 }
  0xa0   : > { %v455_v47 = vpop.f32.mrf.mxu0  ;;  %v773_v48 = vpop.f32.mrf.mxu1  ;;  %v1090_v57 = vadd.f32 %v1089_v45, %v4464_v42  ;;  %v1408_v58 = vadd.f32 %v1407_v46, %v4464_v42  ;;  %v3996_v45 = vld [vmem:[%s4386_s17 + $0x1d0] sm:$0xff] }
  0xa1   : > { %v456_v49 = vadd.f32 %v455_v47, %v4464_v42  ;;  %v774_v50 = vadd.f32 %v773_v48, %v4464_v42 }
  0xa2   : > { %v1169_v7 = vmax.f32 %v1090_v57, 0.0  ;;  %v1487_v8 = vmax.f32 %v1408_v58, 0.0 }
  0xa3   : > { %v534_v53 = vmax.f32 %v456_v49, 0.0  ;;  %v852_v54 = vmax.f32 %v774_v50, 0.0 }
  0xa5   : > { %v565_v55 = vadd.f32 %v534_v53, %v533_v51  ;;  %v883_v56 = vadd.f32 %v852_v54, %v851_v52 }
  0xa7   : > { %v1091_v59 = vpop.f32.mrf.mxu2  ;;  %v1409_v60 = vpop.f32.mrf.mxu3 }
  0xa8   : > { %v1092_v63 = vadd.f32 %v1091_v59, %v4464_v42  ;;  %v1410_v0 = vadd.f32 %v1409_v60, %v4464_v42  ;;  %v458_v1 = vpop.f32.mrf.mxu0  ;;  %v776_v2 = vpop.f32.mrf.mxu1 }
  0xa9   : > { %v459_v5 = vadd.f32 %v458_v1, %v4464_v42  ;;  %v777_v6 = vadd.f32 %v776_v2, %v4464_v42 }
  0xaa   : > { %v1170_v9 = vmax.f32 %v1092_v63, 0.0  ;;  %v1488_v10 = vmax.f32 %v1410_v0, 0.0 }
  0xab   : > { %v535_v11 = vmax.f32 %v459_v5, 0.0  ;;  %v853_v12 = vmax.f32 %v777_v6, 0.0  ;;  %3238 = vmatmul.msk.bf16.gmra.mxu0 %vm395_vm0, %v3947_v61  ;;  %3318 = vmatmul.msk.bf16.gmra.mxu1 %vm395_vm0, %v3963_v62 }
  0xac   : > { %v1201_v13 = vadd.f32 %v1170_v9, %v1169_v7  ;;  %v1519_v14 = vadd.f32 %v1488_v10, %v1487_v8  ;;  %3398 = vmatmul.msk.bf16.gmra.mxu2 %vm395_vm0, %v3979_v3  ;;  %3478 = vmatmul.msk.bf16.gmra.mxu3 %vm395_vm0, %v3995_v4  ;;  %v3949_v10 = vld [vmem:[%s4386_s17 + $0x58] sm:$0xff] }
  0xad   : > { %v566_v15 = vadd.f32 %v565_v55, %v535_v11  ;;  %v884_v16 = vadd.f32 %v883_v56, %v853_v12  ;;  %v3965_v11 = vld [vmem:[%s4386_s17 + $0xd8] sm:$0xff] }
  0xaf   : > { %v1094_v17 = vpop.f32.mrf.mxu2  ;;  %v1412_v18 = vpop.f32.mrf.mxu3 }
  0xb0   : > { %v1095_v19 = vadd.f32 %v1094_v17, %v4464_v42  ;;  %v1413_v20 = vadd.f32 %v1412_v18, %v4464_v42  ;;  %v460_v21 = vpop.f32.mrf.mxu0  ;;  %v778_v22 = vpop.f32.mrf.mxu1  ;;  %v3997_v17 = vld [vmem:[%s4386_s17 + $0x1d8] sm:$0xff] }
  0xb1   : > { %v461_v23 = vadd.f32 %v460_v21, %v4464_v42  ;;  %v779_v24 = vadd.f32 %v778_v22, %v4464_v42 }
  0xb2   : > { %v1171_v25 = vmax.f32 %v1095_v19, 0.0  ;;  %v1489_v26 = vmax.f32 %v1413_v20, 0.0 }
  0xb3   : > { %v536_v27 = vmax.f32 %v461_v23, 0.0  ;;  %v854_v28 = vmax.f32 %v779_v24, 0.0 }
  0xb4   : > { %v1202_v29 = vadd.f32 %v1201_v13, %v1171_v25  ;;  %v1520_v30 = vadd.f32 %v1519_v14, %v1489_v26 }
  0xb5   : > { %v567_v31 = vadd.f32 %v566_v15, %v536_v27  ;;  %v885_v32 = vadd.f32 %v884_v16, %v854_v28  ;;  %v3981_v16 = vld [vmem:[%s4386_s17 + $0x158] sm:$0xff] }
  0xb7   : > { %v1096_v33 = vpop.f32.mrf.mxu2  ;;  %v1414_v36 = vpop.f32.mrf.mxu3 }
  0xb8   : > { %v1097_v39 = vadd.f32 %v1096_v33, %v4464_v42  ;;  %v1415_v40 = vadd.f32 %v1414_v36, %v4464_v42  ;;  %v463_v41 = vpop.f32.mrf.mxu0  ;;  %v781_v43 = vpop.f32.mrf.mxu1 }
  0xb9   : > { %v464_v46 = vadd.f32 %v463_v41, %v4464_v42  ;;  %v782_v47 = vadd.f32 %v781_v43, %v4464_v42 }
  0xba   : > { %v1172_v48 = vmax.f32 %v1097_v39, 0.0  ;;  %v1490_v49 = vmax.f32 %v1415_v40, 0.0 }
  0xbb   : > { %v537_v50 = vmax.f32 %v464_v46, 0.0  ;;  %v855_v51 = vmax.f32 %v782_v47, 0.0  ;;  %3239 = vmatmul.msk.bf16.gmra.mxu0 %vm395_vm0, %v3948_v37  ;;  %3319 = vmatmul.msk.bf16.gmra.mxu1 %vm395_vm0, %v3964_v38 }
  0xbc   : > { %v1203_v52 = vadd.f32 %v1202_v29, %v1172_v48  ;;  %v1521_v53 = vadd.f32 %v1520_v30, %v1490_v49  ;;  %3399 = vmatmul.msk.bf16.gmra.mxu2 %vm395_vm0, %v3980_v44  ;;  %3479 = vmatmul.msk.bf16.gmra.mxu3 %vm395_vm0, %v3996_v45  ;;  %v3950_v49 = vld [vmem:[%s4386_s17 + $0x60] sm:$0xff] }
  0xbd   : > { %v568_v54 = vadd.f32 %v567_v31, %v537_v50  ;;  %v886_v55 = vadd.f32 %v885_v32, %v855_v51  ;;  %v3966_v50 = vld [vmem:[%s4386_s17 + $0xe0] sm:$0xff] }
  0xbf   : > { %v1099_v56 = vpop.f32.mrf.mxu2  ;;  %v1417_v57 = vpop.f32.mrf.mxu3 }
  0xc0   : > { %v1100_v58 = vadd.f32 %v1099_v56, %v4464_v42  ;;  %v1418_v59 = vadd.f32 %v1417_v57, %v4464_v42  ;;  %v465_v60 = vpop.f32.mrf.mxu0  ;;  %v783_v61 = vpop.f32.mrf.mxu1  ;;  %v3998_v56 = vld [vmem:[%s4386_s17 + $0x1e0] sm:$0xff] }
  0xc1   : > { %v466_v62 = vadd.f32 %v465_v60, %v4464_v42  ;;  %v784_v63 = vadd.f32 %v783_v61, %v4464_v42 }
  0xc2   : > { %v1173_v0 = vmax.f32 %v1100_v58, 0.0  ;;  %v1491_v1 = vmax.f32 %v1418_v59, 0.0 }
  0xc3   : > { %v538_v2 = vmax.f32 %v466_v62, 0.0  ;;  %v856_v3 = vmax.f32 %v784_v63, 0.0 }
  0xc4   : > { %v1204_v4 = vadd.f32 %v1203_v52, %v1173_v0  ;;  %v1522_v5 = vadd.f32 %v1521_v53, %v1491_v1 }
  0xc5   : > { %v569_v6 = vadd.f32 %v568_v54, %v538_v2  ;;  %v887_v7 = vadd.f32 %v886_v55, %v856_v3  ;;  %v3982_v55 = vld [vmem:[%s4386_s17 + $0x160] sm:$0xff] }
  0xc7   : > { %v1101_v8 = vpop.f32.mrf.mxu2  ;;  %v1419_v9 = vpop.f32.mrf.mxu3 }
  0xc8   : > { %v1102_v12 = vadd.f32 %v1101_v8, %v4464_v42  ;;  %v1420_v13 = vadd.f32 %v1419_v9, %v4464_v42  ;;  %v468_v14 = vpop.f32.mrf.mxu0  ;;  %v786_v15 = vpop.f32.mrf.mxu1 }
  0xc9   : > { %v469_v18 = vadd.f32 %v468_v14, %v4464_v42  ;;  %v787_v19 = vadd.f32 %v786_v15, %v4464_v42 }
  0xca   : > { %v1174_v20 = vmax.f32 %v1102_v12, 0.0  ;;  %v1492_v21 = vmax.f32 %v1420_v13, 0.0 }
  0xcb   : > { %v539_v22 = vmax.f32 %v469_v18, 0.0  ;;  %v857_v23 = vmax.f32 %v787_v19, 0.0  ;;  %3240 = vmatmul.msk.bf16.gmra.mxu0 %vm395_vm0, %v3949_v10  ;;  %3320 = vmatmul.msk.bf16.gmra.mxu1 %vm395_vm0, %v3965_v11 }
  0xcc   : > { %v1205_v24 = vadd.f32 %v1204_v4, %v1174_v20  ;;  %v1523_v25 = vadd.f32 %v1522_v5, %v1492_v21  ;;  %3400 = vmatmul.msk.bf16.gmra.mxu2 %vm395_vm0, %v3981_v16  ;;  %3480 = vmatmul.msk.bf16.gmra.mxu3 %vm395_vm0, %v3997_v17  ;;  %v3951_v16 = vld [vmem:[%s4386_s17 + $0x68] sm:$0xff] }
  0xcd   : > { %v570_v26 = vadd.f32 %v569_v6, %v539_v22  ;;  %v888_v27 = vadd.f32 %v887_v7, %v857_v23  ;;  %v3967_v17 = vld [vmem:[%s4386_s17 + $0xe8] sm:$0xff] }
  0xce   : > { %v3983_v21 = vld [vmem:[%s4386_s17 + $0x168] sm:$0xff] }
  0xcf   : > { %v1104_v28 = vpop.f32.mrf.mxu2  ;;  %v1422_v29 = vpop.f32.mrf.mxu3  ;;  %v3999_v22 = vld [vmem:[%s4386_s17 + $0x1e8] sm:$0xff] }
  0xd0   : > { %v1105_v30 = vadd.f32 %v1104_v28, %v4464_v42  ;;  %v1423_v31 = vadd.f32 %v1422_v29, %v4464_v42  ;;  %v470_v32 = vpop.f32.mrf.mxu0  ;;  %v788_v33 = vpop.f32.mrf.mxu1 }
  0xd1   : > { %v471_v36 = vadd.f32 %v470_v32, %v4464_v42  ;;  %v789_v37 = vadd.f32 %v788_v33, %v4464_v42 }
  0xd2   : > { %v1175_v38 = vmax.f32 %v1105_v30, 0.0  ;;  %v1493_v39 = vmax.f32 %v1423_v31, 0.0 }
  0xd3   : > { %v540_v40 = vmax.f32 %v471_v36, 0.0  ;;  %v858_v41 = vmax.f32 %v789_v37, 0.0 }
  0xd4   : > { %v1206_v43 = vadd.f32 %v1205_v24, %v1175_v38  ;;  %v1524_v44 = vadd.f32 %v1523_v25, %v1493_v39 }
  0xd5   : > { %v571_v45 = vadd.f32 %v570_v26, %v540_v40  ;;  %v889_v46 = vadd.f32 %v888_v27, %v858_v41 }
  0xd7   : > { %v1106_v47 = vpop.f32.mrf.mxu2  ;;  %v1424_v48 = vpop.f32.mrf.mxu3 }
  0xd8   : > { %v1107_v51 = vadd.f32 %v1106_v47, %v4464_v42  ;;  %v1425_v52 = vadd.f32 %v1424_v48, %v4464_v42  ;;  %v473_v53 = vpop.f32.mrf.mxu0  ;;  %v791_v54 = vpop.f32.mrf.mxu1 }
  0xd9   : > { %v474_v57 = vadd.f32 %v473_v53, %v4464_v42  ;;  %v792_v58 = vadd.f32 %v791_v54, %v4464_v42 }
  0xda   : > { %v1176_v59 = vmax.f32 %v1107_v51, 0.0  ;;  %v1494_v60 = vmax.f32 %v1425_v52, 0.0 }
  0xdb   : > { %v541_v61 = vmax.f32 %v474_v57, 0.0  ;;  %v859_v62 = vmax.f32 %v792_v58, 0.0  ;;  %3241 = vmatmul.msk.bf16.gmra.mxu0 %vm395_vm0, %v3950_v49  ;;  %3321 = vmatmul.msk.bf16.gmra.mxu1 %vm395_vm0, %v3966_v50  ;;  %v3952_v58 = vld [vmem:[%s4386_s17 + $0x70] sm:$0xff] }
  0xdc   : > { %v1207_v63 = vadd.f32 %v1206_v43, %v1176_v59  ;;  %v1525_v0 = vadd.f32 %v1524_v44, %v1494_v60  ;;  %3401 = vmatmul.msk.bf16.gmra.mxu2 %vm395_vm0, %v3982_v55  ;;  %3481 = vmatmul.msk.bf16.gmra.mxu3 %vm395_vm0, %v3998_v56  ;;  %v3968_v59 = vld [vmem:[%s4386_s17 + $0xf0] sm:$0xff] }
  0xdd   : > { %v572_v1 = vadd.f32 %v571_v45, %v541_v61  ;;  %v890_v2 = vadd.f32 %v889_v46, %v859_v62  ;;  %v3984_v62 = vld [vmem:[%s4386_s17 + $0x170] sm:$0xff] }
  0xdf   : > { %v1109_v3 = vpop.f32.mrf.mxu2  ;;  %v1427_v4 = vpop.f32.mrf.mxu3 }
  0xe0   : > { %v1110_v5 = vadd.f32 %v1109_v3, %v4464_v42  ;;  %v475_v6 = vpop.f32.mrf.mxu0  ;;  %v793_v7 = vpop.f32.mrf.mxu1  ;;  %v1428_v18 = vadd.f32 %v1427_v4, %v4464_v42 }
  0xe1   : > { %v476_v9 = vadd.f32 %v475_v6, %v4464_v42  ;;  %v794_v10 = vadd.f32 %v793_v7, %v4464_v42 }
  0xe2   : > { %v1177_v8 = vmax.f32 %v1110_v5, 0.0  ;;  %v1495_v31 = vmax.f32 %v1428_v18, 0.0 }
  0xe3   : > { %v542_v12 = vmax.f32 %v476_v9, 0.0  ;;  %v860_v13 = vmax.f32 %v794_v10, 0.0 }
  0xe4   : > { %v1208_v11 = vadd.f32 %v1207_v63, %v1177_v8  ;;  %v1526_v40 = vadd.f32 %v1525_v0, %v1495_v31  ;;  %v4000_v63 = vld [vmem:[%s4386_s17 + $0x1f0] sm:$0xff]  ;;  %v3969_v31 = vld [vmem:[%s4386_s17 + $0xf8] sm:$0xff] }
  0xe5   : > { %v573_v27 = vadd.f32 %v572_v1, %v542_v12  ;;  %v891_v28 = vadd.f32 %v890_v2, %v860_v13 }
  0xe7   : > { %v1111_v14 = vpop.f32.mrf.mxu2  ;;  %v1429_v15 = vpop.f32.mrf.mxu3 }
  0xe8   : > { %v478_v19 = vpop.f32.mrf.mxu0  ;;  %v796_v20 = vpop.f32.mrf.mxu1  ;;  %v1112_v25 = vadd.f32 %v1111_v14, %v4464_v42  ;;  %v1430_v26 = vadd.f32 %v1429_v15, %v4464_v42 }
  0xe9   : > { %v479_v23 = vadd.f32 %v478_v19, %v4464_v42  ;;  %v797_v24 = vadd.f32 %v796_v20, %v4464_v42 }
  0xea   : > { %v1178_v36 = vmax.f32 %v1112_v25, 0.0  ;;  %v1496_v37 = vmax.f32 %v1430_v26, 0.0 }
  0xeb   : > { %v543_v29 = vmax.f32 %v479_v23, 0.0  ;;  %v861_v30 = vmax.f32 %v797_v24, 0.0  ;;  %3242 = vmatmul.msk.bf16.gmra.mxu0 %vm395_vm0, %v3951_v16  ;;  %3322 = vmatmul.msk.bf16.gmra.mxu1 %vm395_vm0, %v3967_v17 }
  0xec   : > { %3402 = vmatmul.msk.bf16.gmra.mxu2 %vm395_vm0, %v3983_v21  ;;  %3482 = vmatmul.msk.bf16.gmra.mxu3 %vm395_vm0, %v3999_v22  ;;  %v1209_v46 = vadd.f32 %v1208_v11, %v1178_v36  ;;  %v1527_v47 = vadd.f32 %v1526_v40, %v1496_v37  ;;  %v3985_v36 = vld [vmem:[%s4386_s17 + $0x178] sm:$0xff] }
  0xed   : > { %v574_v32 = vadd.f32 %v573_v27, %v543_v29  ;;  %v892_v33 = vadd.f32 %v891_v28, %v861_v30  ;;  %v3953_v30 = vld [vmem:[%s4386_s17 + $0x78] sm:$0xff] }
  0xee   : > { %v4001_v37 = vld [vmem:[%s4386_s17 + $0x1f8] sm:$0xff] }
  0xef   : > { %v1114_v38 = vpop.f32.mrf.mxu2  ;;  %v1432_v39 = vpop.f32.mrf.mxu3 }
  0xf0   : > { %v1115_v41 = vadd.f32 %v1114_v38, %v4464_v42  ;;  %v1433_v43 = vadd.f32 %v1432_v39, %v4464_v42  ;;  %v480_v44 = vpop.f32.mrf.mxu0  ;;  %v798_v45 = vpop.f32.mrf.mxu1 }
  0xf1   : > { %v481_v50 = vadd.f32 %v480_v44, %v4464_v42  ;;  %v799_v51 = vadd.f32 %v798_v45, %v4464_v42 }
  0xf2   : > { %v1179_v48 = vmax.f32 %v1115_v41, 0.0  ;;  %v1497_v49 = vmax.f32 %v1433_v43, 0.0 }
  0xf3   : > { %v544_v54 = vmax.f32 %v481_v50, 0.0  ;;  %v862_v55 = vmax.f32 %v799_v51, 0.0 }
  0xf4   : > { %v1210_v52 = vadd.f32 %v1209_v46, %v1179_v48  ;;  %v1528_v53 = vadd.f32 %v1527_v47, %v1497_v49 }
  0xf5   : > { %v575_v4 = vadd.f32 %v574_v32, %v544_v54  ;;  %v893_v5 = vadd.f32 %v892_v33, %v862_v55 }
  0xf7   : > { %v1116_v56 = vpop.f32.mrf.mxu2  ;;  %v1434_v57 = vpop.f32.mrf.mxu3 }
  0xf8   : > { %v483_v60 = vpop.f32.mrf.mxu0  ;;  %v801_v61 = vpop.f32.mrf.mxu1  ;;  %v1117_v2 = vadd.f32 %v1116_v56, %v4464_v42  ;;  %v1435_v3 = vadd.f32 %v1434_v57, %v4464_v42 }
  0xf9   : > { %v484_v0 = vadd.f32 %v483_v60, %v4464_v42  ;;  %v802_v1 = vadd.f32 %v801_v61, %v4464_v42  ;;  %v4287_v61 = vmov 0  }
  0xfa   : > { %v1180_v10 = vmax.f32 %v1117_v2, 0.0  ;;  %v1498_v11 = vmax.f32 %v1435_v3, 0.0  ;;  %4151 = vset.pattern.permute.xlu0 %v4287_v61 }
  0xfb   : > { %v545_v6 = vmax.f32 %v484_v0, 0.0  ;;  %v863_v7 = vmax.f32 %v802_v1, 0.0  ;;  %3243 = vmatmul.msk.bf16.gmra.mxu0 %vm395_vm0, %v3952_v58  ;;  %3323 = vmatmul.msk.bf16.gmra.mxu1 %vm395_vm0, %v3968_v59 }
  0xfc   : > { %3403 = vmatmul.msk.bf16.gmra.mxu2 %vm395_vm0, %v3984_v62  ;;  %3483 = vmatmul.msk.bf16.gmra.mxu3 %vm395_vm0, %v4000_v63  ;;  %v1211_v18 = vadd.f32 %v1210_v52, %v1180_v10  ;;  %v1529_v19 = vadd.f32 %v1528_v53, %v1498_v11  ;;  %v1565_v62 = vld [vmem:[%s4588_s28] sm:$0x1] }
  0xfd   : > { %v576_v8 = vadd.f32 %v575_v4, %v545_v6  ;;  %v894_v9 = vadd.f32 %v893_v5, %v863_v7  ;;  %1568 = vperm.xlu0 %4151, %v1565_v62  }
  0xff   : > { %v1119_v12 = vpop.f32.mrf.mxu2  ;;  %v1437_v13 = vpop.f32.mrf.mxu3 }
 0x100   : > { %v1120_v14 = vadd.f32 %v1119_v12, %v4464_v42  ;;  %v1438_v15 = vadd.f32 %v1437_v13, %v4464_v42  ;;  %v485_v16 = vpop.f32.mrf.mxu0  ;;  %v803_v17 = vpop.f32.mrf.mxu1 }
 0x101   : > { %v486_v22 = vadd.f32 %v485_v16, %v4464_v42  ;;  %v804_v23 = vadd.f32 %v803_v17, %v4464_v42 }
 0x102   : > { %v1181_v20 = vmax.f32 %v1120_v14, 0.0  ;;  %v1499_v21 = vmax.f32 %v1438_v15, 0.0 }
 0x103   : > { %v546_v26 = vmax.f32 %v486_v22, 0.0  ;;  %v864_v27 = vmax.f32 %v804_v23, 0.0 }
 0x104   : > { %v1212_v24 = vadd.f32 %v1211_v18, %v1181_v20  ;;  %v1530_v25 = vadd.f32 %v1529_v19, %v1499_v21 }
 0x105   : > { %v577_v43 = vadd.f32 %v576_v8, %v546_v26  ;;  %v895_v44 = vadd.f32 %v894_v9, %v864_v27 }
 0x107   : > { %v1121_v28 = vpop.f32.mrf.mxu2  ;;  %v1439_v29 = vpop.f32.mrf.mxu3 }
 0x108   : > { %v488_v32 = vpop.f32.mrf.mxu0  ;;  %v806_v33 = vpop.f32.mrf.mxu1  ;;  %v1122_v40 = vadd.f32 %v1121_v28, %v4464_v42  ;;  %v1440_v41 = vadd.f32 %v1439_v29, %v4464_v42 }
 0x109   : > { %v489_v38 = vadd.f32 %v488_v32, %v4464_v42  ;;  %v807_v39 = vadd.f32 %v806_v33, %v4464_v42 }
 0x10a   : > { %v1182_v49 = vmax.f32 %v1122_v40, 0.0  ;;  %v1500_v50 = vmax.f32 %v1440_v41, 0.0 }
 0x10b   : > { %v547_v45 = vmax.f32 %v489_v38, 0.0  ;;  %v865_v46 = vmax.f32 %v807_v39, 0.0  ;;  %3244 = vmatmul.msk.bf16.gmra.mxu0 %vm395_vm0, %v3953_v30  ;;  %3324 = vmatmul.msk.bf16.gmra.mxu1 %vm395_vm0, %v3969_v31 }
 0x10c   : > { %3404 = vmatmul.msk.bf16.gmra.mxu2 %vm395_vm0, %v3985_v36  ;;  %3484 = vmatmul.msk.bf16.gmra.mxu3 %vm395_vm0, %v4001_v37  ;;  %v1213_v57 = vadd.f32 %v1212_v24, %v1182_v49  ;;  %v1531_v58 = vadd.f32 %v1530_v25, %v1500_v50 }
 0x10d   : > { %v578_v47 = vadd.f32 %v577_v43, %v547_v45  ;;  %v896_v48 = vadd.f32 %v895_v44, %v865_v46 }
 0x10f   : > { %v1124_v51 = vpop.f32.mrf.mxu2  ;;  %v1442_v52 = vpop.f32.mrf.mxu3 }
 0x110   : > { %v1125_v53 = vadd.f32 %v1124_v51, %v4464_v42  ;;  %v1443_v54 = vadd.f32 %v1442_v52, %v4464_v42  ;;  %v490_v55 = vpop.f32.mrf.mxu0  ;;  %v808_v56 = vpop.f32.mrf.mxu1 }
 0x111   : > { %v491_v63 = vadd.f32 %v490_v55, %v4464_v42  ;;  %v809_v0 = vadd.f32 %v808_v56, %v4464_v42 }
 0x112   : > { %v1183_v59 = vmax.f32 %v1125_v53, 0.0  ;;  %v1501_v60 = vmax.f32 %v1443_v54, 0.0 }
 0x113   : > { %v548_v3 = vmax.f32 %v491_v63, 0.0  ;;  %v866_v4 = vmax.f32 %v809_v0, 0.0 }
 0x114   : > { %v1214_v1 = vadd.f32 %v1213_v57, %v1183_v59  ;;  %v1532_v2 = vadd.f32 %v1531_v58, %v1501_v60 }
 0x115   : > { %v579_v13 = vadd.f32 %v578_v47, %v548_v3  ;;  %v897_v14 = vadd.f32 %v896_v48, %v866_v4 }
 0x117   : > { %v1126_v5 = vpop.f32.mrf.mxu2  ;;  %v1444_v6 = vpop.f32.mrf.mxu3 }
 0x118   : > { %v493_v7 = vpop.f32.mrf.mxu0  ;;  %v811_v8 = vpop.f32.mrf.mxu1  ;;  %v1127_v11 = vadd.f32 %v1126_v5, %v4464_v42  ;;  %v1445_v12 = vadd.f32 %v1444_v6, %v4464_v42 }
 0x119   : > { %v494_v9 = vadd.f32 %v493_v7, %v4464_v42  ;;  %v812_v10 = vadd.f32 %v811_v8, %v4464_v42 }
 0x11a   : > { %v1184_v19 = vmax.f32 %v1127_v11, 0.0  ;;  %v1502_v20 = vmax.f32 %v1445_v12, 0.0 }
 0x11b   : > { %v549_v15 = vmax.f32 %v494_v9, 0.0  ;;  %v867_v16 = vmax.f32 %v812_v10, 0.0 }
 0x11c   : > { %v1215_v27 = vadd.f32 %v1214_v1, %v1184_v19  ;;  %v1533_v28 = vadd.f32 %v1532_v2, %v1502_v20 }
 0x11d   : > { %v580_v17 = vadd.f32 %v579_v13, %v549_v15  ;;  %v898_v18 = vadd.f32 %v897_v14, %v867_v16 }
 0x11f   : > { %v1129_v21 = vpop.f32.mrf.mxu2  ;;  %v1447_v22 = vpop.f32.mrf.mxu3 }
 0x120   : > { %v1130_v23 = vadd.f32 %v1129_v21, %v4464_v42  ;;  %v1448_v24 = vadd.f32 %v1447_v22, %v4464_v42  ;;  %v495_v25 = vpop.f32.mrf.mxu0  ;;  %v813_v26 = vpop.f32.mrf.mxu1 }
 0x121   : > { %v496_v31 = vadd.f32 %v495_v25, %v4464_v42  ;;  %v814_v32 = vadd.f32 %v813_v26, %v4464_v42 }
 0x122   : > { %v1185_v29 = vmax.f32 %v1130_v23, 0.0  ;;  %v1503_v30 = vmax.f32 %v1448_v24, 0.0 }
 0x123   : > { %v550_v37 = vmax.f32 %v496_v31, 0.0  ;;  %v868_v38 = vmax.f32 %v814_v32, 0.0 }
 0x124   : > { %v1216_v33 = vadd.f32 %v1215_v27, %v1185_v29  ;;  %v1534_v36 = vadd.f32 %v1533_v28, %v1503_v30 }
 0x125   : > { %v581_v48 = vadd.f32 %v580_v17, %v550_v37  ;;  %v899_v49 = vadd.f32 %v898_v18, %v868_v38 }
 0x127   : > { %v1131_v39 = vpop.f32.mrf.mxu2  ;;  %v1449_v40 = vpop.f32.mrf.mxu3 }
 0x128   : > { %v498_v41 = vpop.f32.mrf.mxu0  ;;  %v816_v43 = vpop.f32.mrf.mxu1  ;;  %v1132_v46 = vadd.f32 %v1131_v39, %v4464_v42  ;;  %v1450_v47 = vadd.f32 %v1449_v40, %v4464_v42 }
 0x129   : > { %v499_v44 = vadd.f32 %v498_v41, %v4464_v42  ;;  %v817_v45 = vadd.f32 %v816_v43, %v4464_v42 }
 0x12a   : > { %v1186_v54 = vmax.f32 %v1132_v46, 0.0  ;;  %v1504_v55 = vmax.f32 %v1450_v47, 0.0 }
 0x12b   : > { %v551_v50 = vmax.f32 %v499_v44, 0.0  ;;  %v869_v51 = vmax.f32 %v817_v45, 0.0 }
 0x12c   : > { %v1217_v63 = vadd.f32 %v1216_v33, %v1186_v54  ;;  %v1535_v0 = vadd.f32 %v1534_v36, %v1504_v55 }
 0x12d   : > { %v582_v52 = vadd.f32 %v581_v48, %v551_v50  ;;  %v900_v53 = vadd.f32 %v899_v49, %v869_v51 }
 0x12f   : > { %v1134_v56 = vpop.f32.mrf.mxu2  ;;  %v1452_v57 = vpop.f32.mrf.mxu3 }
 0x130   : > { %v1135_v58 = vadd.f32 %v1134_v56, %v4464_v42  ;;  %v1453_v59 = vadd.f32 %v1452_v57, %v4464_v42  ;;  %v500_v60 = vpop.f32.mrf.mxu0  ;;  %v818_v62 = vpop.f32.mrf.mxu1 }
 0x131   : > { %v501_v3 = vadd.f32 %v500_v60, %v4464_v42  ;;  %v819_v4 = vadd.f32 %v818_v62, %v4464_v42 }
 0x132   : > { %v1187_v1 = vmax.f32 %v1135_v58, 0.0  ;;  %v1505_v2 = vmax.f32 %v1453_v59, 0.0 }
 0x133   : > { %v552_v7 = vmax.f32 %v501_v3, 0.0  ;;  %v870_v8 = vmax.f32 %v819_v4, 0.0 }
 0x134   : > { %v1218_v5 = vadd.f32 %v1217_v63, %v1187_v1  ;;  %v1536_v6 = vadd.f32 %v1535_v0, %v1505_v2 }
 0x135   : > { %v583_v17 = vadd.f32 %v582_v52, %v552_v7  ;;  %v901_v18 = vadd.f32 %v900_v53, %v870_v8 }
 0x137   : > { %v1136_v9 = vpop.f32.mrf.mxu2  ;;  %v1454_v10 = vpop.f32.mrf.mxu3 }
 0x138   : > { %v503_v11 = vpop.f32.mrf.mxu0  ;;  %v821_v12 = vpop.f32.mrf.mxu1  ;;  %v1137_v15 = vadd.f32 %v1136_v9, %v4464_v42  ;;  %v1455_v16 = vadd.f32 %v1454_v10, %v4464_v42 }
 0x139   : > { %v504_v13 = vadd.f32 %v503_v11, %v4464_v42  ;;  %v822_v14 = vadd.f32 %v821_v12, %v4464_v42 }
 0x13a   : > { %v1188_v23 = vmax.f32 %v1137_v15, 0.0  ;;  %v1506_v24 = vmax.f32 %v1455_v16, 0.0  ;;  %v4023_v15 = vld [vmem:[%s5667_s3 + $0xe4] sm:$0xf] }
 0x13b   : > { %v553_v19 = vmax.f32 %v504_v13, 0.0  ;;  %v871_v20 = vmax.f32 %v822_v14, 0.0  ;;  %v3571_v13 = vld [vmem:[%s5667_s3 + $0xe0] sm:$0xf]  ;;  %v4024_v14 = vld [vmem:[%s5667_s3 + $0xec] sm:$0xf0] }
 0x13c   : > { %v1219_v31 = vadd.f32 %v1218_v5, %v1188_v23  ;;  %v1537_v32 = vadd.f32 %v1536_v6, %v1506_v24  ;;  %v3572_v16 = vor.u32 %v4024_v14, %v3571_v13  ;;  %v3555_v13 = vld [vmem:[%s5667_s3 + $0xa8] sm:$0xf]  ;;  %v4019_v14 = vld [vmem:[%s5667_s3 + $0xb4] sm:$0xf0] }
 0x13d   : > { %v4616_v21 = vadd.f32 %v583_v17, %v553_v19  ;;  %v4618_v22 = vadd.f32 %v901_v18, %v871_v20  ;;  %v3573_v17 = vld [vmem:[%s5667_s3 + $0xf0] sm:$0xf0]  ;;  %v3579_v18 = vld [vmem:[%s5667_s3 + $0xe8] sm:$0xf]  ;;  %v4025_v19 = vld [vmem:[%s5667_s3 + $0xf4] sm:$0xf0] }
 0x13e   : > { %v3576_v24 = vor.u32 %v4023_v15, %v3573_v17  ;;  %1748 = vmatpush.bf16.msrb.mxu0 %v3572_v16 }
 0x13f   : > { %v1139_v25 = vpop.f32.mrf.mxu2  ;;  %v1457_v26 = vpop.f32.mrf.mxu3 }
 0x140   : > { %v1140_v27 = vadd.f32 %v1139_v25, %v4464_v42  ;;  %v1458_v28 = vadd.f32 %v1457_v26, %v4464_v42  ;;  %v505_v29 = vpop.f32.mrf.mxu0  ;;  %v823_v30 = vpop.f32.mrf.mxu1  ;;  %v3580_v25 = vor.u32 %v4025_v19, %v3579_v18  ;;  %1761 = vmatpush.bf16.msrb.mxu1 %v3576_v24  ;;  %v4015_v24 = vld [vmem:[%s5667_s3 + $0x8c] sm:$0xf0] }
 0x141   : > { %v506_v60 = vadd.f32 %v505_v29, %v4464_v42  ;;  %v824_v62 = vadd.f32 %v823_v30, %v4464_v42  ;;  %v3559_v30 = vld [vmem:[%s5667_s3 + $0xc0] sm:$0xf] }
 0x142   : > { %v1189_v33 = vmax.f32 %v1140_v27, 0.0  ;;  %v1507_v36 = vmax.f32 %v1458_v28, 0.0  ;;  %1774 = vmatpush.bf16.msrb.mxu2 %v3580_v25  ;;  %v4014_v25 = vld [vmem:[%s5667_s3 + $0x84] sm:$0xf] }
 0x143   : > { %v554_v1 = vmax.f32 %v506_v60, 0.0  ;;  %v872_v2 = vmax.f32 %v824_v62, 0.0 }
 0x144   : > { %v4622_v37 = vadd.f32 %v1219_v31, %v1189_v33  ;;  %v4624_v38 = vadd.f32 %v1537_v32, %v1507_v36  ;;  %v4021_v31 = vld [vmem:[%s5667_s3 + $0xcc] sm:$0xf0]  ;;  %v4020_v32 = vld [vmem:[%s5667_s3 + $0xc4] sm:$0xf] }
 0x145   : > { %v585_v33 = vadd.f32 %v4616_v21, %v554_v1  ;;  %v3560_v36 = vor.u32 %v4021_v31, %v3559_v30  ;;  %v903_v1 = vadd.f32 %v4618_v22, %v872_v2  ;;  %v3543_v30 = vld [vmem:[%s5667_s3 + $0x88] sm:$0xf]  ;;  %v4016_v31 = vld [vmem:[%s5667_s3 + $0x94] sm:$0xf0] }
 0x147   : > { %v1141_v39 = vpop.f32.mrf.mxu2  ;;  %v1459_v40 = vpop.f32.mrf.mxu3  ;;  %1749 = vmatpush.bf16.msrb.mxu0 %v3560_v36  ;;  %v3544_v36 = vor.u32 %v4016_v31, %v3543_v30 }
 0x148   : > { %v508_v41 = vpop.f32.mrf.mxu0  ;;  %v826_v43 = vpop.f32.mrf.mxu1  ;;  %v1142_v63 = vadd.f32 %v1141_v39, %v4464_v42  ;;  %v1460_v0 = vadd.f32 %v1459_v40, %v4464_v42  ;;  %v3561_v39 = vld [vmem:[%s5667_s3 + $0xd0] sm:$0xf0]  ;;  %v3567_v40 = vld [vmem:[%s5667_s3 + $0xc8] sm:$0xf] }
 0x149   : > { %v509_v3 = vadd.f32 %v508_v41, %v4464_v42  ;;  %v4648_v4 = vadd.f32 %v826_v43, %v4464_v42  ;;  %v4022_v41 = vld [vmem:[%s5667_s3 + $0xd4] sm:$0xf0] }
 0x14a   : > { %v1190_v5 = vmax.f32 %v1142_v63, 0.0  ;;  %v1508_v6 = vmax.f32 %v1460_v0, 0.0 }
 0x14b   : > { %v555_v20 = vmax.f32 %v509_v3, 0.0  ;;  %v873_v26 = vmax.f32 %v4648_v4, 0.0 }
 0x14c   : > { %v1221_v22 = vadd.f32 %v4622_v37, %v1190_v5  ;;  %v1539_v2 = vadd.f32 %v4624_v38, %v1508_v6  ;;  %v3556_v38 = vor.u32 %v4019_v14, %v3555_v13 }
 0x14d   : > { %v586_v4 = vadd.f32 %v585_v33, %v555_v20  ;;  %v904_v19 = vadd.f32 %v903_v1, %v873_v26 }
 0x14f   : > { %v1144_v44 = vpop.f32.mrf.mxu2  ;;  %v1462_v45 = vpop.f32.mrf.mxu3 }
 0x150   : > { %v510_v46 = vpop.f32.mrf.mxu0  ;;  %v828_v47 = vpop.f32.mrf.mxu1  ;;  %v4651_v7 = vadd.f32 %v1144_v44, %v4464_v42  ;;  %v4654_v8 = vadd.f32 %v1462_v45, %v4464_v42  ;;  %v3564_v45 = vor.u32 %v4020_v32, %v3561_v39 }
 0x151   : > { %v511_v23 = vadd.f32 %v510_v46, %v4464_v42  ;;  %v4687_v29 = vadd.f32 %v828_v47, %v4464_v42  ;;  %v3568_v46 = vor.u32 %v4022_v41, %v3567_v40 }
 0x152   : > { %v1191_v27 = vmax.f32 %v4651_v7, 0.0  ;;  %v1509_v28 = vmax.f32 %v4654_v8, 0.0  ;;  %1762 = vmatpush.bf16.msrb.mxu1 %v3564_v45  ;;  %v3549_v8 = vld [vmem:[%s5667_s3 + $0xb0] sm:$0xf0] }
 0x153   : > { %v556_v43 = vmax.f32 %v511_v23, 0.0  ;;  %v874_v21 = vmax.f32 %v4687_v29, 0.0  ;;  %1775 = vmatpush.bf16.msrb.mxu2 %v3568_v46 }
 0x154   : > { %v1222_v20 = vadd.f32 %v1221_v22, %v1191_v27  ;;  %v1540_v23 = vadd.f32 %v1539_v2, %v1509_v28  ;;  %v3537_v28 = vld [vmem:[%s5667_s3 + $0x90] sm:$0xf0] }
 0x155   : > { %v587_v29 = vadd.f32 %v586_v4, %v556_v43  ;;  %v3540_v33 = vor.u32 %v4014_v25, %v3537_v28  ;;  %v905_v45 = vadd.f32 %v904_v19, %v874_v21 }
 0x157   : > { %v1146_v48 = vpop.f32.mrf.mxu2  ;;  %v1464_v49 = vpop.f32.mrf.mxu3  ;;  %1776 = vmatpush.bf16.msrb.mxu2 %v3556_v38 }
 0x158   : > { %v513_v50 = vpop.f32.mrf.mxu0  ;;  %v831_v51 = vpop.f32.mrf.mxu1  ;;  %v1147_v44 = vadd.f32 %v1146_v48, %v4464_v42  ;;  %v1465_v47 = vadd.f32 %v1464_v49, %v4464_v42  ;;  %v3547_v49 = vld [vmem:[%s5667_s3 + $0xa0] sm:$0xf] }
 0x159   : > { %v4712_v60 = vadd.f32 %v513_v50, %v4464_v42  ;;  %v4715_v62 = vadd.f32 %v831_v51, %v4464_v42  ;;  %v4018_v50 = vld [vmem:[%s5667_s3 + $0xac] sm:$0xf0]  ;;  %v4017_v51 = vld [vmem:[%s5667_s3 + $0xa4] sm:$0xf] }
 0x15a   : > { %v3548_v7 = vor.u32 %v4018_v50, %v3547_v49  ;;  %v1192_v15 = vmax.f32 %v1147_v44, 0.0  ;;  %v3552_v5 = vor.u32 %v4017_v51, %v3549_v8  ;;  %v1510_v6 = vmax.f32 %v1465_v47, 0.0  ;;  %v3525_v50 = vld [vmem:[%s5667_s3 + $0x70] sm:$0xf0]  ;;  %v3531_v51 = vld [vmem:[%s5667_s3 + $0x68] sm:$0xf] }
 0x15b   : > { %v557_v16 = vmax.f32 %v4712_v60, 0.0  ;;  %v875_v17 = vmax.f32 %v4715_v62, 0.0  ;;  %1777 = vmatpush.bf16.msrb.mxu2 %v3544_v36  ;;  %v4013_v8 = vld [vmem:[%s5667_s3 + $0x74] sm:$0xf0] }
 0x15c   : > { %1750 = vmatpush.bf16.msrb.mxu0 %v3548_v7  ;;  %1763 = vmatpush.bf16.msrb.mxu1 %v3552_v5  ;;  %v1223_v46 = vadd.f32 %v1222_v20, %v1192_v15  ;;  %v3532_v15 = vor.u32 %v4013_v8, %v3531_v51  ;;  %v4003_v8 = vld [vmem:[%s5667_s3 + $0xc] sm:$0xf0] }
 0x15d   : > { %v588_v62 = vadd.f32 %v587_v29, %v557_v16  ;;  %v4009_v16 = vld [vmem:[%s5667_s3 + $0x4c] sm:$0xf0] }
 0x15f   : > { %v4626_v52 = vpop.f32.mrf.mxu2  ;;  %v4628_v53 = vpop.f32.mrf.mxu3  ;;  %1778 = vmatpush.bf16.msrb.mxu2 %v3532_v15 }
 0x160   : > { %v4630_v54 = vpop.f32.mrf.mxu0  ;;  %v4632_v55 = vpop.f32.mrf.mxu1  ;;  %v1150_v37 = vadd.f32 %v4626_v52, %v4464_v42  ;;  %v1468_v18 = vadd.f32 %v4628_v53, %v4464_v42  ;;  %v3535_v52 = vld [vmem:[%s5667_s3 + $0x80] sm:$0xf]  ;;  %1764 = vmatpush.bf16.msrb.mxu1 %v3540_v33 }
 0x161   : > { %v516_v53 = vadd.f32 %v4630_v54, %v4464_v42  ;;  %v834_v26 = vadd.f32 %v4632_v55, %v4464_v42  ;;  %v3536_v27 = vor.u32 %v4015_v24, %v3535_v52  ;;  %v3519_v52 = vld [vmem:[%s5667_s3 + $0x48] sm:$0xf] }
 0x162   : > { %v1193_v32 = vmax.f32 %v1150_v37, 0.0  ;;  %v1511_v55 = vmax.f32 %v1468_v18, 0.0  ;;  %v906_v37 = vadd.f32 %v905_v45, %v875_v17  ;;  %v4008_v18 = vld [vmem:[%s5667_s3 + $0x44] sm:$0xf] }
 0x163   : > { %1751 = vmatpush.bf16.msrb.mxu0 %v3536_v27  ;;  %v558_v21 = vmax.f32 %v516_v53, 0.0  ;;  %v876_v22 = vmax.f32 %v834_v26, 0.0 }
 0x164   : > { %v1224_v5 = vadd.f32 %v1223_v46, %v1193_v32 }
 0x165   : > { %v589_v19 = vadd.f32 %v588_v62, %v558_v21  ;;  %v907_v24 = vadd.f32 %v906_v37, %v876_v22  ;;  %v3495_v37 = vld [vmem:[%s5667_s3 + $0x8] sm:$0xf] }
 0x167   : > { %v4634_v56 = vpop.f32.mrf.mxu2  ;;  %v4636_v57 = vpop.f32.mrf.mxu3 }
 0x168   : > { %v4638_v58 = vpop.f32.mrf.mxu0  ;;  %v4640_v59 = vpop.f32.mrf.mxu1  ;;  %v1152_v54 = vadd.f32 %v4634_v56, %v4464_v42  ;;  %v1470_v39 = vadd.f32 %v4636_v57, %v4464_v42  ;;  %v1541_v56 = vadd.f32 %v1540_v23, %v1510_v6  ;;  %v3523_v57 = vld [vmem:[%s5667_s3 + $0x60] sm:$0xf]  ;;  %v3513_v23 = vld [vmem:[%s5667_s3 + $0x50] sm:$0xf0] }
 0x169   : > { %v519_v40 = vadd.f32 %v4638_v58, %v4464_v42  ;;  %v837_v41 = vadd.f32 %v4640_v59, %v4464_v42  ;;  %v4012_v58 = vld [vmem:[%s5667_s3 + $0x6c] sm:$0xf0]  ;;  %v4011_v59 = vld [vmem:[%s5667_s3 + $0x64] sm:$0xf]  ;;  %v3516_v53 = vor.u32 %v4008_v18, %v3513_v23 }
 0x16a   : > { %v3524_v49 = vor.u32 %v4012_v58, %v3523_v57  ;;  %v1194_v2 = vmax.f32 %v1152_v54, 0.0  ;;  %v3528_v7 = vor.u32 %v4011_v59, %v3525_v50  ;;  %v1542_v38 = vadd.f32 %v1541_v56, %v1511_v55  ;;  %v4005_v56 = vld [vmem:[%s5667_s3 + $0x24] sm:$0xf]  ;;  %v3501_v57 = vld [vmem:[%s5667_s3 + $0x30] sm:$0xf0] }
 0x16b   : > { %v559_v13 = vmax.f32 %v519_v40, 0.0  ;;  %v877_v14 = vmax.f32 %v837_v41, 0.0  ;;  %v4006_v40 = vld [vmem:[%s5667_s3 + $0x2c] sm:$0xf0]  ;;  %v3504_v21 = vor.u32 %v4005_v56, %v3501_v57 }
 0x16c   : > { %1752 = vmatpush.bf16.msrb.mxu0 %v3524_v49  ;;  %1765 = vmatpush.bf16.msrb.mxu1 %v3528_v7  ;;  %v1225_v26 = vadd.f32 %v1224_v5, %v1194_v2  ;;  %v3487_v7 = vld [vmem:[%s5667_s3] sm:$0xf] }
 0x16d   : > { %v590_v54 = vadd.f32 %v589_v19, %v559_v13  ;;  %v908_v33 = vadd.f32 %v907_v24, %v877_v14  ;;  %v3488_v15 = vor.u32 %v4003_v8, %v3487_v7 }
 0x16f   : > { %v4656_v9 = vpop.f32.mrf.mxu2  ;;  %v4658_v10 = vpop.f32.mrf.mxu3 }
 0x170   : > { %v4660_v11 = vpop.f32.mrf.mxu0  ;;  %v4662_v12 = vpop.f32.mrf.mxu1  ;;  %v1155_v1 = vadd.f32 %v4656_v9, %v4464_v42  ;;  %v1473_v4 = vadd.f32 %v4658_v10, %v4464_v42  ;;  %v1512_v9 = vmax.f32 %v1470_v39, 0.0  ;;  %v3511_v10 = vld [vmem:[%s5667_s3 + $0x40] sm:$0xf]  ;;  %1766 = vmatpush.bf16.msrb.mxu1 %v3516_v53 }
 0x171   : > { %v521_v6 = vadd.f32 %v4660_v11, %v4464_v42  ;;  %v839_v20 = vadd.f32 %v4662_v12, %v4464_v42  ;;  %v3512_v11 = vor.u32 %v4009_v16, %v3511_v10  ;;  %v4010_v12 = vld [vmem:[%s5667_s3 + $0x54] sm:$0xf0] }
 0x172   : > { %v1195_v17 = vmax.f32 %v1155_v1, 0.0  ;;  %v1513_v25 = vmax.f32 %v1473_v4, 0.0  ;;  %v3520_v31 = vor.u32 %v4010_v12, %v3519_v52  ;;  %v1543_v32 = vadd.f32 %v1542_v38, %v1512_v9  ;;  %v3507_v1 = vld [vmem:[%s5667_s3 + $0x28] sm:$0xf]  ;;  %v4002_v9 = vld [vmem:[%s5667_s3 + $0x4] sm:$0xf] }
 0x173   : > { %1753 = vmatpush.bf16.msrb.mxu0 %v3512_v11  ;;  %v560_v36 = vmax.f32 %v521_v6, 0.0  ;;  %v878_v41 = vmax.f32 %v839_v20, 0.0  ;;  %v4004_v16 = vld [vmem:[%s5667_s3 + $0x14] sm:$0xf0] }
 0x174   : > { %1779 = vmatpush.bf16.msrb.mxu2 %v3520_v31  ;;  %v1544_v58 = vadd.f32 %v1543_v32, %v1513_v25  ;;  %1767 = vmatpush.bf16.msrb.mxu1 %v3504_v21  ;;  %v3496_v23 = vor.u32 %v4004_v16, %v3495_v37 }
 0x175   : > { %v591_v22 = vadd.f32 %v590_v54, %v560_v36  ;;  %v909_v13 = vadd.f32 %v908_v33, %v878_v41 }
 0x177   : > { %v4717_v63 = vpop.f32.mrf.mxu2  ;;  %v4719_v0 = vpop.f32.mrf.mxu3 }
 0x178   : > { %v4722_v48 = vpop.f32.mrf.mxu0  ;;  %v4724_v3 = vpop.f32.mrf.mxu1  ;;  %v1157_v2 = vadd.f32 %v4717_v63, %v4464_v42  ;;  %v1475_v4 = vadd.f32 %v4719_v0, %v4464_v42  ;;  %v3489_v0 = vld [vmem:[%s5667_s3 + $0x10] sm:$0xf0] }
 0x179   : > { %v524_v29 = vadd.f32 %v4722_v48, %v4464_v42  ;;  %v842_v27 = vadd.f32 %v4724_v3, %v4464_v42  ;;  %v3499_v48 = vld [vmem:[%s5667_s3 + $0x20] sm:$0xf]  ;;  %v4840_v3 = vadd.f32 %v1225_v26, %v1195_v17  ;;  %v3492_v10 = vor.u32 %v4002_v9, %v3489_v0 }
 0x17a   : > { %v3500_v62 = vor.u32 %v4006_v40, %v3499_v48  ;;  %v1196_v52 = vmax.f32 %v1157_v2, 0.0  ;;  %v1514_v24 = vmax.f32 %v1475_v4, 0.0 }
 0x17b   : > { %v561_v59 = vmax.f32 %v524_v29, 0.0  ;;  %1768 = vmatpush.bf16.msrb.mxu1 %v3492_v10 }
 0x17c   : > { %1754 = vmatpush.bf16.msrb.mxu0 %v3500_v62  ;;  %v1545_v48 = vadd.f32 %v1544_v58, %v1514_v24 }
 0x17d   : > { %v592_v5 = vadd.f32 %v591_v22, %v561_v59 }
 0x17f   : > { %v4782_v43 = vpop.f32.mrf.mxu2  ;;  %v4784_v44 = vpop.f32.mrf.mxu3 }
 0x180   : > { %v525_v47 = vpop.f32.mrf.mxu0  ;;  %v843_v60 = vpop.f32.mrf.mxu1  ;;  %v1160_v38 = vadd.f32 %v4782_v43, %v4464_v42  ;;  %v1478_v6 = vadd.f32 %v4784_v44, %v4464_v42  ;;  %1755 = vmatpush.bf16.msrb.mxu0 %v3488_v15 }
 0x181   : > { %v526_v45 = vadd.f32 %v525_v47, %v4464_v42  ;;  %v844_v46 = vadd.f32 %v843_v60, %v4464_v42  ;;  %v4007_v47 = vld [vmem:[%s5667_s3 + $0x34] sm:$0xf0]  ;;  %v879_v60 = vmax.f32 %v842_v27, 0.0 }
 0x182   : > { %v3508_v51 = vor.u32 %v4007_v47, %v3507_v1  ;;  %v1197_v31 = vmax.f32 %v1160_v38, 0.0  ;;  %v1515_v32 = vmax.f32 %v1478_v6, 0.0 }
 0x183   : > { %v562_v14 = vmax.f32 %v526_v45, 0.0  ;;  %v880_v63 = vmax.f32 %v844_v46, 0.0  ;;  %v910_v18 = vadd.f32 %v909_v13, %v879_v60 }
 0x184   : > { %1780 = vmatpush.bf16.msrb.mxu2 %v3508_v51  ;;  %v1546_v57 = vadd.f32 %v1545_v48, %v1515_v32  ;;  %v1612_v48 = vld [vmem:[%s5667_s3 + $0x108] sm:$0x1] }
 0x185   : > { %v593_v44 = vadd.f32 %v592_v5, %v562_v14  ;;  %v911_v12 = vadd.f32 %v910_v18, %v880_v63  ;;  %v1563_v14 = vld [vmem:[%s5666_s2 + $0x10] sm:$0x2]  ;;  %v1569_v63 = vpop.permute.xlu0 %1568 }
 0x186   : > { %v1571_v10 = vperm.slane %v1569_v63, 0 }
 0x187   : > { %v1161_v28 = vpop.f32.mrf.mxu2  ;;  %v1479_v30 = vpop.f32.mrf.mxu3 }
 0x188   : > { %v528_v55 = vpop.f32.mrf.mxu0  ;;  %v846_v39 = vpop.f32.mrf.mxu1  ;;  %v1162_v25 = vadd.f32 %v1161_v28, %v4464_v42  ;;  %v1480_v43 = vadd.f32 %v1479_v30, %v4464_v42  ;;  %1781 = vmatpush.bf16.msrb.mxu2 %v3496_v23 }
 0x189   : > { %v529_v49 = vadd.f32 %v528_v55, %v4464_v42  ;;  %v847_v50 = vadd.f32 %v846_v39, %v4464_v42  ;;  %v1227_v39 = vadd.f32 %v4840_v3, %v1196_v52 }
 0x18a   : > { %v1198_v40 = vmax.f32 %v1162_v25, 0.0  ;;  %v1516_v41 = vmax.f32 %v1480_v43, 0.0  ;;  %v1572_v25 = vmul.f32 %v1571_v10, %v269_v35  ;;  %v1614_v35 = vunpack.c.h.bf16 %v1611_v34  ;;  %v4029_v10 = vld [vmem:[%s5667_s3 + $0x78] sm:$0xf0] }
 0x18b   : > { %v563_v19 = vmax.f32 %v529_v49, 0.0  ;;  %v881_v17 = vmax.f32 %v847_v50, 0.0  ;;  %v1228_v56 = vadd.f32 %v1227_v39, %v1197_v31 }
 0x18c   : > { %v1547_v50 = vadd.f32 %v1546_v57, %v1516_v41  ;;  %v1618_v39 = vperm.slane %v1614_v35, 0 }
 0x18d   : > { %v594_v28 = vadd.f32 %v593_v44, %v563_v19  ;;  %v912_v36 = vadd.f32 %v911_v12, %v881_v17  ;;  %v1229_v49 = vadd.f32 %v1228_v56, %v1198_v40 }
 0x18f   : > { %v1164_v20 = vpop.f32.mrf.mxu2  ;;  %v1482_v11 = vpop.f32.mrf.mxu3 }
 0x190   : > { %v530_v29 = vpop.f32.mrf.mxu0  ;;  %v848_v53 = vpop.f32.mrf.mxu1  ;;  %v1165_v54 = vadd.f32 %v1164_v20, %v4464_v42  ;;  %v1483_v33 = vadd.f32 %v1482_v11, %v4464_v42 }
 0x191   : > { %v531_v26 = vadd.f32 %v530_v29, %v4464_v42  ;;  %v849_v27 = vadd.f32 %v848_v53, %v4464_v42 }
 0x192   : > { %v1199_v59 = vmax.f32 %v1165_v54, 0.0  ;;  %v1517_v62 = vmax.f32 %v1483_v33, 0.0 }
 0x193   : > { %v564_v30 = vmax.f32 %v531_v26, 0.0  ;;  %v882_v55 = vmax.f32 %v849_v27, 0.0 }
 0x194   : > { %v1230_v2 = vadd.f32 %v1229_v49, %v1199_v59  ;;  %v1548_v4 = vadd.f32 %v1547_v50, %v1517_v62 }
 0x195   : > { %v595_v45 = vadd.f32 %v594_v28, %v564_v30  ;;  %v913_v46 = vadd.f32 %v912_v36, %v882_v55  ;;  %v1613_v55 = vunpack.c.l.bf16 %v1611_v34  ;;  %v3713_v34 = vld [vmem:[%s5668_s4 + $0xc0] sm:$0xf] }
 0x197   : > { %v596_v21 = vrot.slane %v595_v45, 4  ;;  %v914_v1 = vrot.slane %v913_v46, 4  ;;  %v1166_v47 = vpop.f32.mrf.mxu2  ;;  %v1484_v60 = vpop.f32.mrf.mxu3  ;;  %v1617_v40 = vperm.slane %v1613_v55, 0  ;;  %v4060_v55 = vld [vmem:[%s5668_s4 + $0xcc] sm:$0xf0] }
 0x198   : > { %v1167_v51 = vadd.f32 %v1166_v47, %v4464_v42  ;;  %v1485_v22 = vadd.f32 %v1484_v60, %v4464_v42  ;;  %v1564_v42 = vunpack.c.l.bf16 %v1563_v14  ;;  %v4032_v14 = vld [vmem:[%s5667_s3 + $0xd8] sm:$0xf0] }
 0x199   : > { %v597_v3 = vadd.f32 %v596_v21, %v595_v45  ;;  %v915_v58 = vadd.f32 %v914_v1, %v913_v46  ;;  %v1615_v46 = vunpack.c.l.bf16 %v1612_v48  ;;  %v3715_v48 = vld [vmem:[%s5668_s4 + $0xd0] sm:$0xf0] }
 0x19a   : > { %v1200_v7 = vmax.f32 %v1167_v51, 0.0  ;;  %v1518_v8 = vmax.f32 %v1485_v22, 0.0  ;;  %v1574_v24 = vrot.slane %v1564_v42, 1  ;;  %v3597_v42 = vld [vmem:[%s5667_s3 + $0x6c] sm:$0xf] }
 0x19b   : > { %v598_v9 = vrot.slane %v597_v3, 2  ;;  %v916_v13 = vrot.slane %v915_v58, 2  ;;  %v1619_v59 = vperm.slane %v1615_v46, 0  ;;  %v4061_v46 = vld [vmem:[%s5668_s4 + $0xd4] sm:$0xf0] }
 0x19c   : > { %v1231_v15 = vadd.f32 %v1230_v2, %v1200_v7  ;;  %v1549_v0 = vadd.f32 %v1548_v4, %v1518_v8  ;;  %v1576_v26 = vadd.f32 %v1574_v24, %v1572_v25  ;;  %v3613_v7 = vld [vmem:[%s5667_s3 + $0xec] sm:$0xf]  ;;  %v4033_v8 = vld [vmem:[%s5667_s3 + $0xf8] sm:$0xf0] }
 0x19d   : > { %v599_v37 = vadd.f32 %v598_v9, %v597_v3  ;;  %v917_v5 = vadd.f32 %v916_v13, %v915_v58  ;;  %v3609_v9 = vld [vmem:[%s5667_s3 + $0xcc] sm:$0xf]  ;;  %v3614_v13 = vor.u32 %v4033_v8, %v3613_v7  ;;  %v4052_v7 = vld [vmem:[%s5668_s4 + $0x8c] sm:$0xf0]  ;;  %v4050_v8 = vld [vmem:[%s5668_s4 + $0x84] sm:$0xf] }
 0x19e   : > { %v1232_v38 = vrot.slane %v1231_v15, 4  ;;  %v1550_v6 = vrot.slane %v1549_v0, 4  ;;  %v1577_v54 = vperm.slane %v1576_v26, 1  ;;  %v3610_v63 = vor.u32 %v4032_v14, %v3609_v9  ;;  %v4062_v26 = vld [vmem:[%s5668_s4 + $0xe4] sm:$0xf] }
 0x19f   : > { %v600_v16 = vrot.slane %v599_v37, 1  ;;  %v918_v18 = vrot.slane %v917_v5, 1  ;;  %1916 = vmatpush.bf16.msra.mxu0 %v3614_v13  ;;  %v3683_v13 = vld [vmem:[%s5668_s4 + $0x90] sm:$0xf0]  ;;  %v3689_v14 = vld [vmem:[%s5668_s4 + $0x88] sm:$0xf] }
 0x1a0   : > { %v1233_v19 = vadd.f32 %v1232_v38, %v1231_v15  ;;  %v1551_v17 = vadd.f32 %v1550_v6, %v1549_v0  ;;  %v3605_v15 = vld [vmem:[%s5667_s3 + $0xac] sm:$0xf]  ;;  %v4031_v0 = vld [vmem:[%s5667_s3 + $0xb8] sm:$0xf0] }
 0x1a1   : > { %v601_v20 = vadd.f32 %v600_v16, %v599_v37  ;;  %v919_v11 = vadd.f32 %v918_v18, %v917_v5  ;;  %v3606_v37 = vor.u32 %v4031_v0, %v3605_v15  ;;  %v3601_v5 = vld [vmem:[%s5667_s3 + $0x8c] sm:$0xf]  ;;  %v4030_v38 = vld [vmem:[%s5667_s3 + $0x98] sm:$0xf0]  ;;  %v3598_v16 = vor.u32 %v4029_v10, %v3597_v42  ;;  %v4048_v42 = vld [vmem:[%s5668_s4 + $0x6c] sm:$0xf0] }
 0x1a2   : > { %v1234_v23 = vrot.slane %v1233_v19, 2  ;;  %v1552_v52 = vrot.slane %v1551_v17, 2  ;;  %v3602_v6 = vor.u32 %v4030_v38, %v3601_v5  ;;  %v3593_v18 = vld [vmem:[%s5667_s3 + $0x4c] sm:$0xf]  ;;  %v3691_v0 = vld [vmem:[%s5668_s4 + $0x98] sm:$0xf0]  ;;  %v3686_v5 = vor.u32 %v4050_v8, %v3683_v13 }
 0x1a3   : > { %v1557_v43 = vsel %vm1556_vm1, %v601_v20, %v919_v11  ;;  %1917 = vmatpush.bf16.msra.mxu0 %v3610_v63  ;;  %v3589_v20 = vld [vmem:[%s5667_s3 + $0x2c] sm:$0xf]  ;;  %v4027_v11 = vld [vmem:[%s5667_s3 + $0x38] sm:$0xf0]  ;;  %v4053_v63 = vld [vmem:[%s5668_s4 + $0x94] sm:$0xf0] }
 0x1a4   : > { %v1235_v29 = vadd.f32 %v1234_v23, %v1233_v19  ;;  %v1553_v53 = vadd.f32 %v1552_v52, %v1551_v17  ;;  %v4028_v19 = vld [vmem:[%s5667_s3 + $0x58] sm:$0xf0]  ;;  %v3590_v52 = vor.u32 %v4027_v11, %v3589_v20  ;;  %v4051_v15 = vld [vmem:[%s5668_s4 + $0x8c] sm:$0xf]  ;;  %v3690_v38 = vor.u32 %v4053_v63, %v3689_v14  ;;  %v4046_v10 = vld [vmem:[%s5668_s4 + $0x64] sm:$0xf] }
 0x1a5   : > { %v3594_v17 = vor.u32 %v4028_v19, %v3593_v18  ;;  %v3667_v18 = vld [vmem:[%s5668_s4 + $0x70] sm:$0xf0]  ;;  %v3673_v19 = vld [vmem:[%s5668_s4 + $0x68] sm:$0xf]  ;;  %v4047_v20 = vld [vmem:[%s5668_s4 + $0x6c] sm:$0xf] }
 0x1a6   : > { %v1236_v44 = vrot.slane %v1235_v29, 1  ;;  %v1554_v12 = vrot.slane %v1553_v53, 1  ;;  %v3675_v11 = vld [vmem:[%s5668_s4 + $0x78] sm:$0xf0]  ;;  %v4095_v8 = vld [vmem:[%s5668_s4 + $0x1ec] sm:$0xf] }
 0x1a7   : > { %1918 = vmatpush.bf16.msra.mxu0 %v3606_v37 }
 0x1a8   : > { %v1237_v27 = vadd.f32 %v1236_v44, %v1235_v29  ;;  %v1555_v31 = vadd.f32 %v1554_v12, %v1553_v53  ;;  %v4026_v29 = vld [vmem:[%s5667_s3 + $0x18] sm:$0xf0]  ;;  %v3729_v44 = vld [vmem:[%s5668_s4 + $0xe0] sm:$0xf]  ;;  %v4064_v12 = vld [vmem:[%s5668_s4 + $0xec] sm:$0xf0] }
 0x1aa   : > { %v1559_v32 = vsel %vm1558_vm2, %v1557_v43, %v1237_v27  ;;  %v3585_v43 = vld [vmem:[%s5667_s3 + $0xc] sm:$0xf]  ;;  %v3730_v27 = vor.u32 %v4064_v12, %v3729_v44  ;;  %v3651_v44 = vld [vmem:[%s5668_s4 + $0x50] sm:$0xf0]  ;;  %v3657_v12 = vld [vmem:[%s5668_s4 + $0x48] sm:$0xf] }
 0x1ab   : > { %v1561_v33 = vsel %vm1560_vm3, %v1559_v32, %v1555_v31  ;;  %1919 = vmatpush.bf16.msra.mxu0 %v3602_v6  ;;  %v3586_v53 = vor.u32 %v4026_v29, %v3585_v43  ;;  %v3731_v31 = vld [vmem:[%s5668_s4 + $0xf0] sm:$0xf0]  ;;  %v3737_v32 = vld [vmem:[%s5668_s4 + $0xe8] sm:$0xf]  ;;  %v3665_v6 = vld [vmem:[%s5668_s4 + $0x60] sm:$0xf] }
 0x1ac   : > { %v1562_v28 = vmul.f32 0.00390625, %v1561_v33  ;;  %v3734_v33 = vor.u32 %v4062_v26, %v3731_v31  ;;  %2164 = vmatpush.bf16.msra.mxu1 %v3730_v27  ;;  %v4044_v43 = vld [vmem:[%s5668_s4 + $0x4c] sm:$0xf0]  ;;  %v4042_v29 = vld [vmem:[%s5668_s4 + $0x44] sm:$0xf] }
 0x1ad   : > { %v4045_v26 = vld [vmem:[%s5668_s4 + $0x54] sm:$0xf0]  ;;  %v4043_v27 = vld [vmem:[%s5668_s4 + $0x4c] sm:$0xf]  ;;  %v3659_v31 = vld [vmem:[%s5668_s4 + $0x58] sm:$0xf0] }
 0x1ae   : > { %v1578_v36 = vadd.f32 %v1577_v54, %v1562_v28  ;;  %v4065_v54 = vld [vmem:[%s5668_s4 + $0xf4] sm:$0xf0]  ;;  %2177 = vmatpush.bf16.msra.mxu2 %v3734_v33  ;;  %v3658_v33 = vor.u32 %v4045_v26, %v3657_v12  ;;  %v4087_v26 = vld [vmem:[%s5668_s4 + $0x1ac] sm:$0xf] }
 0x1af   : > { %1920 = vmatpush.bf16.msra.mxu0 %v3598_v16  ;;  %v3738_v28 = vor.u32 %v4065_v54, %v3737_v32  ;;  %v3694_v16 = vor.u32 %v4051_v15, %v3691_v0  ;;  %v3654_v54 = vor.u32 %v4042_v29, %v3651_v44  ;;  %v4086_v29 = vld [vmem:[%s5668_s4 + $0x1a4] sm:$0xf]  ;;  %v3833_v44 = vld [vmem:[%s5668_s4 + $0x1a8] sm:$0xf]  ;;  %v4089_v12 = vld [vmem:[%s5668_s4 + $0x1b4] sm:$0xf0] }
 0x1b0   : > { %v1616_v30 = vpack.c.bf16 %v1578_v36, %v1578_v36  ;;  %v4063_v36 = vld [vmem:[%s5668_s4 + $0xec] sm:$0xf] }
 0x1b2   : > { %1756 = vmatmul.bf16.vlgmr.msrb.gmra.mxu0 %v1616_v30  ;;  %1769 = vmatmul.bf16.vlgmr.msrb.gmra.mxu1 %v1616_v30 }
 0x1b3   : > { %1782 = vmatmul.bf16.vlgmr.msrb.gmra.mxu2 %v1616_v30  ;;  %1921 = vmatpush.bf16.msra.mxu0 %v3594_v17  ;;  %v3739_v30 = vld [vmem:[%s5668_s4 + $0xf8] sm:$0xf0]  ;;  %v4049_v17 = vld [vmem:[%s5668_s4 + $0x74] sm:$0xf0] }
 0x1b4   : > { %v3742_v35 = vor.u32 %v4063_v36, %v3739_v30  ;;  %v4040_v36 = vld [vmem:[%s5668_s4 + $0x2c] sm:$0xf0]  ;;  %v4038_v30 = vld [vmem:[%s5668_s4 + $0x24] sm:$0xf] }
 0x1b7   : > { %1922 = vmatpush.bf16.msra.mxu0 %v3590_v52  ;;  %v3670_v52 = vor.u32 %v4046_v10, %v3667_v18  ;;  %v4090_v10 = vld [vmem:[%s5668_s4 + $0x1c4] sm:$0xf]  ;;  %v3849_v18 = vld [vmem:[%s5668_s4 + $0x1c8] sm:$0xf] }
 0x1bb   : > { %1923 = vmatpush.bf16.msra.mxu0 %v3586_v53  ;;  %v3678_v53 = vor.u32 %v4047_v20, %v3675_v11  ;;  %v3851_v20 = vld [vmem:[%s5668_s4 + $0x1d8] sm:$0xf0] }
 0x1bf   : > { %2203 = vmatpush.bf16.msrb.mxu0 %v3742_v35  ;;  %v3635_v35 = vld [vmem:[%s5668_s4 + $0x30] sm:$0xf0] }
 0x22f   : > { %v1757_v41 = vpop.f32.mrf.mxu0  ;;  %v1770_v45 = vpop.f32.mrf.mxu1 }
 0x230   : > { %v1771_v56 = vadd.f32 %v1770_v45, %v1618_v39  ;;  %v1758_v57 = vadd.f32 %v1757_v41, %v1617_v40  ;;  %v4058_v39 = vld [vmem:[%s5668_s4 + $0xc4] sm:$0xf]  ;;  %v3714_v40 = vor.u32 %v4060_v55, %v3713_v34  ;;  %v3721_v45 = vld [vmem:[%s5668_s4 + $0xc8] sm:$0xf]  ;;  %v3662_v34 = vor.u32 %v4043_v27, %v3659_v31  ;;  %v3835_v27 = vld [vmem:[%s5668_s4 + $0x1b8] sm:$0xf0] }
 0x231   : > { %v3718_v41 = vor.u32 %v4058_v39, %v3715_v48  ;;  %v3641_v55 = vld [vmem:[%s5668_s4 + $0x28] sm:$0xf]  ;;  %v4041_v39 = vld [vmem:[%s5668_s4 + $0x34] sm:$0xf0]  ;;  %v4039_v48 = vld [vmem:[%s5668_s4 + $0x2c] sm:$0xf] }
 0x232   : > { %1802 = vmatpush.xpose.msrb.mxu3 %v1771_v56  ;;  %v4059_v56 = vld [vmem:[%s5668_s4 + $0xcc] sm:$0xf]  ;;  %2165 = vmatpush.bf16.msra.mxu1 %v3714_v40  ;;  %v3643_v40 = vld [vmem:[%s5668_s4 + $0x38] sm:$0xf0] }
 0x233   : > { %2178 = vmatpush.bf16.msra.mxu2 %v3718_v41 }
 0x235   : > { %1803 = vmatmul.f32.vlgmr.msrb.gmra.mxu3 %v1758_v57  ;;  %v3722_v57 = vor.u32 %v4061_v46, %v3721_v45  ;;  %v3617_v45 = vld [vmem:[%s5668_s4] sm:$0xf]  ;;  %v3638_v46 = vor.u32 %v4038_v30, %v3635_v35  ;;  %v4082_v30 = vld [vmem:[%s5668_s4 + $0x184] sm:$0xf]  ;;  %v3811_v35 = vld [vmem:[%s5668_s4 + $0x190] sm:$0xf0] }
 0x236   : > { %v1783_v62 = vpop.f32.mrf.mxu2 }
 0x237   : > { %v1784_v21 = vadd.f32 %v1783_v62, %v1619_v59  ;;  %v1759_v1 = vpop.f32.mrf.mxu0  ;;  %v1772_v47 = vpop.f32.mrf.mxu1  ;;  %v3723_v59 = vld [vmem:[%s5668_s4 + $0xd8] sm:$0xf0]  ;;  %v3697_v62 = vld [vmem:[%s5668_s4 + $0xa0] sm:$0xf] }
 0x238   : > { %v3726_v1 = vor.u32 %v4059_v56, %v3723_v59  ;;  %v4054_v47 = vld [vmem:[%s5668_s4 + $0xa4] sm:$0xf]  ;;  %v3642_v56 = vor.u32 %v4041_v39, %v3641_v55  ;;  %v3817_v55 = vld [vmem:[%s5668_s4 + $0x188] sm:$0xf]  ;;  %v4085_v39 = vld [vmem:[%s5668_s4 + $0x194] sm:$0xf0] }
 0x239   : > { %3581 = vmatpush.msk.msra.mxu3 %vm1824_vm4, %v1784_v21  ;;  %v4056_v21 = vld [vmem:[%s5668_s4 + $0xac] sm:$0xf0]  ;;  %v4034_v59 = vld [vmem:[%s5668_s4 + $0x4] sm:$0xf] }
 0x23a   : > { %2204 = vmatpush.bf16.msrb.mxu0 %v3726_v1  ;;  %v3625_v1 = vld [vmem:[%s5668_s4 + $0x8] sm:$0xf] }
 0x23b   : > { %2190 = vmatpush.bf16.msrb.mxu3 %v3738_v28  ;;  %v3633_v28 = vld [vmem:[%s5668_s4 + $0x20] sm:$0xf] }
 0x23c   : > { %v3634_v41 = vor.u32 %v4040_v36, %v3633_v28  ;;  %v3809_v28 = vld [vmem:[%s5668_s4 + $0x180] sm:$0xf]  ;;  %v4084_v36 = vld [vmem:[%s5668_s4 + $0x18c] sm:$0xf0] }
 0x23e   : > { %v1785_v60 = vpop.f32.mrf.mxu2 }
 0x23f   : > { %v3699_v60 = vld [vmem:[%s5668_s4 + $0xb0] sm:$0xf0]  ;;  %2191 = vmatpush.bf16.msrb.mxu3 %v3722_v57  ;;  %v4036_v57 = vld [vmem:[%s5668_s4 + $0xc] sm:$0xf0] }
 0x2b8   : > { %v1804_v49 = vpop.f32.mrf.mxu3 }
 0x2b9   : > { %v1807_v50 = vmul.f32 0.088388346, %v1804_v49  ;;  %v3705_v49 = vld [vmem:[%s5668_s4 + $0xa8] sm:$0xf] }
 0x2bb   : > { %v1809_v51 = vsel %vm1808_vm5, %v1807_v50, -inf }
 0x2bc   : > { %1810 = vmax.xlane.f32.xlu0 %v1809_v51  ;;  %v4057_v51 = vld [vmem:[%s5668_s4 + $0xb4] sm:$0xf0] }
 0x32f   : > { %v1811_v22 = vpop.xlane.xlu0 %1810 }
 0x330   : > { %v1812_v3 = vsub.f32 %v1807_v50, %v1811_v22  ;;  %v3698_v50 = vor.u32 %v4056_v21, %v3697_v62  ;;  %v4055_v22 = vld [vmem:[%s5668_s4 + $0xac] sm:$0xf]  ;;  %v3619_v62 = vld [vmem:[%s5668_s4 + $0x10] sm:$0xf0]  ;;  %v3646_v21 = vor.u32 %v4039_v48, %v3643_v40  ;;  %v5273_v48 = vor.u32 %v4082_v30, %v3811_v35  ;;  %v4069_v35 = vld [vmem:[%s5668_s4 + $0x114] sm:$0xf0] }
 0x331   : > { %v5275_v40 = vor.u32 %v4085_v39, %v3817_v55  ;;  %v4067_v55 = vld [vmem:[%s5668_s4 + $0x10c] sm:$0xf]  ;;  %v3755_v39 = vld [vmem:[%s5668_s4 + $0x118] sm:$0xf0] }
 0x332   : > { %v1813_v58 = vmul.f32 1.442695, %v1812_v3  ;;  %v3707_v3 = vld [vmem:[%s5668_s4 + $0xb8] sm:$0xf0]  ;;  %2166 = vmatpush.bf16.msra.mxu1 %v3698_v50  ;;  %v3857_v50 = vld [vmem:[%s5668_s4 + $0x1e0] sm:$0xf] }
 0x333   : > { %v3710_v9 = vor.u32 %v4055_v22, %v3707_v3  ;;  %v3618_v22 = vor.u32 %v4036_v57, %v3617_v45  ;;  %v4094_v3 = vld [vmem:[%s5668_s4 + $0x1e4] sm:$0xf]  ;;  %v3819_v45 = vld [vmem:[%s5668_s4 + $0x198] sm:$0xf0]  ;;  %v4080_v57 = vld [vmem:[%s5668_s4 + $0x16c] sm:$0xf0] }
 0x334   : > { %4152 = vpow2.f32 %v1813_v58  ;;  %v3702_v58 = vor.u32 %v4054_v47, %v3699_v60  ;;  %v4037_v47 = vld [vmem:[%s5668_s4 + $0x14] sm:$0xf0]  ;;  %v4035_v60 = vld [vmem:[%s5668_s4 + $0xc] sm:$0xf] }
 0x335   : > { %2205 = vmatpush.bf16.msrb.mxu0 %v3710_v9  ;;  %v3867_v9 = vld [vmem:[%s5668_s4 + $0x1f8] sm:$0xf0]  ;;  %v3626_v14 = vor.u32 %v4037_v47, %v3625_v1  ;;  %v3801_v1 = vld [vmem:[%s5668_s4 + $0x168] sm:$0xf]  ;;  %v4081_v47 = vld [vmem:[%s5668_s4 + $0x174] sm:$0xf0] }
 0x336   : > { %2179 = vmatpush.bf16.msra.mxu2 %v3702_v58  ;;  %v3859_v58 = vld [vmem:[%s5668_s4 + $0x1f0] sm:$0xf0] }
 0x339   : > { %2206 = vmatpush.bf16.msrb.mxu0 %v3694_v16  ;;  %v3843_v16 = vld [vmem:[%s5668_s4 + $0x1d0] sm:$0xf0] }
 0x33a   : > { %v4153_v2 = vpop.eup %4152  ;;  %2180 = vmatpush.bf16.msra.mxu2 %v3686_v5  ;;  %v3841_v5 = vld [vmem:[%s5668_s4 + $0x1c0] sm:$0xf] }
 0x33b   : > { %v1815_v4 = vsel %vm1808_vm5, %v4153_v2, 0.0 }
 0x33c   : > { %1816 = vadd.xlane.f32.xlu1 %v1815_v4  ;;  %v3681_v4 = vld [vmem:[%s5668_s4 + $0x80] sm:$0xf] }
 0x33d   : > { %v3682_v37 = vor.u32 %v4052_v7, %v3681_v4  ;;  %2207 = vmatpush.bf16.msrb.mxu0 %v3678_v53  ;;  %v3622_v4 = vor.u32 %v4034_v59, %v3619_v62  ;;  %v4097_v7 = vld [vmem:[%s5668_s4 + $0x1f4] sm:$0xf0]  ;;  %v3827_v53 = vld [vmem:[%s5668_s4 + $0x1b0] sm:$0xf0]  ;;  %v4078_v59 = vld [vmem:[%s5668_s4 + $0x164] sm:$0xf] }
 0x33e   : > { %2181 = vmatpush.bf16.msra.mxu2 %v3670_v52  ;;  %v3825_v52 = vld [vmem:[%s5668_s4 + $0x1a0] sm:$0xf] }
 0x33f   : > { %2167 = vmatpush.bf16.msra.mxu1 %v3682_v37  ;;  %v5171_v37 = vor.u32 %v4094_v3, %v3859_v58  ;;  %v3777_v3 = vld [vmem:[%s5668_s4 + $0x140] sm:$0xf]  ;;  %v4076_v58 = vld [vmem:[%s5668_s4 + $0x14c] sm:$0xf0] }
 0x341   : > { %2208 = vmatpush.bf16.msrb.mxu0 %v3662_v34  ;;  %v5262_v34 = vor.u32 %v4084_v36, %v3809_v28  ;;  %v3747_v28 = vld [vmem:[%s5668_s4 + $0x110] sm:$0xf0]  ;;  %v3753_v36 = vld [vmem:[%s5668_s4 + $0x108] sm:$0xf] }
 0x342   : > { %2182 = vmatpush.bf16.msra.mxu2 %v3654_v54  ;;  %v5245_v54 = vor.u32 %v4089_v12, %v3833_v44  ;;  %v3745_v44 = vld [vmem:[%s5668_s4 + $0x100] sm:$0xf]  ;;  %v4068_v12 = vld [vmem:[%s5668_s4 + $0x10c] sm:$0xf0] }
 0x343   : > { %v5409_v30 = vor.u32 %v4068_v12, %v3745_v44 }
 0x345   : > { %2209 = vmatpush.bf16.msrb.mxu0 %v3646_v21  ;;  %v3795_v21 = vld [vmem:[%s5668_s4 + $0x170] sm:$0xf0] }
 0x346   : > { %2183 = vmatpush.bf16.msra.mxu2 %v3638_v46 }
 0x34a   : > { %2184 = vmatpush.bf16.msra.mxu2 %v3622_v4  ;;  %v5334_v4 = vor.u32 %v4076_v58, %v3777_v3  ;;  %v1993_v58 = vld [vmem:[%s5668_s4 + $0x200] sm:$0x11] }
 0x34e   : > { %2389 = vmatpush.bf16.msrb.mxu2 %v5171_v37 }
 0x3af   : > { %v1817_v23 = vpop.xlane.xlu1 %1816 }
 0x3b0   : > { %4154 = vrcp.f32 %v1817_v23  ;;  %v3666_v23 = vor.u32 %v4048_v42, %v3665_v6  ;;  %v5181_v42 = vor.u32 %v4095_v8, %v3867_v9  ;;  %v3785_v8 = vld [vmem:[%s5668_s4 + $0x148] sm:$0xf]  ;;  %v4077_v9 = vld [vmem:[%s5668_s4 + $0x154] sm:$0xf0] }
 0x3b2   : > { %2168 = vmatpush.bf16.msra.mxu1 %v3666_v23  ;;  %v5205_v23 = vor.u32 %v4090_v10, %v3843_v16  ;;  %v4072_v10 = vld [vmem:[%s5668_s4 + $0x12c] sm:$0xf0]  ;;  %v4070_v16 = vld [vmem:[%s5668_s4 + $0x124] sm:$0xf] }
 0x3b4   : > { %2390 = vmatpush.bf16.msrb.mxu2 %v5205_v23 }
 0x3b6   : > { %v4155_v24 = vpop.eup %4154 }
 0x3b7   : > { %v1819_v25 = vmul.f32 %v4155_v24, %v4153_v2  ;;  %v3706_v2 = vor.u32 %v4057_v51, %v3705_v49  ;;  %v3674_v24 = vor.u32 %v4049_v17, %v3673_v19  ;;  %v3627_v49 = vld [vmem:[%s5668_s4 + $0x18] sm:$0xf0]  ;;  %v4096_v51 = vld [vmem:[%s5668_s4 + $0x1ec] sm:$0xf0]  ;;  %v4093_v19 = vld [vmem:[%s5668_s4 + $0x1d4] sm:$0xf0] }
 0x3b8   : > { %v3630_v63 = vor.u32 %v4035_v60, %v3627_v49  ;;  %v5169_v0 = vor.u32 %v4096_v51, %v3857_v50  ;;  %v4091_v17 = vld [vmem:[%s5668_s4 + $0x1cc] sm:$0xf]  ;;  %v5309_v60 = vor.u32 %v4078_v59, %v3795_v21  ;;  %v5311_v49 = vor.u32 %v4081_v47, %v3801_v1  ;;  %v3803_v51 = vld [vmem:[%s5668_s4 + $0x178] sm:$0xf0] }
 0x3b9   : > { %3582 = vmatmul.msk.f32.vlgmr.msra.gmra.mxu3 %vm1820_vm6, %v1819_v25  ;;  %v3649_v25 = vld [vmem:[%s5668_s4 + $0x40] sm:$0xf]  ;;  %v4079_v50 = vld [vmem:[%s5668_s4 + $0x16c] sm:$0xf] }
 0x3ba   : > { %2192 = vmatpush.bf16.msrb.mxu3 %v3706_v2  ;;  %v3650_v32 = vor.u32 %v4044_v43, %v3649_v25  ;;  %v3865_v2 = vld [vmem:[%s5668_s4 + $0x1e8] sm:$0xf]  ;;  %2210 = vmatpush.bf16.msrb.mxu0 %v3630_v63  ;;  %v5215_v25 = vor.u32 %v4093_v19, %v3849_v18  ;;  %v5217_v43 = vor.u32 %v4091_v17, %v3851_v20  ;;  %v4075_v63 = vld [vmem:[%s5668_s4 + $0x14c] sm:$0xf]  ;;  %v3763_v18 = vld [vmem:[%s5668_s4 + $0x130] sm:$0xf0] }
 0x3bb   : > { %v5179_v6 = vor.u32 %v4097_v7, %v3865_v2  ;;  %v4074_v2 = vld [vmem:[%s5668_s4 + $0x144] sm:$0xf]  ;;  %v3779_v7 = vld [vmem:[%s5668_s4 + $0x150] sm:$0xf0]  ;;  %v5374_v17 = vor.u32 %v4070_v16, %v3763_v18  ;;  %v3769_v20 = vld [vmem:[%s5668_s4 + $0x128] sm:$0xf] }
 0x3bc   : > { %2169 = vmatpush.bf16.msra.mxu1 %v3650_v32  ;;  %v5241_v32 = vor.u32 %v4086_v29, %v3827_v53  ;;  %v3771_v53 = vld [vmem:[%s5668_s4 + $0x138] sm:$0xf0] }
 0x3be   : > { %2193 = vmatpush.bf16.msrb.mxu3 %v3690_v38  ;;  %v4092_v38 = vld [vmem:[%s5668_s4 + $0x1cc] sm:$0xf0]  ;;  %2391 = vmatpush.bf16.msrb.mxu2 %v5241_v32 }
 0x3bf   : > { %v5203_v11 = vor.u32 %v4092_v38, %v3841_v5  ;;  %v3761_v5 = vld [vmem:[%s5668_s4 + $0x120] sm:$0xf] }
 0x3c0   : > { %2170 = vmatpush.bf16.msra.mxu1 %v3634_v41  ;;  %v4083_v41 = vld [vmem:[%s5668_s4 + $0x18c] sm:$0xf]  ;;  %v5372_v19 = vor.u32 %v4072_v10, %v3761_v5  ;;  %v1996_v10 = vunpack.c.h.bf16 %v1993_v58 }
 0x3c1   : > { %v5284_v46 = vor.u32 %v4083_v41, %v3819_v45  ;;  %v5424_v45 = vor.u32 %v4069_v35, %v3753_v36  ;;  %v1994_v5 = vld [vmem:[%s5668_s4 + $0x208] sm:$0x11] }
 0x3c2   : > { %2194 = vmatpush.bf16.msrb.mxu3 %v3674_v24  ;;  %v4088_v24 = vld [vmem:[%s5668_s4 + $0x1ac] sm:$0xf0]  ;;  %2392 = vmatpush.bf16.msrb.mxu2 %v5273_v48  ;;  %v1997_v16 = vunpack.c.l.bf16 %v1994_v5 }
 0x3c3   : > { %v5239_v31 = vor.u32 %v4088_v24, %v3825_v52  ;;  %v4073_v52 = vld [vmem:[%s5668_s4 + $0x134] sm:$0xf0]  ;;  %v4071_v24 = vld [vmem:[%s5668_s4 + $0x12c] sm:$0xf] }
 0x3c4   : > { %2171 = vmatpush.bf16.msra.mxu1 %v3618_v22  ;;  %v5320_v22 = vor.u32 %v4079_v50, %v3803_v51  ;;  %v5386_v29 = vor.u32 %v4073_v52, %v3769_v20 }
 0x3c6   : > { %2195 = vmatpush.bf16.msrb.mxu3 %v3658_v33  ;;  %v5247_v33 = vor.u32 %v4087_v26, %v3835_v27  ;;  %2393 = vmatpush.bf16.msrb.mxu2 %v5309_v60  ;;  %v5397_v26 = vor.u32 %v4071_v24, %v3771_v53  ;;  %v4066_v27 = vld [vmem:[%s5668_s4 + $0x104] sm:$0xf]  ;;  %v2001_v53 = vperm.slane %v1996_v10, 0 }
 0x3c7   : > { %v5422_v41 = vor.u32 %v4066_v27, %v3747_v28  ;;  %v2002_v27 = vperm.slane %v1997_v16, 0 }
 0x3c8   : > { %2376 = vmatpush.bf16.msrb.mxu1 %v5169_v0 }
 0x3ca   : > { %2196 = vmatpush.bf16.msrb.mxu3 %v3642_v56  ;;  %v3793_v56 = vld [vmem:[%s5668_s4 + $0x160] sm:$0xf] }
 0x3cb   : > { %v5298_v62 = vor.u32 %v4080_v57, %v3793_v56  ;;  %v5427_v56 = vor.u32 %v4067_v55, %v3755_v39  ;;  %v1864_v57 = vld [vmem:[%s5667_s3 + $0x10c] sm:$0x1] }
 0x3cc   : > { %2377 = vmatpush.bf16.msrb.mxu1 %v5203_v11  ;;  %v1865_v59 = vunpack.c.l.bf16 %v1864_v57 }
 0x3ce   : > { %2197 = vmatpush.bf16.msrb.mxu3 %v3626_v14  ;;  %v5347_v14 = vor.u32 %v4077_v9, %v3785_v8  ;;  %v1867_v21 = vperm.slane %v1865_v59, 0 }
 0x3d0   : > { %2378 = vmatpush.bf16.msrb.mxu1 %v5239_v31 }
 0x3d2   : > { %2402 = vmatpush.bf16.msra.mxu3 %v5179_v6 }
 0x3d4   : > { %2379 = vmatpush.bf16.msrb.mxu1 %v5262_v34 }
 0x3d6   : > { %2403 = vmatpush.bf16.msra.mxu3 %v5215_v25 }
 0x3d8   : > { %2380 = vmatpush.bf16.msrb.mxu1 %v5298_v62 }
 0x3da   : > { %2404 = vmatpush.bf16.msra.mxu3 %v5245_v54 }
 0x3dc   : > { %2381 = vmatpush.bf16.msrb.mxu1 %v5334_v4 }
 0x3de   : > { %2405 = vmatpush.bf16.msra.mxu3 %v5275_v40 }
 0x3e0   : > { %2382 = vmatpush.bf16.msrb.mxu1 %v5372_v19 }
 0x3e2   : > { %2406 = vmatpush.bf16.msra.mxu3 %v5311_v49 }
 0x3e4   : > { %2383 = vmatpush.bf16.msrb.mxu1 %v5409_v30 }
 0x3e6   : > { %2407 = vmatpush.bf16.msra.mxu3 %v5347_v14 }
 0x3ea   : > { %2408 = vmatpush.bf16.msra.mxu3 %v5386_v29 }
 0x3ee   : > { %2409 = vmatpush.bf16.msra.mxu3 %v5424_v45 }
 0x43c   : > { %v1845_v13 = vpop.f32.mrf.mxu3 }
 0x43d   : > { %v1866_v15 = vpack.c.bf16 %v1845_v13, %v1845_v13  ;;  %v5345_v13 = vor.u32 %v4074_v2, %v3779_v7  ;;  %v1995_v7 = vunpack.c.l.bf16 %v1993_v58 }
 0x43f   : > { %1924 = vmatmul.bf16.vlgmr.msra.gmra.mxu0 %v1866_v15  ;;  %v3787_v15 = vld [vmem:[%s5668_s4 + $0x158] sm:$0xf0]  ;;  %2394 = vmatpush.bf16.msrb.mxu2 %v5345_v13 }
 0x440   : > { %2415 = vmatpush.bf16.msra.mxu0 %v5181_v42  ;;  %v5359_v38 = vor.u32 %v4075_v63, %v3787_v15  ;;  %v2000_v15 = vperm.slane %v1995_v7, 0  ;;  %v1998_v7 = vunpack.c.h.bf16 %v1994_v5 }
 0x442   : > { %v2003_v16 = vperm.slane %v1998_v7, 0 }
 0x443   : > { %2395 = vmatpush.bf16.msrb.mxu2 %v5374_v17 }
 0x444   : > { %2416 = vmatpush.bf16.msra.mxu0 %v5217_v43 }
 0x447   : > { %2396 = vmatpush.bf16.msrb.mxu2 %v5422_v41 }
 0x448   : > { %2417 = vmatpush.bf16.msra.mxu0 %v5247_v33 }
 0x44c   : > { %2418 = vmatpush.bf16.msra.mxu0 %v5284_v46 }
 0x450   : > { %2419 = vmatpush.bf16.msra.mxu0 %v5320_v22 }
 0x454   : > { %2420 = vmatpush.bf16.msra.mxu0 %v5359_v38 }
 0x458   : > { %2421 = vmatpush.bf16.msra.mxu0 %v5397_v26 }
 0x45c   : > { %2422 = vmatpush.bf16.msra.mxu0 %v5427_v56 }
 0x4bc   : > { %v1925_v1 = vpop.f32.mrf.mxu0 }
 0x4bd   : > { %v1926_v47 = vadd.f32 %v1925_v1, %v1867_v21 }
 0x4bf   : > { %v1999_v50 = vpack.c.bf16 %v1926_v47, %v1926_v47 }
 0x4c1   : > { %2172 = vmatmul.bf16.vlgmr.msra.gmra.mxu1 %v1999_v50  ;;  %2185 = vmatmul.bf16.vlgmr.msra.gmra.mxu2 %v1999_v50 }
 0x4c2   : > { %2198 = vmatmul.bf16.vlgmr.msrb.gmra.mxu3 %v1999_v50  ;;  %2211 = vmatmul.bf16.vlgmr.msrb.gmra.mxu0 %v1999_v50 }
 0x4c3   : > { %2496 = vmatpush.bf16.msra.mxu1 %v5169_v0  ;;  %2509 = vmatpush.bf16.msra.mxu2 %v5171_v37 }
 0x4c4   : > { %v1927_v51 = vpop.f32.mrf.mxu0  ;;  %2522 = vmatpush.bf16.msrb.mxu3 %v5179_v6  ;;  %2535 = vmatpush.bf16.msrb.mxu0 %v5181_v42 }
 0x4c7   : > { %2497 = vmatpush.bf16.msra.mxu1 %v5203_v11  ;;  %2510 = vmatpush.bf16.msra.mxu2 %v5205_v23 }
 0x4c8   : > { %2523 = vmatpush.bf16.msrb.mxu3 %v5215_v25  ;;  %2536 = vmatpush.bf16.msrb.mxu0 %v5217_v43 }
 0x4cb   : > { %2498 = vmatpush.bf16.msra.mxu1 %v5239_v31  ;;  %2511 = vmatpush.bf16.msra.mxu2 %v5241_v32 }
 0x4cc   : > { %2524 = vmatpush.bf16.msrb.mxu3 %v5245_v54  ;;  %2537 = vmatpush.bf16.msrb.mxu0 %v5247_v33 }
 0x4cf   : > { %2499 = vmatpush.bf16.msra.mxu1 %v5262_v34  ;;  %2512 = vmatpush.bf16.msra.mxu2 %v5273_v48 }
 0x4d0   : > { %2525 = vmatpush.bf16.msrb.mxu3 %v5275_v40  ;;  %2538 = vmatpush.bf16.msrb.mxu0 %v5284_v46 }
 0x4d1   : > { %2384 = vmatmul.bf16.vlgmr.msrb.gmra.mxu1 %v4287_v61  ;;  %2397 = vmatmul.bf16.vlgmr.msrb.gmra.mxu2 %v4287_v61 }
 0x4d2   : > { %2410 = vmatmul.bf16.vlgmr.msra.gmra.mxu3 %v4287_v61  ;;  %2423 = vmatmul.bf16.vlgmr.msra.gmra.mxu0 %v4287_v61 }
 0x4d3   : > { %2500 = vmatpush.bf16.msra.mxu1 %v5298_v62  ;;  %2513 = vmatpush.bf16.msra.mxu2 %v5309_v60 }
 0x4d4   : > { %2526 = vmatpush.bf16.msrb.mxu3 %v5311_v49  ;;  %2539 = vmatpush.bf16.msrb.mxu0 %v5320_v22 }
 0x4d7   : > { %2501 = vmatpush.bf16.msra.mxu1 %v5334_v4  ;;  %2514 = vmatpush.bf16.msra.mxu2 %v5345_v13 }
 0x4d8   : > { %2527 = vmatpush.bf16.msrb.mxu3 %v5347_v14  ;;  %2540 = vmatpush.bf16.msrb.mxu0 %v5359_v38 }
 0x4db   : > { %2502 = vmatpush.bf16.msra.mxu1 %v5372_v19  ;;  %2515 = vmatpush.bf16.msra.mxu2 %v5374_v17 }
 0x4dc   : > { %2528 = vmatpush.bf16.msrb.mxu3 %v5386_v29  ;;  %2541 = vmatpush.bf16.msrb.mxu0 %v5397_v26 }
 0x4df   : > { %2503 = vmatpush.bf16.msra.mxu1 %v5409_v30  ;;  %2516 = vmatpush.bf16.msra.mxu2 %v5422_v41 }
 0x4e0   : > { %2529 = vmatpush.bf16.msrb.mxu3 %v5424_v45  ;;  %2542 = vmatpush.bf16.msrb.mxu0 %v5427_v56 }
 0x4e3   : > { %2635 = vmatpush.bf16.msrb.mxu1 %v5169_v0  ;;  %2648 = vmatpush.bf16.msrb.mxu2 %v5171_v37 }
 0x4e4   : > { %2661 = vmatpush.bf16.msra.mxu3 %v5179_v6  ;;  %2674 = vmatpush.bf16.msra.mxu0 %v5181_v42 }
 0x4e7   : > { %2636 = vmatpush.bf16.msrb.mxu1 %v5203_v11  ;;  %2649 = vmatpush.bf16.msrb.mxu2 %v5205_v23 }
 0x4e8   : > { %2662 = vmatpush.bf16.msra.mxu3 %v5215_v25  ;;  %2675 = vmatpush.bf16.msra.mxu0 %v5217_v43 }
 0x4eb   : > { %2637 = vmatpush.bf16.msrb.mxu1 %v5239_v31  ;;  %2650 = vmatpush.bf16.msrb.mxu2 %v5241_v32 }
 0x4ec   : > { %2663 = vmatpush.bf16.msra.mxu3 %v5245_v54  ;;  %2676 = vmatpush.bf16.msra.mxu0 %v5247_v33 }
 0x4ef   : > { %2638 = vmatpush.bf16.msrb.mxu1 %v5262_v34  ;;  %2651 = vmatpush.bf16.msrb.mxu2 %v5273_v48 }
 0x4f0   : > { %2664 = vmatpush.bf16.msra.mxu3 %v5275_v40  ;;  %2677 = vmatpush.bf16.msra.mxu0 %v5284_v46 }
 0x4f3   : > { %2639 = vmatpush.bf16.msrb.mxu1 %v5298_v62  ;;  %2652 = vmatpush.bf16.msrb.mxu2 %v5309_v60 }
 0x4f4   : > { %2665 = vmatpush.bf16.msra.mxu3 %v5311_v49  ;;  %2678 = vmatpush.bf16.msra.mxu0 %v5320_v22 }
 0x4f7   : > { %2640 = vmatpush.bf16.msrb.mxu1 %v5334_v4  ;;  %2653 = vmatpush.bf16.msrb.mxu2 %v5345_v13 }
 0x4f8   : > { %2666 = vmatpush.bf16.msra.mxu3 %v5347_v14  ;;  %2679 = vmatpush.bf16.msra.mxu0 %v5359_v38 }
 0x4fb   : > { %2641 = vmatpush.bf16.msrb.mxu1 %v5372_v19  ;;  %2654 = vmatpush.bf16.msrb.mxu2 %v5374_v17 }
 0x4fc   : > { %2667 = vmatpush.bf16.msra.mxu3 %v5386_v29  ;;  %2680 = vmatpush.bf16.msra.mxu0 %v5397_v26 }
 0x4ff   : > { %2642 = vmatpush.bf16.msrb.mxu1 %v5409_v30  ;;  %2655 = vmatpush.bf16.msrb.mxu2 %v5422_v41 }
 0x500   : > { %2668 = vmatpush.bf16.msra.mxu3 %v5424_v45  ;;  %2681 = vmatpush.bf16.msra.mxu0 %v5427_v56 }
 0x53e   : > { %v2173_v61 = vpop.f32.mrf.mxu1 }
 0x53f   : > { %v2212_v3 = vpop.f32.mrf.mxu0  ;;  %v5510_v20 = vadd.f32 %v2173_v61, %v2000_v15 }
 0x544   : > { %v2186_v2 = vpop.f32.mrf.mxu2 }
 0x545   : > { %v2199_v8 = vpop.f32.mrf.mxu3  ;;  %v5513_v36 = vadd.f32 %v2186_v2, %v2001_v53 }
 0x546   : > { %v2175_v9 = vpop.f32.mrf.mxu1  ;;  %v5515_v35 = vadd.f32 %v2199_v8, %v2002_v27 }
 0x547   : > { %v2214_v63 = vpop.f32.mrf.mxu0 }
 0x54c   : > { %v2188_v18 = vpop.f32.mrf.mxu2 }
 0x54d   : > { %v2201_v52 = vpop.f32.mrf.mxu3 }
 0x54e   : > { %v2385_v24 = vpop.f32.mrf.mxu1 }
 0x54f   : > { %v2428_v44 = vadd.f32 %v2385_v24, %v5510_v20  ;;  %v2424_v12 = vpop.f32.mrf.mxu0  ;;  %v5519_v24 = vadd.f32 %v2212_v3, %v2003_v16 }
 0x551   : > { %v3871_v28 = vmul.f32 -1.442695, %v2428_v44  ;;  %v2431_v27 = vadd.f32 %v2424_v12, %v5519_v24 }
 0x553   : > { %4156 = vpow2.f32 %v3871_v28 }
 0x554   : > { %v2398_v55 = vpop.f32.mrf.mxu2 }
 0x555   : > { %v2429_v39 = vadd.f32 %v2398_v55, %v5513_v36  ;;  %v2411_v57 = vpop.f32.mrf.mxu3 }
 0x556   : > { %v2430_v59 = vadd.f32 %v2411_v57, %v5515_v35  ;;  %v2387_v21 = vpop.f32.mrf.mxu1 }
 0x557   : > { %v3872_v1 = vmul.f32 -1.442695, %v2429_v39  ;;  %v2426_v47 = vpop.f32.mrf.mxu0 }
 0x558   : > { %v3873_v50 = vmul.f32 -1.442695, %v2430_v59 }
 0x559   : > { %v4157_v51 = vpop.eup %4156  ;;  %4158 = vpow2.f32 %v3872_v1 }
 0x55a   : > { %v2441_v61 = vadd.f32 1.0, %v4157_v51  ;;  %4160 = vpow2.f32 %v3873_v50 }
 0x55c   : > { %4162 = vrcp.f32 %v2441_v61  ;;  %v2400_v58 = vpop.f32.mrf.mxu2  ;;  %v2455_v39 = vand.u32 2147483648, %v2441_v61  ;;  %vm2449_vm8 = vweird.f32 %v2441_v61  ;;  %v2453_v59 = vand.u32 2147483647, %v2441_v61 }
 0x55d   : > { %v2413_v2 = vpop.f32.mrf.mxu3 }
 0x55e   : > { %v2456_v51 = vor.u32 1.1754944e-38, %v2455_v39  ;;  %vm2454_vm11 = vcmp.eq.f32.partialorder %v2453_v59, 8.507059e+37 }
 0x55f   : > { %v4159_v8 = vpop.eup %4158 }
 0x560   : > { %v4161_v9 = vpop.eup %4160  ;;  %v2442_v63 = vadd.f32 1.0, %v4159_v8 }
 0x561   : > { %v2443_v15 = vadd.f32 1.0, %v4161_v9 }
 0x562   : > { %v4163_v10 = vpop.eup %4162  ;;  %4164 = vrcp.f32 %v2442_v63  ;;  %v2470_v1 = vand.u32 2147483648, %v2442_v63  ;;  %v2468_v3 = vand.u32 2147483647, %v2442_v63  ;;  %vm2464_vm12 = vweird.f32 %v2442_v63 }
 0x563   : > { %v2445_v18 = vmul.f32 %v4163_v10, %v2441_v61  ;;  %4166 = vrcp.f32 %v2443_v15  ;;  %vm2450_vm7 = vweird.f32 %v4163_v10  ;;  %vm2479_vm0 = vweird.f32 %v2443_v15 }
 0x564   : > { %vm2451_vm9 = vmor %vm2449_vm8, %vm2450_vm7  ;;  %4168 = vtanh.f32 %v2431_v27  ;;  %v2471_v7 = vor.u32 1.1754944e-38, %v2470_v1  ;;  %vm2469_vm14 = vcmp.eq.f32.partialorder %v2468_v3, 8.507059e+37  ;;  %v2485_v27 = vand.u32 2147483648, %v2443_v15 }
 0x565   : > { %v2446_v52 = vsub.f32 1.0, %v2445_v18 }
 0x567   : > { %v2447_v53 = vmul.f32 %v4163_v10, %v2446_v52 }
 0x568   : > { %v4165_v44 = vpop.eup %4164 }
 0x569   : > { %v4167_v28 = vpop.eup %4166  ;;  %v2448_v55 = vadd.f32 %v4163_v10, %v2447_v53  ;;  %v2460_v5 = vmul.f32 %v4165_v44, %v2442_v63  ;;  %vm2465_vm10 = vweird.f32 %v4165_v44 }
 0x56a   : > { %v2475_v57 = vmul.f32 %v4167_v28, %v2443_v15  ;;  %vm2466_vm13 = vmor %vm2464_vm12, %vm2465_vm10  ;;  %v4169_v9 = vpop.eup %4168  ;;  %vm2480_vm15 = vweird.f32 %v4167_v28 }
 0x56b   : > { %v2461_v21 = vsub.f32 1.0, %v2460_v5  ;;  %v2452_v47 = vsel %vm2451_vm9, %v4163_v10, %v2448_v55  ;;  %v2483_v55 = vand.u32 2147483647, %v2443_v15  ;;  %vm2481_vm1 = vmor %vm2479_vm0, %vm2480_vm15  ;;  %v2486_v5 = vor.u32 1.1754944e-38, %v2485_v27 }
 0x56c   : > { %v2476_v58 = vsub.f32 1.0, %v2475_v57  ;;  %v2457_v2 = vsel %vm2454_vm11, %v2456_v51, %v2452_v47 }
 0x56d   : > { %v2462_v50 = vmul.f32 %v4165_v44, %v2461_v21  ;;  %v2491_v18 = vmul.f32 %v4169_v9, %v2457_v2  ;;  %vm2484_vm2 = vcmp.eq.f32.partialorder %v2483_v55, 8.507059e+37 }
 0x56e   : > { %v2477_v16 = vmul.f32 %v4167_v28, %v2476_v58 }
 0x56f   : > { %v2463_v12 = vadd.f32 %v4165_v44, %v2462_v50 }
 0x570   : > { %v2478_v10 = vadd.f32 %v4167_v28, %v2477_v16 }
 0x571   : > { %v2467_v8 = vsel %vm2466_vm13, %v4165_v44, %v2463_v12 }
 0x572   : > { %v2472_v61 = vsel %vm2469_vm14, %v2471_v7, %v2467_v8  ;;  %v2482_v63 = vsel %vm2481_vm1, %v4167_v28, %v2478_v10 }
 0x573   : > { %v2490_v52 = vmul.f32 0.0, %v2472_v61  ;;  %v2487_v39 = vsel %vm2484_vm2, %v2486_v5, %v2482_v63 }
 0x575   : > { %v5522_v53 = vadd.f32 %v2491_v18, %v2490_v52 }
 0x577   : > { %4170 = vtanh.f32 %v5522_v53  ;;  %v2623_v61 = vrot.slane %v5522_v53, 7 }
 0x57d   : > { %v4171_v44 = vpop.eup %4170 }
 0x57e   : > { %v2494_v57 = vmul.f32 %v4171_v44, %v2487_v39 }
 0x580   : > { %v2495_v59 = vpack.c.bf16 %v2494_v57, %v2494_v57 }
 0x582   : > { %2504 = vmatmul.bf16.vlgmr.msra.gmra.mxu1 %v2495_v59  ;;  %2517 = vmatmul.bf16.vlgmr.msra.gmra.mxu2 %v2495_v59 }
 0x583   : > { %2530 = vmatmul.bf16.vlgmr.msrb.gmra.mxu3 %v2495_v59  ;;  %2543 = vmatmul.bf16.vlgmr.msrb.gmra.mxu0 %v2495_v59 }
 0x584   : > { %2773 = vmatpush.bf16.msra.mxu1 %v5169_v0  ;;  %2786 = vmatpush.bf16.msra.mxu2 %v5171_v37 }
 0x585   : > { %2799 = vmatpush.bf16.msrb.mxu3 %v5179_v6  ;;  %2812 = vmatpush.bf16.msrb.mxu0 %v5181_v42 }
 0x588   : > { %2774 = vmatpush.bf16.msra.mxu1 %v5203_v11  ;;  %2787 = vmatpush.bf16.msra.mxu2 %v5205_v23 }
 0x589   : > { %2800 = vmatpush.bf16.msrb.mxu3 %v5215_v25  ;;  %2813 = vmatpush.bf16.msrb.mxu0 %v5217_v43 }
 0x58c   : > { %2775 = vmatpush.bf16.msra.mxu1 %v5239_v31  ;;  %2788 = vmatpush.bf16.msra.mxu2 %v5241_v32 }
 0x58d   : > { %2801 = vmatpush.bf16.msrb.mxu3 %v5245_v54  ;;  %2814 = vmatpush.bf16.msrb.mxu0 %v5247_v33 }
 0x590   : > { %2776 = vmatpush.bf16.msra.mxu1 %v5262_v34  ;;  %2789 = vmatpush.bf16.msra.mxu2 %v5273_v48 }
 0x591   : > { %2802 = vmatpush.bf16.msrb.mxu3 %v5275_v40  ;;  %2815 = vmatpush.bf16.msrb.mxu0 %v5284_v46 }
 0x594   : > { %2777 = vmatpush.bf16.msra.mxu1 %v5298_v62  ;;  %2790 = vmatpush.bf16.msra.mxu2 %v5309_v60 }
 0x595   : > { %2803 = vmatpush.bf16.msrb.mxu3 %v5311_v49  ;;  %2816 = vmatpush.bf16.msrb.mxu0 %v5320_v22 }
 0x598   : > { %2778 = vmatpush.bf16.msra.mxu1 %v5334_v4  ;;  %2791 = vmatpush.bf16.msra.mxu2 %v5345_v13 }
 0x599   : > { %2804 = vmatpush.bf16.msrb.mxu3 %v5347_v14  ;;  %2817 = vmatpush.bf16.msrb.mxu0 %v5359_v38 }
 0x59c   : > { %2779 = vmatpush.bf16.msra.mxu1 %v5372_v19  ;;  %2792 = vmatpush.bf16.msra.mxu2 %v5374_v17 }
 0x59d   : > { %2805 = vmatpush.bf16.msrb.mxu3 %v5386_v29  ;;  %2818 = vmatpush.bf16.msrb.mxu0 %v5397_v26 }
 0x5a0   : > { %2780 = vmatpush.bf16.msra.mxu1 %v5409_v30  ;;  %2793 = vmatpush.bf16.msra.mxu2 %v5422_v41 }
 0x5a1   : > { %2806 = vmatpush.bf16.msrb.mxu3 %v5424_v45  ;;  %2819 = vmatpush.bf16.msrb.mxu0 %v5427_v56 }
 0x5ff   : > { %v2505_v0 = vpop.f32.mrf.mxu1 }
 0x600   : > { %v2552_v37 = vrot.slane %v2505_v0, 7  ;;  %v2544_v6 = vpop.f32.mrf.mxu0 }
 0x601   : > { %v2555_v17 = vrot.slane %v2544_v6, 7 }
 0x602   : > { %v2560_v42 = vadd.f32 %v2552_v37, %v5510_v20 }
 0x603   : > { %v2563_v41 = vadd.f32 %v2555_v17, %v5519_v24 }
 0x604   : > { %v3874_v11 = vmul.f32 -1.442695, %v2560_v42 }
 0x605   : > { %v2518_v23 = vpop.f32.mrf.mxu2 }
 0x606   : > { %4172 = vpow2.f32 %v3874_v11  ;;  %v2553_v25 = vrot.slane %v2518_v23, 7  ;;  %v2531_v43 = vpop.f32.mrf.mxu3  ;;  %v4222_v11 = vld [vmem:[%s4588_s28] sm:$0x1]  ;;  %s253_s28 = sand.u32 1, %s4277_s22  }
 0x607   : > { %v2554_v31 = vrot.slane %v2531_v43, 7  ;;  %v2507_v32 = vpop.f32.mrf.mxu1  ;;  %v2926_v23 = vpack.c.bf16 %v4222_v11, %v4222_v11  ;;  %s254_s16 = scalar_lea.vmem [#allocation2], %s253_s28  ;;  %s3075_s19 = scalar_lea.sflag [#allocation3], %s253_s28 }
 0x608   : > { %v2561_v54 = vadd.f32 %v2553_v25, %v5513_v36  ;;  %v2546_v33 = vpop.f32.mrf.mxu0  ;;  %s3085_s17 = sshll.u32 %s254_s16, 4  ;;  %s3086_s17 = int_to_ptr.vmem [resolvable:$true] %s3085_s17 }
 0x609   : > { %v2562_v34 = vadd.f32 %v2554_v31, %v5515_v35  ;;  %2929 = vrot.lane.b32.xlu1 %v2926_v23, %s4288_s12 }
 0x60a   : > { %v3875_v48 = vmul.f32 -1.442695, %v2561_v54 }
 0x60b   : > { %v3876_v40 = vmul.f32 -1.442695, %v2562_v34 }
 0x60c   : > { %v4173_v46 = vpop.eup %4172  ;;  %4174 = vpow2.f32 %v3875_v48 }
 0x60d   : > { %v2573_v62 = vadd.f32 1.0, %v4173_v46  ;;  %4176 = vpow2.f32 %v3876_v40  ;;  %v2520_v60 = vpop.f32.mrf.mxu2 }
 0x60e   : > { %v2533_v49 = vpop.f32.mrf.mxu3 }
 0x60f   : > { %4178 = vrcp.f32 %v2573_v62  ;;  %v2587_v28 = vand.u32 2147483648, %v2573_v62  ;;  %vm2581_vm5 = vweird.f32 %v2573_v62  ;;  %v2585_v1 = vand.u32 2147483647, %v2573_v62 }
 0x611   : > { %v2588_v12 = vor.u32 1.1754944e-38, %v2587_v28  ;;  %vm2586_vm8 = vcmp.eq.f32.partialorder %v2585_v1, 8.507059e+37 }
 0x612   : > { %v4175_v22 = vpop.eup %4174 }
 0x613   : > { %v4177_v4 = vpop.eup %4176  ;;  %v2574_v13 = vadd.f32 1.0, %v4175_v22 }
 0x614   : > { %v2575_v14 = vadd.f32 1.0, %v4177_v4 }
 0x615   : > { %v4179_v38 = vpop.eup %4178  ;;  %4180 = vrcp.f32 %v2574_v13  ;;  %v2602_v50 = vand.u32 2147483648, %v2574_v13  ;;  %v2600_v58 = vand.u32 2147483647, %v2574_v13  ;;  %vm2596_vm9 = vweird.f32 %v2574_v13 }
 0x616   : > { %v2577_v19 = vmul.f32 %v4179_v38, %v2573_v62  ;;  %4182 = vrcp.f32 %v2575_v14  ;;  %vm2582_vm3 = vweird.f32 %v4179_v38  ;;  %v2617_v44 = vand.u32 2147483648, %v2575_v14 }
 0x617   : > { %vm2583_vm6 = vmor %vm2581_vm5, %vm2582_vm3  ;;  %4184 = vtanh.f32 %v2563_v41  ;;  %v2603_v9 = vor.u32 1.1754944e-38, %v2602_v50  ;;  %vm2601_vm11 = vcmp.eq.f32.partialorder %v2600_v58, 8.507059e+37  ;;  %vm2611_vm13 = vweird.f32 %v2575_v14 }
 0x618   : > { %v2578_v29 = vsub.f32 1.0, %v2577_v19  ;;  %v2615_v39 = vand.u32 2147483647, %v2575_v14  ;;  %v2618_v53 = vor.u32 1.1754944e-38, %v2617_v44 }
 0x61a   : > { %v2579_v26 = vmul.f32 %v4179_v38, %v2578_v29  ;;  %vm2616_vm15 = vcmp.eq.f32.partialorder %v2615_v39, 8.507059e+37 }
 0x61b   : > { %v4181_v30 = vpop.eup %4180 }
 0x61c   : > { %v4183_v45 = vpop.eup %4182  ;;  %v2580_v56 = vadd.f32 %v4179_v38, %v2579_v26  ;;  %v2592_v15 = vmul.f32 %v4181_v30, %v2574_v13  ;;  %vm2597_vm7 = vweird.f32 %v4181_v30 }
 0x61d   : > { %v2607_v21 = vmul.f32 %v4183_v45, %v2575_v14  ;;  %vm2598_vm10 = vmor %vm2596_vm9, %vm2597_vm7  ;;  %v4185_v18 = vpop.eup %4184  ;;  %vm2612_vm12 = vweird.f32 %v4183_v45 }
 0x61e   : > { %v2593_v47 = vsub.f32 1.0, %v2592_v15  ;;  %v2584_v3 = vsel %vm2583_vm6, %v4179_v38, %v2580_v56  ;;  %vm2613_vm14 = vmor %vm2611_vm13, %vm2612_vm12  ;;  %vm2931_vm13 = vcmask 64512  }
 0x61f   : > { %v2608_v2 = vsub.f32 1.0, %v2607_v21  ;;  %v2589_v8 = vsel %vm2586_vm8, %v2588_v12, %v2584_v3 }
 0x620   : > { %v2594_v51 = vmul.f32 %v4181_v30, %v2593_v47  ;;  %v2626_v27 = vmul.f32 %v4185_v18, %v2589_v8 }
 0x621   : > { %v2609_v10 = vmul.f32 %v4183_v45, %v2608_v2 }
 0x622   : > { %v2595_v7 = vadd.f32 %v4181_v30, %v2594_v51 }
 0x623   : > { %v2610_v5 = vadd.f32 %v4183_v45, %v2609_v10 }
 0x624   : > { %v2599_v16 = vsel %vm2598_vm10, %v4181_v30, %v2595_v7 }
 0x625   : > { %v2604_v52 = vsel %vm2601_vm11, %v2603_v9, %v2599_v16  ;;  %v2614_v57 = vsel %vm2613_vm14, %v4183_v45, %v2610_v5 }
 0x626   : > { %v2625_v55 = vmul.f32 %v2623_v61, %v2604_v52  ;;  %v2619_v0 = vsel %vm2616_vm15, %v2618_v53, %v2614_v57 }
 0x628   : > { %v5562_v63 = vadd.f32 %v2626_v27, %v2625_v55 }
 0x62a   : > { %4186 = vtanh.f32 %v5562_v63  ;;  %v2762_v5 = vrot.slane %v5562_v63, 7 }
 0x630   : > { %v4187_v59 = vpop.eup %4186 }
 0x631   : > { %v2629_v37 = vmul.f32 %v4187_v59, %v2619_v0 }
 0x633   : > { %v2630_v6 = vpack.c.bf16 %v2629_v37, %v2629_v37 }
 0x635   : > { %v2632_v42 = vshrl.u32 %v2630_v6, 16 }
 0x637   : > { %2643 = vmatmul.bf16.vlgmr.msrb.gmra.mxu1 %v2632_v42  ;;  %2656 = vmatmul.bf16.vlgmr.msrb.gmra.mxu2 %v2632_v42 }
 0x638   : > { %2669 = vmatmul.bf16.vlgmr.msra.gmra.mxu3 %v2632_v42  ;;  %2682 = vmatmul.bf16.vlgmr.msra.gmra.mxu0 %v2632_v42 }
 0x6b4   : > { %v2644_v25 = vpop.f32.mrf.mxu1 }
 0x6b5   : > { %v2691_v43 = vrot.slane %v2644_v25, 6  ;;  %v2683_v31 = vpop.f32.mrf.mxu0 }
 0x6b6   : > { %v2694_v56 = vrot.slane %v2683_v31, 6 }
 0x6b7   : > { %v2699_v32 = vadd.f32 %v2691_v43, %v5510_v20 }
 0x6b8   : > { %v2702_v1 = vadd.f32 %v2694_v56, %v5519_v24 }
 0x6b9   : > { %v3877_v54 = vmul.f32 -1.442695, %v2699_v32 }
 0x6ba   : > { %v2657_v33 = vpop.f32.mrf.mxu2 }
 0x6bb   : > { %4188 = vpow2.f32 %v3877_v54  ;;  %v2692_v34 = vrot.slane %v2657_v33, 6  ;;  %v2670_v48 = vpop.f32.mrf.mxu3  ;;  %v4105_v54 = vld [vmem:[%s5669_s5 + $0x38] sm:$0xff]  ;;  %v4104_v33 = vld [vmem:[%s5669_s5 + $0x30] sm:$0xff] }
 0x6bc   : > { %v2693_v40 = vrot.slane %v2670_v48, 6  ;;  %v2646_v46 = vpop.f32.mrf.mxu1  ;;  %3004 = vmatpush.bf16.msrb.mxu2 %v4105_v54 }
 0x6bd   : > { %v2700_v62 = vadd.f32 %v2692_v34, %v5513_v36  ;;  %v2685_v60 = vpop.f32.mrf.mxu0 }
 0x6be   : > { %v2701_v49 = vadd.f32 %v2693_v40, %v5515_v35 }
 0x6bf   : > { %v3878_v22 = vmul.f32 -1.442695, %v2700_v62  ;;  %v4103_v62 = vld [vmem:[%s5669_s5 + $0x28] sm:$0xff] }
 0x6c0   : > { %v3879_v4 = vmul.f32 -1.442695, %v2701_v49  ;;  %3005 = vmatpush.bf16.msrb.mxu2 %v4104_v33 }
 0x6c1   : > { %v4189_v13 = vpop.eup %4188  ;;  %4190 = vpow2.f32 %v3878_v22 }
 0x6c2   : > { %v2712_v14 = vadd.f32 1.0, %v4189_v13  ;;  %4192 = vpow2.f32 %v3879_v4  ;;  %v2659_v38 = vpop.f32.mrf.mxu2  ;;  %v4102_v13 = vld [vmem:[%s5669_s5 + $0x20] sm:$0xff] }
 0x6c3   : > { %v2672_v19 = vpop.f32.mrf.mxu3 }
 0x6c4   : > { %4194 = vrcp.f32 %v2712_v14  ;;  %v2726_v51 = vand.u32 2147483648, %v2712_v14  ;;  %vm2720_vm1 = vweird.f32 %v2712_v14  ;;  %v2724_v12 = vand.u32 2147483647, %v2712_v14  ;;  %3006 = vmatpush.bf16.msrb.mxu2 %v4103_v62 }
 0x6c6   : > { %v2727_v16 = vor.u32 1.1754944e-38, %v2726_v51  ;;  %vm2725_vm5 = vcmp.eq.f32.partialorder %v2724_v12, 8.507059e+37  ;;  %v2923_v51 = vld [vmem:[%s5669_s5 + $0x40] sm:$0xf] }
 0x6c7   : > { %v4191_v17 = vpop.eup %4190 }
 0x6c8   : > { %v4193_v29 = vpop.eup %4192  ;;  %v2713_v26 = vadd.f32 1.0, %v4191_v17  ;;  %3007 = vmatpush.bf16.msrb.mxu2 %v4102_v13 }
 0x6c9   : > { %v2714_v30 = vadd.f32 1.0, %v4193_v29 }
 0x6ca   : > { %v4195_v41 = vpop.eup %4194  ;;  %4196 = vrcp.f32 %v2713_v26  ;;  %v2741_v7 = vand.u32 2147483648, %v2713_v26  ;;  %v2739_v61 = vand.u32 2147483647, %v2713_v26  ;;  %vm2735_vm6 = vweird.f32 %v2713_v26 }
 0x6cb   : > { %v2716_v45 = vmul.f32 %v4195_v41, %v2712_v14  ;;  %4198 = vrcp.f32 %v2714_v30  ;;  %vm2721_vm0 = vweird.f32 %v4195_v41  ;;  %v2756_v6 = vand.u32 2147483648, %v2714_v30 }
 0x6cc   : > { %vm2722_vm2 = vmor %vm2720_vm1, %vm2721_vm0  ;;  %4200 = vtanh.f32 %v2702_v1  ;;  %v2742_v27 = vor.u32 1.1754944e-38, %v2741_v7  ;;  %vm2740_vm8 = vcmp.eq.f32.partialorder %v2739_v61, 8.507059e+37  ;;  %vm2750_vm10 = vweird.f32 %v2714_v30 }
 0x6cd   : > { %v2717_v15 = vsub.f32 1.0, %v2716_v45  ;;  %v2754_v42 = vand.u32 2147483647, %v2714_v30  ;;  %v2757_v23 = vor.u32 1.1754944e-38, %v2756_v6  ;;  %v4100_v45 = vld [vmem:[%s5669_s5 + $0x10] sm:$0xff]  ;;  %v2936_v7 = vsel %vm1824_vm4, %v2923_v51, 0 }
 0x6ce   : > { %2945 = vmatpush.bf16.msrb.mxu1 %v2936_v7 }
 0x6cf   : > { %v2718_v28 = vmul.f32 %v4195_v41, %v2717_v15  ;;  %vm2755_vm12 = vcmp.eq.f32.partialorder %v2754_v42, 8.507059e+37 }
 0x6d0   : > { %v4197_v21 = vpop.eup %4196 }
 0x6d1   : > { %v4199_v47 = vpop.eup %4198  ;;  %v2719_v50 = vadd.f32 %v4195_v41, %v2718_v28  ;;  %v2731_v3 = vmul.f32 %v4197_v21, %v2713_v26  ;;  %vm2736_vm3 = vweird.f32 %v4197_v21  ;;  %v4099_v28 = vld [vmem:[%s5669_s5 + $0x8] sm:$0xff] }
 0x6d2   : > { %v2746_v58 = vmul.f32 %v4199_v47, %v2714_v30  ;;  %vm2737_vm7 = vmor %vm2735_vm6, %vm2736_vm3  ;;  %v4201_v44 = vpop.eup %4200  ;;  %vm2751_vm9 = vweird.f32 %v4199_v47 }
 0x6d3   : > { %v2732_v2 = vsub.f32 1.0, %v2731_v3  ;;  %v2723_v8 = vsel %vm2722_vm2, %v4195_v41, %v2719_v50  ;;  %vm2752_vm11 = vmor %vm2750_vm10, %vm2751_vm9  ;;  %v4098_v50 = vld [vmem:[%s5669_s5] sm:$0xff]  ;;  %vm3054_vm10 = vcmask 523264  }
 0x6d4   : > { %v2747_v18 = vsub.f32 1.0, %v2746_v58  ;;  %v2728_v10 = vsel %vm2725_vm5, %v2727_v16, %v2723_v8  ;;  %v2930_v8 = vpop.permute.xlu1 %2929 }
 0x6d5   : > { %v2733_v9 = vmul.f32 %v4197_v21, %v2732_v2  ;;  %v2765_v53 = vmul.f32 %v4201_v44, %v2728_v10 }
 0x6d6   : > { %v2748_v57 = vmul.f32 %v4199_v47, %v2747_v18 }
 0x6d7   : > { %v2734_v52 = vadd.f32 %v4197_v21, %v2733_v9  ;;  %v4109_v9 = vld [vmem:[%s5669_s5 + $0x60] sm:$0xff] }
 0x6d8   : > { %v2749_v37 = vadd.f32 %v4199_v47, %v2748_v57  ;;  %3062 = vmatpush.bf16.msra.mxu3 %v4109_v9 }
 0x6d9   : > { %v2738_v55 = vsel %vm2737_vm7, %v4197_v21, %v2734_v52  ;;  %v4108_v52 = vld [vmem:[%s5669_s5 + $0x58] sm:$0xff] }
 0x6da   : > { %v2743_v39 = vsel %vm2740_vm8, %v2742_v27, %v2738_v55  ;;  %v2753_v11 = vsel %vm2752_vm11, %v4199_v47, %v2749_v37  ;;  %vm3072_vm11 = vcmask 16384  }
 0x6db   : > { %v2764_v59 = vmul.f32 %v2762_v5, %v2743_v39  ;;  %v2758_v63 = vsel %vm2755_vm12, %v2757_v23, %v2753_v11 }
 0x6dc   : > { %3063 = vmatpush.bf16.msra.mxu3 %v4108_v52 }
 0x6dd   : > { %v5571_v0 = vadd.f32 %v2765_v53, %v2764_v59 }
 0x6df   : > { %4202 = vtanh.f32 %v5571_v0 }
 0x6e5   : > { %v4203_v25 = vpop.eup %4202 }
 0x6e6   : > { %v2768_v43 = vmul.f32 %v4203_v25, %v2758_v63 }
 0x6e8   : > { %v2769_v31 = vpack.c.bf16 %v2768_v43, %v2768_v43  ;;  %v2900_v43 = vrot.slane %v5571_v0, 7 }
 0x6ea   : > { %v2771_v32 = vrot.slane %v2769_v31, 1 }
 0x6ec   : > { %2781 = vmatmul.bf16.vlgmr.msra.gmra.mxu1 %v2771_v32  ;;  %2794 = vmatmul.bf16.vlgmr.msra.gmra.mxu2 %v2771_v32 }
 0x6ed   : > { %2807 = vmatmul.bf16.vlgmr.msrb.gmra.mxu3 %v2771_v32  ;;  %2820 = vmatmul.bf16.vlgmr.msrb.gmra.mxu0 %v2771_v32 }
 0x6fc   : > { %3883 = vmatmul.msk.bf16.vlgmr.msrb.gmra.mxu1 %vm2931_vm13, %v2930_v8 }
 0x769   : > { %v2782_v34 = vpop.f32.mrf.mxu1 }
 0x76a   : > { %v2829_v48 = vrot.slane %v2782_v34, 5  ;;  %v2821_v40 = vpop.f32.mrf.mxu0 }
 0x76b   : > { %v2832_v12 = vrot.slane %v2821_v40, 5 }
 0x76c   : > { %v2837_v46 = vadd.f32 %v2829_v48, %v5510_v20  ;;  %v4101_v20 = vld [vmem:[%s5669_s5 + $0x18] sm:$0xff] }
 0x76d   : > { %3008 = vmatpush.bf16.msrb.mxu2 %v4101_v20  ;;  %v2840_v18 = vadd.f32 %v2832_v12, %v5519_v24 }
 0x76e   : > { %v3880_v60 = vmul.f32 -1.442695, %v2837_v46 }
 0x76f   : > { %v2795_v49 = vpop.f32.mrf.mxu2 }
 0x770   : > { %4204 = vpow2.f32 %v3880_v60  ;;  %v2830_v22 = vrot.slane %v2795_v49, 5  ;;  %v2808_v4 = vpop.f32.mrf.mxu3 }
 0x771   : > { %v2831_v14 = vrot.slane %v2808_v4, 5  ;;  %v2784_v38 = vpop.f32.mrf.mxu1  ;;  %3009 = vmatpush.bf16.msrb.mxu2 %v4100_v45 }
 0x772   : > { %v2838_v19 = vadd.f32 %v2830_v22, %v5513_v36  ;;  %v2823_v17 = vpop.f32.mrf.mxu0 }
 0x773   : > { %v2839_v29 = vadd.f32 %v2831_v14, %v5515_v35  ;;  %v4107_v17 = vld [vmem:[%s5669_s5 + $0x50] sm:$0xff] }
 0x774   : > { %v3881_v26 = vmul.f32 -1.442695, %v2838_v19  ;;  %3064 = vmatpush.bf16.msra.mxu3 %v4107_v17 }
 0x775   : > { %v3882_v30 = vmul.f32 -1.442695, %v2839_v29  ;;  %3010 = vmatpush.bf16.msrb.mxu2 %v4099_v28  ;;  %v4106_v29 = vld [vmem:[%s5669_s5 + $0x48] sm:$0xff] }
 0x776   : > { %v4205_v41 = vpop.eup %4204  ;;  %4206 = vpow2.f32 %v3881_v26  ;;  %v2924_v26 = vld [vmem:[%s5669_s5 + $0x44] sm:$0x1] }
 0x777   : > { %v2850_v56 = vadd.f32 1.0, %v4205_v41  ;;  %4208 = vpow2.f32 %v3882_v30  ;;  %v2797_v36 = vpop.f32.mrf.mxu2  ;;  %v2925_v30 = vunpack.c.l.bf16 %v2924_v26 }
 0x778   : > { %v2810_v15 = vpop.f32.mrf.mxu3  ;;  %3065 = vmatpush.bf16.msra.mxu3 %v4106_v29 }
 0x779   : > { %4210 = vrcp.f32 %v2850_v56  ;;  %3011 = vmatpush.bf16.msrb.mxu2 %v4098_v50  ;;  %v2864_v5 = vand.u32 2147483648, %v2850_v56  ;;  %vm2858_vm4 = vweird.f32 %v2850_v56  ;;  %v2862_v39 = vand.u32 2147483647, %v2850_v56  ;;  %v2947_v19 = vpop.f32.mrf.mxu1 }
 0x77b   : > { %v2865_v6 = vor.u32 1.1754944e-38, %v2864_v5  ;;  %vm2863_vm1 = vcmp.eq.f32.partialorder %v2862_v39, 8.507059e+37 }
 0x77c   : > { %v4207_v35 = vpop.eup %4206 }
 0x77d   : > { %v4209_v21 = vpop.eup %4208  ;;  %v2851_v1 = vadd.f32 1.0, %v4207_v35  ;;  %v3027_v35 = vld [vmem:[%s5669_s5 + $0x68] sm:$0x1] }
 0x77e   : > { %v5598_v47 = vadd.f32 1.0, %v4209_v21  ;;  %v3028_v21 = vunpack.c.l.bf16 %v3027_v35 }
 0x77f   : > { %v4211_v3 = vpop.eup %4210  ;;  %4212 = vrcp.f32 %v2851_v1  ;;  %v2879_v53 = vand.u32 2147483648, %v2851_v1  ;;  %v2877_v37 = vand.u32 2147483647, %v2851_v1  ;;  %vm2873_vm2 = vweird.f32 %v2851_v1 }
 0x780   : > { %v2854_v58 = vmul.f32 %v4211_v3, %v2850_v56  ;;  %4214 = vrcp.f32 %v5598_v47  ;;  %vm2859_vm14 = vweird.f32 %v4211_v3  ;;  %v2894_v46 = vand.u32 2147483648, %v5598_v47 }
 0x781   : > { %vm2860_vm15 = vmor %vm2858_vm4, %vm2859_vm14  ;;  %4216 = vtanh.f32 %v2840_v18  ;;  %v2880_v25 = vor.u32 1.1754944e-38, %v2879_v53  ;;  %vm2878_vm5 = vcmp.eq.f32.partialorder %v2877_v37, 8.507059e+37  ;;  %vm2888_vm7 = vweird.f32 %v5598_v47  ;;  %v2949_v20 = vpop.f32.mrf.mxu1 }
 0x782   : > { %v2855_v2 = vsub.f32 1.0, %v2854_v58  ;;  %v2892_v62 = vand.u32 2147483647, %v5598_v47  ;;  %v2895_v49 = vor.u32 1.1754944e-38, %v2894_v46 }
 0x784   : > { %v2856_v61 = vmul.f32 %v4211_v3, %v2855_v2  ;;  %vm2893_vm9 = vcmp.eq.f32.partialorder %v2892_v62, 8.507059e+37 }
 0x785   : > { %v4213_v16 = vpop.eup %4212 }
 0x786   : > { %v4215_v10 = vpop.eup %4214  ;;  %v2857_v27 = vadd.f32 %v4211_v3, %v2856_v61  ;;  %v2869_v55 = vmul.f32 %v4213_v16, %v2851_v1  ;;  %vm2874_vm0 = vweird.f32 %v4213_v16 }
 0x787   : > { %v2884_v44 = vmul.f32 %v4215_v10, %v5598_v47  ;;  %vm2875_vm3 = vmor %vm2873_vm2, %vm2874_vm0  ;;  %v4217_v31 = vpop.eup %4216  ;;  %vm2889_vm6 = vweird.f32 %v4215_v10 }
 0x788   : > { %v2870_v57 = vsub.f32 1.0, %v2869_v55  ;;  %v2861_v24 = vsel %vm2860_vm15, %v4211_v3, %v2857_v27  ;;  %vm2890_vm8 = vmor %vm2888_vm7, %vm2889_vm6 }
 0x789   : > { %v2885_v42 = vsub.f32 1.0, %v2884_v44  ;;  %v2866_v23 = vsel %vm2863_vm1, %v2865_v6, %v2861_v24 }
 0x78a   : > { %v2871_v59 = vmul.f32 %v4213_v16, %v2870_v57  ;;  %v2903_v33 = vmul.f32 %v4217_v31, %v2866_v23 }
 0x78b   : > { %v2886_v54 = vmul.f32 %v4215_v10, %v2885_v42 }
 0x78c   : > { %v2872_v11 = vadd.f32 %v4213_v16, %v2871_v59 }
 0x78d   : > { %v2887_v40 = vadd.f32 %v4215_v10, %v2886_v54 }
 0x78e   : > { %v2876_v63 = vsel %vm2875_vm3, %v4213_v16, %v2872_v11 }
 0x78f   : > { %v2881_v32 = vsel %vm2878_vm5, %v2880_v25, %v2876_v63  ;;  %v2891_v60 = vsel %vm2890_vm8, %v4215_v10, %v2887_v40 }
 0x790   : > { %v2902_v34 = vmul.f32 %v2900_v43, %v2881_v32  ;;  %v2896_v22 = vsel %vm2893_vm9, %v2895_v49, %v2891_v60 }
 0x792   : > { %v2904_v48 = vadd.f32 %v2903_v33, %v2902_v34 }
 0x794   : > { %4218 = vtanh.f32 %v2904_v48 }
 0x79a   : > { %v4219_v0 = vpop.eup %4218 }
 0x79b   : > { %v2906_v4 = vmul.f32 %v4219_v0, %v2896_v22 }
 0x79d   : > { %v2927_v13 = vpack.c.bf16 %v2906_v4, %v2906_v4 }
 0x79f   : > { %v2952_v14 = vshrl.u32 %v2927_v13, 16 }
 0x7a1   : > { %v2954_v38 = vrot.slane %v2952_v14, 1 }
 0x7a3   : > { %3012 = vmatmul.bf16.vlgmr.msrb.gmra.mxu2 %v2954_v38 }
 0x826   : > { %v3013_v41 = vpop.f32.mrf.mxu2 }
 0x827   : > { %v3014_v45 = vadd.f32 %v3013_v41, %v2947_v19 }
 0x829   : > { %v3017_v56 = vadd.f32 %v3014_v45, %v2925_v30 }
 0x82b   : > { %v3018_v36 = vmax.f32 %v3017_v56, 0.0 }
 0x82d   : > { %v3029_v15 = vpack.c.bf16 %v3018_v36, %v3018_v36 }
 0x82e   : > { %v3015_v28 = vpop.f32.mrf.mxu2 }
 0x82f   : > { %3932 = vmatmul.msk.bf16.vlgmr.msra.gmra.mxu3 %vm3054_vm10, %v3029_v15 }
 0x8b2   : > { %v3067_v1 = vpop.f32.mrf.mxu3 }
 0x8b3   : > { %v3068_v47 = vadd.f32 %v3067_v1, %v3028_v21 }
 0x8b5   : > { %4220 = vtanh.f32 %v3068_v47 }
 0x8ba   : > { %v3069_v50 = vpop.f32.mrf.mxu3 }
 0x8bb   : > { %v4221_v3 = vpop.eup %4220 }
 0x8bc   : > { %3073 = vst.msk [vmem:[%s254_s16] sm:$0x1] %vm3072_vm11, %v4221_v3 }
 0x8bd   : > { %4250 = shalt.err (!%p4247_p3)
}
 0x8be   : > { %4110 = dma.vmem_to_hbm [thread:$0]  (%p4362_p5), %s3086_s17, 16, %s3088_s18, %s3075_s19  }
 0x8bf PF: > { %p4116_p4 = scmp.ge.s32.totalorder %s4285_s24, 2  ;;  %s3099_s12 = sand.u32 1, %s4273_s21  }
 0x8c0   : > { %s3100_s28 = scalar_lea.sflag [#allocation3], %s3099_s12 }
 0x8c1   : > { %p4113_p7 = pnand %p4116_p4, %p4366_p6 }
 0x8c3   : > { %p4114_p8 = pneg %p4113_p7 }
 0x8c5   : > { %4268 = dma.done.wait (%p4114_p8), %s3100_s28, 16  }
 0x8c6   : > { %4270 = vsyncadd (%p4114_p8), %s3100_s28, 4294967280  ;;  %p16_p9 = scmp.ge.s32.totalorder %s4349_s27, 4   ;;  %s5673_s21 = smov %s4277_s22 }
 0x8c7   : > { %s5674_s22 = smov %s4281_s23  ;;  %s5675_s23 = smov %s4360_s30 }
 0x8c8   : > { %s5676_s24 = smov %s4349_s27  ;;  %18 = sbr.rel (!%p16_p9) target bundleno = 3 (0x3), region = 82 }
 0x8cd   :  { %3105 = vsyncpa [#allocation3], 1 }
 0x8ce   :  { %3107 = vsyncpa [#allocation3 + $0x1], 1 }

</bundles_post_ra>
